<compile_context>
chip_gen: v6e
topology: v6e:2x2x1
jax: 0.10.0
libtpu: 0.0.40
codegen_flags: <defaults>
</compile_context>

<pallas_src>
import functools

import numpy as np
import jax
import jax.numpy as jnp
from jax import lax
from jax.scipy.linalg import block_diag
from jax.experimental import pallas as pl
from jax.experimental.pallas import tpu as pltpu


# ---------------------------------------------------------------------------
# Fused Pallas kernel (one grid step = bt batch elements)
# ---------------------------------------------------------------------------

def _lite_mla_fused_kernel(x_ref, wqkv_ref, comb_ref, wpw_ref, hmask_ref,
                           wproj_ref, bias_ref, o_ref, *,
                           dim, heads, ks, H, W, eps, bt):
    HW = H * W
    pad = ks // 2
    hd = heads * dim                       # channels per {Q,K,V} slab per branch
    center = pad * ks + pad                # tap with zero spatial shift

    # Weights loaded once per grid step (amortized over bt images).
    wqkv = wqkv_ref[...]                   # (c_qkv, Cin)   bf16
    wpw = wpw_ref[...]                     # (c_qkv, c_qkv) bf16
    hmask = hmask_ref[...]                 # (nh*dim, nh*dim) f32 block-diagonal ones
    hmask_bf = hmask.astype(jnp.bfloat16)
    wproj = wproj_ref[...]                 # (out_ch, nh*dim) f32, BN scale folded in
    bias = bias_ref[...]                   # (out_ch, 1) f32

    for bi in range(bt):
        x = x_ref[bi]                                                      # (Cin, HW) bf16

        # ---- qkv 1x1 conv (channels permuted to [Q|K|V] layout) -------------
        qkv = jnp.dot(wqkv, x, preferred_element_type=jnp.float32)         # (c_qkv, HW) f32

        # ---- aggreg[0] depthwise ks x ks conv, 'same' zero padding ----------
        # pltpu.roll along flattened spatial lanes; per-tap weight*mask is the
        # pre-folded comb table; single accumulator (12 vregs) keeps us well
        # inside the 64-vreg file.
        acc = qkv * comb_ref[center]                                        # (c_qkv, HW)
        idx = 0
        for dy in range(ks):
            for dx in range(ks):
                s = (dy - pad) * W + (dx - pad)
                if s != 0:
                    shifted = pltpu.roll(qkv, shift=(-s) % HW, axis=1)
                    acc = acc + shifted * comb_ref[idx]
                idx += 1

        # ---- aggreg[0] grouped 1x1 conv (block-diagonal dense weight) -------
        agg = jnp.dot(wpw, acc.astype(jnp.bfloat16),
                      preferred_element_type=jnp.float32)                   # (c_qkv, HW)

        # ---- relu linear attention, all nh = 2*heads heads at once ----------
        # Slab layout: rows 0..hd-1 = qkv-branch heads, hd..2hd-1 = agg-branch.
        q = jnp.maximum(jnp.concatenate([qkv[0:hd], agg[0:hd]], axis=0), 0.0)
        k = jnp.maximum(jnp.concatenate([qkv[hd:2 * hd], agg[hd:2 * hd]], axis=0), 0.0)
        v = jnp.concatenate([qkv[2 * hd:3 * hd], agg[2 * hd:3 * hd]], axis=0)

        q_bf = q.astype(jnp.bfloat16)
        # Gram over the spatial axis for all heads at once, then block-diag mask.
        kv = lax.dot_general(v.astype(jnp.bfloat16), k.astype(jnp.bfloat16),
                             (((1,), (1,)), ((), ())),
                             preferred_element_type=jnp.float32)            # (nhd, nhd)
        kv_m = (kv * hmask).astype(jnp.bfloat16)
        num = jnp.dot(kv_m, q_bf, preferred_element_type=jnp.float32)       # (nhd, HW)
        ksum = jnp.sum(k, axis=1, keepdims=True)                            # (nhd, 1)
        den = jnp.dot(hmask_bf, (q * ksum).astype(jnp.bfloat16),
                      preferred_element_type=jnp.float32)                   # (nhd, HW), bcast per head
        att = num * pl.reciprocal(den + eps, approx=True)                   # f32

        # ---- proj 1x1 conv (BN scale folded into weight) + BN bias (f32) ----
        out = jnp.dot(wproj, att, preferred_element_type=jnp.float32) + bias
        o_ref[bi] = out.astype(o_ref.dtype)


# ---------------------------------------------------------------------------
# Parameters (deterministic synthetic init; shapes follow LiteMLA.__init__)
# ---------------------------------------------------------------------------

def init_params(key, in_ch, out_ch, dim, heads, scales):
    total_dim = heads * dim
    c_qkv = 3 * total_dim
    ks = scales[0]
    nh = heads * (1 + len(scales))
    k = jax.random.split(key, 8)
    p = {}
    # qkv: Conv2d(in_ch, 3*total_dim, 1, bias=False)  -> stored as (Cin, Cout)
    p["w_qkv"] = 0.2 * jax.random.normal(k[0], (in_ch, c_qkv), jnp.float32)
    # aggreg depthwise: Conv2d(c_qkv, c_qkv, ks, groups=c_qkv, bias=False) -> (ks, ks, C)
    p["w_dw"] = 0.2 * jax.random.normal(k[1], (ks, ks, c_qkv), jnp.float32)
    # aggreg pointwise: Conv2d(c_qkv, c_qkv, 1, groups=3*heads, bias=False)
    # stored exactly as its block-diagonal (Cin, Cout) dense equivalent.
    blocks = 0.2 * jax.random.normal(k[2], (3 * heads, dim, dim), jnp.float32)
    p["w_pw"] = block_diag(*[blocks[i] for i in range(3 * heads)])
    # proj: Conv2d(total_dim*(1+len(scales)), out_ch, 1, bias=False)
    p["w_proj"] = 0.2 * jax.random.normal(k[3], (nh * dim, out_ch), jnp.float32)
    # proj BatchNorm2d (eval mode, running statistics)
    p["bn_gamma"] = 1.0 + 0.1 * jax.random.normal(k[4], (out_ch,), jnp.float32)
    p["bn_beta"] = 0.1 * jax.random.normal(k[5], (out_ch,), jnp.float32)
    p["bn_mean"] = 0.05 * jax.random.normal(k[6], (out_ch,), jnp.float32)
    p["bn_var"] = 1.0 + 0.1 * jax.random.uniform(k[7], (out_ch,), jnp.float32)
    return p


# ---------------------------------------------------------------------------
# LiteMLA forward (single fused Pallas call)
# ---------------------------------------------------------------------------

def lite_mla_forward(x_nchw, p, *, dim, heads, scales, eps=1e-15, bn_eps=1e-5, bt=1):
    assert len(scales) == 1, "only one aggregation branch implemented"
    B, Cin, H, W = x_nchw.shape
    assert B % bt == 0
    HW = H * W
    ks = scales[0]
    total_dim = heads * dim
    c_qkv = 3 * total_dim
    nh = heads * (1 + len(scales))
    nhd = nh * dim
    out_ch = p["w_proj"].shape[1]
    pad = ks // 2

    # Channel permutation: per-head interleaved [q|k|v] -> grouped [Q_all|K_all|V_all]
    # (applied to the weights once, so the kernel needs no in-kernel reshuffling).
    perm = np.empty(c_qkv, dtype=np.int64)
    for which in range(3):
        for h in range(heads):
            for d in range(dim):
                perm[which * total_dim + h * dim + d] = h * 3 * dim + which * dim + d

    # Channels-first, spatial-flattened layout (B, C, H*W); bf16 for the MXU path.
    x_t = x_nchw.reshape(B, Cin, HW).astype(jnp.bfloat16)

    # Transposed / permuted weights, prepared once outside the kernel.
    wqkv_t = p["w_qkv"].T[perm].astype(jnp.bfloat16)               # (c_qkv, Cin)
    wdw_t = p["w_dw"].reshape(ks * ks, c_qkv).T[perm]              # (c_qkv, ks*ks) f32
    wpw_t = p["w_pw"].T[perm][:, perm].astype(jnp.bfloat16)        # (c_qkv, c_qkv)
    scale = p["bn_gamma"] / jnp.sqrt(p["bn_var"] + bn_eps)
    bias = (p["bn_beta"] - p["bn_mean"] * scale).reshape(out_ch, 1)
    wproj_t = (p["w_proj"].T * scale[:, None]).astype(jnp.float32)  # BN scale folded in

    # Depthwise 'same' zero-padding masks, pre-folded with the per-tap weights:
    # comb[tap, c, n] = w_dw[c, tap] * mask[tap, n]   (ks*ks, c_qkv, HW), ~1.2 MB f32.
    hh = np.arange(HW) // W
    ww = np.arange(HW) % W
    m = []
    for dy in range(ks):
        for dx in range(ks):
            m.append(((hh + dy - pad >= 0) & (hh + dy - pad < H) &
                      (ww + dx - pad >= 0) & (ww + dx - pad < W)).astype(np.float32))
    dw_mask = jnp.asarray(np.stack(m))                              # (ks*ks, HW)
    comb = wdw_t.T[:, :, None] * dw_mask[:, None, :]                # (ks*ks, c_qkv, HW)

    # Block-diagonal ones mask over heads for the batched attention matmuls.
    hmask = jnp.asarray(np.kron(np.eye(nh, dtype=np.float32),
                                np.ones((dim, dim), np.float32)))   # (nhd, nhd)

    kernel = functools.partial(_lite_mla_fused_kernel, dim=dim, heads=heads,
                               ks=ks, H=H, W=W, eps=eps, bt=bt)
    out = pl.pallas_call(
        kernel,
        out_shape=jax.ShapeDtypeStruct((B, out_ch, HW), jnp.float32),
        grid=(B // bt,),
        in_specs=[
            pl.BlockSpec((bt, Cin, HW), lambda b: (b, 0, 0)),
            pl.BlockSpec((c_qkv, Cin), lambda b: (0, 0)),
            pl.BlockSpec((ks * ks, c_qkv, HW), lambda b: (0, 0, 0)),
            pl.BlockSpec((c_qkv, c_qkv), lambda b: (0, 0)),
            pl.BlockSpec((nhd, nhd), lambda b: (0, 0)),
            pl.BlockSpec((out_ch, nhd), lambda b: (0, 0)),
            pl.BlockSpec((out_ch, 1), lambda b: (0, 0)),
        ],
        out_specs=pl.BlockSpec((bt, out_ch, HW), lambda b: (b, 0, 0)),
        compiler_params=pltpu.CompilerParams(dimension_semantics=("parallel",)),
    )(x_t, wqkv_t, comb, wpw_t, hmask, wproj_t, bias)

    return out.reshape(B, out_ch, H, W)                             # NCHW, free reshape


# ---------------------------------------------------------------------------
# Pure-JAX reference (numerical sanity check of the Pallas path)
# ---------------------------------------------------------------------------

def ref_forward(x_nchw, p, *, dim, heads, scales, eps=1e-15, bn_eps=1e-5):
    B, Cin, H, W = x_nchw.shape
    total_dim = heads * dim
    c_qkv = 3 * total_dim
    nh = heads * (1 + len(scales))
    hp = lax.Precision.HIGHEST

    x = jnp.transpose(x_nchw, (0, 2, 3, 1)).astype(jnp.float32)
    qkv = jnp.einsum("bhwc,cd->bhwd", x, p["w_qkv"], precision=hp)
    dw = lax.conv_general_dilated(
        qkv, p["w_dw"][:, :, None, :], (1, 1), "SAME",
        dimension_numbers=("NHWC", "HWIO", "NHWC"),
        feature_group_count=c_qkv, precision=hp)
    agg = jnp.einsum("bhwc,cd->bhwd", dw, p["w_pw"], precision=hp)
    multi = jnp.concatenate([qkv, agg], axis=-1)
    qkv4 = multi.reshape(B, H * W, nh, 3 * dim).transpose(0, 2, 1, 3)
    q = jax.nn.relu(qkv4[..., :dim])
    k = jax.nn.relu(qkv4[..., dim:2 * dim])
    v = qkv4[..., 2 * dim:]
    v1 = jnp.concatenate([v, jnp.ones(v.shape[:-1] + (1,), v.dtype)], axis=-1)
    kv = jnp.einsum("bhnd,bhne->bhde", k, v1, precision=hp)
    out = jnp.einsum("bhnd,bhde->bhne", q, kv, precision=hp)
    out = out[..., :dim] / (out[..., dim:] + eps)
    out = out.transpose(0, 2, 1, 3).reshape(B, H * W, nh * dim)
    scale = p["bn_gamma"] / jnp.sqrt(p["bn_var"] + bn_eps)
    bias = p["bn_beta"] - p["bn_mean"] * scale
    proj = jnp.einsum("bnc,cd->bnd", out, p["w_proj"], precision=hp) * scale + bias
    out_ch = p["w_proj"].shape[1]
    return proj.reshape(B, H, W, out_ch).transpose(0, 3, 1, 2)


# ---------------------------------------------------------------------------

if __name__ == "__main__":
    # LiteMLA(in_channels=16, out_channels=16, dim=8, scales=(5,)) ->
    #   heads = 16 // 8 = 2, total_dim = 16, qkv channels = 48, concat channels = 96
    in_ch, out_ch, dim, heads_ratio = 16, 16, 8, 1.0
    heads = int(in_ch // dim * heads_ratio)
    scales = (5,)
    B, H, W = 2, 16, 16

    key = jax.random.PRNGKey(0)
    kx, kp = jax.random.split(key)
    x = jax.random.normal(kx, (B, in_ch, H, W), jnp.float32)   # NCHW, PyTorch convention
    params = init_params(kp, in_ch, out_ch, dim, heads, scales)

    # bt=1 keeps the parallel grid extent even (2) so both v7x TensorCores get work;
    # on single-TC v5e/v6e, bt=B amortizes per-grid-step overhead instead.
    fwd = jax.jit(functools.partial(lite_mla_forward, dim=dim, heads=heads,
                                    scales=scales, bt=1))
    out = jax.block_until_ready(fwd(x, params))

    ref = ref_forward(x, params, dim=dim, heads=heads, scales=scales)
    assert out.shape == (B, out_ch, H, W), out.shape
    assert bool(jnp.all(jnp.isfinite(out)))
    max_err = float(jnp.max(jnp.abs(out - ref)))
    assert bool(jnp.allclose(out, ref, rtol=5e-2, atol=5e-2)), f"max_err={max_err}"

    print("KERNEL_OK")
</pallas_src>

<mosaic_0001>
module attributes {stable_mosaic.version = 11 : i64} {
  func.func @_lite_mla_fused_kernel(%arg0: i32, %arg1: memref<1x16x256xbf16, #tpu.memory_space<vmem>>, %arg2: memref<48x16xbf16, #tpu.memory_space<vmem>>, %arg3: memref<25x48x256xf32, #tpu.memory_space<vmem>>, %arg4: memref<48x48xbf16, #tpu.memory_space<vmem>>, %arg5: memref<32x32xf32, #tpu.memory_space<vmem>>, %arg6: memref<16x32xf32, #tpu.memory_space<vmem>>, %arg7: memref<16x1xf32, #tpu.memory_space<vmem>>, %arg8: memref<1x16x256xf32, #tpu.memory_space<vmem>>) attributes {dimension_semantics = [#tpu.dimension_semantics<parallel>], iteration_bounds = array<i64: 2>, scalar_prefetch = 0 : i64, scratch_operands = 0 : i64, tpu.core_type = #tpu.core_type<tc>, window_params = [{transform_indices = @transform_0, window_bounds = array<i64: 1, 16, 256>}, {pipeline_mode = #tpu.pipeline_mode<synchronous>, transform_indices = @transform_1, window_bounds = array<i64: 48, 16>}, {pipeline_mode = #tpu.pipeline_mode<synchronous>, transform_indices = @transform_2, window_bounds = array<i64: 25, 48, 256>}, {pipeline_mode = #tpu.pipeline_mode<synchronous>, transform_indices = @transform_3, window_bounds = array<i64: 48, 48>}, {pipeline_mode = #tpu.pipeline_mode<synchronous>, transform_indices = @transform_4, window_bounds = array<i64: 32, 32>}, {pipeline_mode = #tpu.pipeline_mode<synchronous>, transform_indices = @transform_5, window_bounds = array<i64: 16, 32>}, {pipeline_mode = #tpu.pipeline_mode<synchronous>, transform_indices = @transform_6, window_bounds = array<i64: 16, 1>}, {transform_indices = @transform_7, window_bounds = array<i64: 1, 16, 256>}]} {
    %c0 = arith.constant 0 : index
    %c0_0 = arith.constant 0 : index
    %0 = vector.load %arg2[%c0, %c0_0] : memref<48x16xbf16, #tpu.memory_space<vmem>>, vector<48x16xbf16>
    %c0_1 = arith.constant 0 : index
    %c0_2 = arith.constant 0 : index
    %1 = vector.load %arg4[%c0_1, %c0_2] : memref<48x48xbf16, #tpu.memory_space<vmem>>, vector<48x48xbf16>
    %c0_3 = arith.constant 0 : index
    %c0_4 = arith.constant 0 : index
    %2 = vector.load %arg5[%c0_3, %c0_4] : memref<32x32xf32, #tpu.memory_space<vmem>>, vector<32x32xf32>
    %3 = arith.truncf %2 : vector<32x32xf32> to vector<32x32xbf16>
    %c0_5 = arith.constant 0 : index
    %c0_6 = arith.constant 0 : index
    %4 = vector.load %arg6[%c0_5, %c0_6] : memref<16x32xf32, #tpu.memory_space<vmem>>, vector<16x32xf32>
    %c0_7 = arith.constant 0 : index
    %c0_8 = arith.constant 0 : index
    %5 = vector.load %arg7[%c0_7, %c0_8] : memref<16x1xf32, #tpu.memory_space<vmem>>, vector<16x1xf32>
    %c0_9 = arith.constant 0 : index
    %c0_10 = arith.constant 0 : index
    %c0_11 = arith.constant 0 : index
    %6 = vector.load %arg1[%c0_9, %c0_10, %c0_11] : memref<1x16x256xbf16, #tpu.memory_space<vmem>>, vector<1x16x256xbf16>
    %7 = vector.shape_cast %6 : vector<1x16x256xbf16> to vector<16x256xbf16>
    %cst = arith.constant dense<0.000000e+00> : vector<48x256xf32>
    %8 = tpu.matmul %0, %7, %cst {dimension_numbers = #tpu.dot_dimension_numbers<[1], [0], [0], [1], [0, 0, 1, 1], [], []>} : vector<48x16xbf16>, vector<16x256xbf16>, vector<48x256xf32> -> vector<48x256xf32>
    %c12 = arith.constant 12 : index
    %c0_12 = arith.constant 0 : index
    %c0_13 = arith.constant 0 : index
    %9 = vector.load %arg3[%c12, %c0_12, %c0_13] : memref<25x48x256xf32, #tpu.memory_space<vmem>>, vector<1x48x256xf32>
    %10 = vector.shape_cast %9 : vector<1x48x256xf32> to vector<48x256xf32>
    %11 = arith.mulf %8, %10 : vector<48x256xf32>
    %c34_i32 = arith.constant 34 : i32
    %12 = tpu.dynamic_rotate %8 by %c34_i32 dim 1 : vector<48x256xf32>, i32 -> vector<48x256xf32>
    %c0_14 = arith.constant 0 : index
    %c0_15 = arith.constant 0 : index
    %c0_16 = arith.constant 0 : index
    %13 = vector.load %arg3[%c0_14, %c0_15, %c0_16] : memref<25x48x256xf32, #tpu.memory_space<vmem>>, vector<1x48x256xf32>
    %14 = vector.shape_cast %13 : vector<1x48x256xf32> to vector<48x256xf32>
    %15 = arith.mulf %12, %14 : vector<48x256xf32>
    %16 = arith.addf %11, %15 : vector<48x256xf32>
    %c33_i32 = arith.constant 33 : i32
    %17 = tpu.dynamic_rotate %8 by %c33_i32 dim 1 : vector<48x256xf32>, i32 -> vector<48x256xf32>
    %c1 = arith.constant 1 : index
    %c0_17 = arith.constant 0 : index
    %c0_18 = arith.constant 0 : index
    %18 = vector.load %arg3[%c1, %c0_17, %c0_18] : memref<25x48x256xf32, #tpu.memory_space<vmem>>, vector<1x48x256xf32>
    %19 = vector.shape_cast %18 : vector<1x48x256xf32> to vector<48x256xf32>
    %20 = arith.mulf %17, %19 : vector<48x256xf32>
    %21 = arith.addf %16, %20 : vector<48x256xf32>
    %c32_i32 = arith.constant 32 : i32
    %22 = tpu.dynamic_rotate %8 by %c32_i32 dim 1 : vector<48x256xf32>, i32 -> vector<48x256xf32>
    %c2 = arith.constant 2 : index
    %c0_19 = arith.constant 0 : index
    %c0_20 = arith.constant 0 : index
    %23 = vector.load %arg3[%c2, %c0_19, %c0_20] : memref<25x48x256xf32, #tpu.memory_space<vmem>>, vector<1x48x256xf32>
    %24 = vector.shape_cast %23 : vector<1x48x256xf32> to vector<48x256xf32>
    %25 = arith.mulf %22, %24 : vector<48x256xf32>
    %26 = arith.addf %21, %25 : vector<48x256xf32>
    %c31_i32 = arith.constant 31 : i32
    %27 = tpu.dynamic_rotate %8 by %c31_i32 dim 1 : vector<48x256xf32>, i32 -> vector<48x256xf32>
    %c3 = arith.constant 3 : index
    %c0_21 = arith.constant 0 : index
    %c0_22 = arith.constant 0 : index
    %28 = vector.load %arg3[%c3, %c0_21, %c0_22] : memref<25x48x256xf32, #tpu.memory_space<vmem>>, vector<1x48x256xf32>
    %29 = vector.shape_cast %28 : vector<1x48x256xf32> to vector<48x256xf32>
    %30 = arith.mulf %27, %29 : vector<48x256xf32>
    %31 = arith.addf %26, %30 : vector<48x256xf32>
    %c30_i32 = arith.constant 30 : i32
    %32 = tpu.dynamic_rotate %8 by %c30_i32 dim 1 : vector<48x256xf32>, i32 -> vector<48x256xf32>
    %c4 = arith.constant 4 : index
    %c0_23 = arith.constant 0 : index
    %c0_24 = arith.constant 0 : index
    %33 = vector.load %arg3[%c4, %c0_23, %c0_24] : memref<25x48x256xf32, #tpu.memory_space<vmem>>, vector<1x48x256xf32>
    %34 = vector.shape_cast %33 : vector<1x48x256xf32> to vector<48x256xf32>
    %35 = arith.mulf %32, %34 : vector<48x256xf32>
    %36 = arith.addf %31, %35 : vector<48x256xf32>
    %c18_i32 = arith.constant 18 : i32
    %37 = tpu.dynamic_rotate %8 by %c18_i32 dim 1 : vector<48x256xf32>, i32 -> vector<48x256xf32>
    %c5 = arith.constant 5 : index
    %c0_25 = arith.constant 0 : index
    %c0_26 = arith.constant 0 : index
    %38 = vector.load %arg3[%c5, %c0_25, %c0_26] : memref<25x48x256xf32, #tpu.memory_space<vmem>>, vector<1x48x256xf32>
    %39 = vector.shape_cast %38 : vector<1x48x256xf32> to vector<48x256xf32>
    %40 = arith.mulf %37, %39 : vector<48x256xf32>
    %41 = arith.addf %36, %40 : vector<48x256xf32>
    %c17_i32 = arith.constant 17 : i32
    %42 = tpu.dynamic_rotate %8 by %c17_i32 dim 1 : vector<48x256xf32>, i32 -> vector<48x256xf32>
    %c6 = arith.constant 6 : index
    %c0_27 = arith.constant 0 : index
    %c0_28 = arith.constant 0 : index
    %43 = vector.load %arg3[%c6, %c0_27, %c0_28] : memref<25x48x256xf32, #tpu.memory_space<vmem>>, vector<1x48x256xf32>
    %44 = vector.shape_cast %43 : vector<1x48x256xf32> to vector<48x256xf32>
    %45 = arith.mulf %42, %44 : vector<48x256xf32>
    %46 = arith.addf %41, %45 : vector<48x256xf32>
    %c16_i32 = arith.constant 16 : i32
    %47 = tpu.dynamic_rotate %8 by %c16_i32 dim 1 : vector<48x256xf32>, i32 -> vector<48x256xf32>
    %c7 = arith.constant 7 : index
    %c0_29 = arith.constant 0 : index
    %c0_30 = arith.constant 0 : index
    %48 = vector.load %arg3[%c7, %c0_29, %c0_30] : memref<25x48x256xf32, #tpu.memory_space<vmem>>, vector<1x48x256xf32>
    %49 = vector.shape_cast %48 : vector<1x48x256xf32> to vector<48x256xf32>
    %50 = arith.mulf %47, %49 : vector<48x256xf32>
    %51 = arith.addf %46, %50 : vector<48x256xf32>
    %c15_i32 = arith.constant 15 : i32
    %52 = tpu.dynamic_rotate %8 by %c15_i32 dim 1 : vector<48x256xf32>, i32 -> vector<48x256xf32>
    %c8 = arith.constant 8 : index
    %c0_31 = arith.constant 0 : index
    %c0_32 = arith.constant 0 : index
    %53 = vector.load %arg3[%c8, %c0_31, %c0_32] : memref<25x48x256xf32, #tpu.memory_space<vmem>>, vector<1x48x256xf32>
    %54 = vector.shape_cast %53 : vector<1x48x256xf32> to vector<48x256xf32>
    %55 = arith.mulf %52, %54 : vector<48x256xf32>
    %56 = arith.addf %51, %55 : vector<48x256xf32>
    %c14_i32 = arith.constant 14 : i32
    %57 = tpu.dynamic_rotate %8 by %c14_i32 dim 1 : vector<48x256xf32>, i32 -> vector<48x256xf32>
    %c9 = arith.constant 9 : index
    %c0_33 = arith.constant 0 : index
    %c0_34 = arith.constant 0 : index
    %58 = vector.load %arg3[%c9, %c0_33, %c0_34] : memref<25x48x256xf32, #tpu.memory_space<vmem>>, vector<1x48x256xf32>
    %59 = vector.shape_cast %58 : vector<1x48x256xf32> to vector<48x256xf32>
    %60 = arith.mulf %57, %59 : vector<48x256xf32>
    %61 = arith.addf %56, %60 : vector<48x256xf32>
    %c2_i32 = arith.constant 2 : i32
    %62 = tpu.dynamic_rotate %8 by %c2_i32 dim 1 : vector<48x256xf32>, i32 -> vector<48x256xf32>
    %c10 = arith.constant 10 : index
    %c0_35 = arith.constant 0 : index
    %c0_36 = arith.constant 0 : index
    %63 = vector.load %arg3[%c10, %c0_35, %c0_36] : memref<25x48x256xf32, #tpu.memory_space<vmem>>, vector<1x48x256xf32>
    %64 = vector.shape_cast %63 : vector<1x48x256xf32> to vector<48x256xf32>
    %65 = arith.mulf %62, %64 : vector<48x256xf32>
    %66 = arith.addf %61, %65 : vector<48x256xf32>
    %c1_i32 = arith.constant 1 : i32
    %67 = tpu.dynamic_rotate %8 by %c1_i32 dim 1 : vector<48x256xf32>, i32 -> vector<48x256xf32>
    %c11 = arith.constant 11 : index
    %c0_37 = arith.constant 0 : index
    %c0_38 = arith.constant 0 : index
    %68 = vector.load %arg3[%c11, %c0_37, %c0_38] : memref<25x48x256xf32, #tpu.memory_space<vmem>>, vector<1x48x256xf32>
    %69 = vector.shape_cast %68 : vector<1x48x256xf32> to vector<48x256xf32>
    %70 = arith.mulf %67, %69 : vector<48x256xf32>
    %71 = arith.addf %66, %70 : vector<48x256xf32>
    %c255_i32 = arith.constant 255 : i32
    %72 = tpu.dynamic_rotate %8 by %c255_i32 dim 1 : vector<48x256xf32>, i32 -> vector<48x256xf32>
    %c13 = arith.constant 13 : index
    %c0_39 = arith.constant 0 : index
    %c0_40 = arith.constant 0 : index
    %73 = vector.load %arg3[%c13, %c0_39, %c0_40] : memref<25x48x256xf32, #tpu.memory_space<vmem>>, vector<1x48x256xf32>
    %74 = vector.shape_cast %73 : vector<1x48x256xf32> to vector<48x256xf32>
    %75 = arith.mulf %72, %74 : vector<48x256xf32>
    %76 = arith.addf %71, %75 : vector<48x256xf32>
    %c254_i32 = arith.constant 254 : i32
    %77 = tpu.dynamic_rotate %8 by %c254_i32 dim 1 : vector<48x256xf32>, i32 -> vector<48x256xf32>
    %c14 = arith.constant 14 : index
    %c0_41 = arith.constant 0 : index
    %c0_42 = arith.constant 0 : index
    %78 = vector.load %arg3[%c14, %c0_41, %c0_42] : memref<25x48x256xf32, #tpu.memory_space<vmem>>, vector<1x48x256xf32>
    %79 = vector.shape_cast %78 : vector<1x48x256xf32> to vector<48x256xf32>
    %80 = arith.mulf %77, %79 : vector<48x256xf32>
    %81 = arith.addf %76, %80 : vector<48x256xf32>
    %c242_i32 = arith.constant 242 : i32
    %82 = tpu.dynamic_rotate %8 by %c242_i32 dim 1 : vector<48x256xf32>, i32 -> vector<48x256xf32>
    %c15 = arith.constant 15 : index
    %c0_43 = arith.constant 0 : index
    %c0_44 = arith.constant 0 : index
    %83 = vector.load %arg3[%c15, %c0_43, %c0_44] : memref<25x48x256xf32, #tpu.memory_space<vmem>>, vector<1x48x256xf32>
    %84 = vector.shape_cast %83 : vector<1x48x256xf32> to vector<48x256xf32>
    %85 = arith.mulf %82, %84 : vector<48x256xf32>
    %86 = arith.addf %81, %85 : vector<48x256xf32>
    %c241_i32 = arith.constant 241 : i32
    %87 = tpu.dynamic_rotate %8 by %c241_i32 dim 1 : vector<48x256xf32>, i32 -> vector<48x256xf32>
    %c16 = arith.constant 16 : index
    %c0_45 = arith.constant 0 : index
    %c0_46 = arith.constant 0 : index
    %88 = vector.load %arg3[%c16, %c0_45, %c0_46] : memref<25x48x256xf32, #tpu.memory_space<vmem>>, vector<1x48x256xf32>
    %89 = vector.shape_cast %88 : vector<1x48x256xf32> to vector<48x256xf32>
    %90 = arith.mulf %87, %89 : vector<48x256xf32>
    %91 = arith.addf %86, %90 : vector<48x256xf32>
    %c240_i32 = arith.constant 240 : i32
    %92 = tpu.dynamic_rotate %8 by %c240_i32 dim 1 : vector<48x256xf32>, i32 -> vector<48x256xf32>
    %c17 = arith.constant 17 : index
    %c0_47 = arith.constant 0 : index
    %c0_48 = arith.constant 0 : index
    %93 = vector.load %arg3[%c17, %c0_47, %c0_48] : memref<25x48x256xf32, #tpu.memory_space<vmem>>, vector<1x48x256xf32>
    %94 = vector.shape_cast %93 : vector<1x48x256xf32> to vector<48x256xf32>
    %95 = arith.mulf %92, %94 : vector<48x256xf32>
    %96 = arith.addf %91, %95 : vector<48x256xf32>
    %c239_i32 = arith.constant 239 : i32
    %97 = tpu.dynamic_rotate %8 by %c239_i32 dim 1 : vector<48x256xf32>, i32 -> vector<48x256xf32>
    %c18 = arith.constant 18 : index
    %c0_49 = arith.constant 0 : index
    %c0_50 = arith.constant 0 : index
    %98 = vector.load %arg3[%c18, %c0_49, %c0_50] : memref<25x48x256xf32, #tpu.memory_space<vmem>>, vector<1x48x256xf32>
    %99 = vector.shape_cast %98 : vector<1x48x256xf32> to vector<48x256xf32>
    %100 = arith.mulf %97, %99 : vector<48x256xf32>
    %101 = arith.addf %96, %100 : vector<48x256xf32>
    %c238_i32 = arith.constant 238 : i32
    %102 = tpu.dynamic_rotate %8 by %c238_i32 dim 1 : vector<48x256xf32>, i32 -> vector<48x256xf32>
    %c19 = arith.constant 19 : index
    %c0_51 = arith.constant 0 : index
    %c0_52 = arith.constant 0 : index
    %103 = vector.load %arg3[%c19, %c0_51, %c0_52] : memref<25x48x256xf32, #tpu.memory_space<vmem>>, vector<1x48x256xf32>
    %104 = vector.shape_cast %103 : vector<1x48x256xf32> to vector<48x256xf32>
    %105 = arith.mulf %102, %104 : vector<48x256xf32>
    %106 = arith.addf %101, %105 : vector<48x256xf32>
    %c226_i32 = arith.constant 226 : i32
    %107 = tpu.dynamic_rotate %8 by %c226_i32 dim 1 : vector<48x256xf32>, i32 -> vector<48x256xf32>
    %c20 = arith.constant 20 : index
    %c0_53 = arith.constant 0 : index
    %c0_54 = arith.constant 0 : index
    %108 = vector.load %arg3[%c20, %c0_53, %c0_54] : memref<25x48x256xf32, #tpu.memory_space<vmem>>, vector<1x48x256xf32>
    %109 = vector.shape_cast %108 : vector<1x48x256xf32> to vector<48x256xf32>
    %110 = arith.mulf %107, %109 : vector<48x256xf32>
    %111 = arith.addf %106, %110 : vector<48x256xf32>
    %c225_i32 = arith.constant 225 : i32
    %112 = tpu.dynamic_rotate %8 by %c225_i32 dim 1 : vector<48x256xf32>, i32 -> vector<48x256xf32>
    %c21 = arith.constant 21 : index
    %c0_55 = arith.constant 0 : index
    %c0_56 = arith.constant 0 : index
    %113 = vector.load %arg3[%c21, %c0_55, %c0_56] : memref<25x48x256xf32, #tpu.memory_space<vmem>>, vector<1x48x256xf32>
    %114 = vector.shape_cast %113 : vector<1x48x256xf32> to vector<48x256xf32>
    %115 = arith.mulf %112, %114 : vector<48x256xf32>
    %116 = arith.addf %111, %115 : vector<48x256xf32>
    %c224_i32 = arith.constant 224 : i32
    %117 = tpu.dynamic_rotate %8 by %c224_i32 dim 1 : vector<48x256xf32>, i32 -> vector<48x256xf32>
    %c22 = arith.constant 22 : index
    %c0_57 = arith.constant 0 : index
    %c0_58 = arith.constant 0 : index
    %118 = vector.load %arg3[%c22, %c0_57, %c0_58] : memref<25x48x256xf32, #tpu.memory_space<vmem>>, vector<1x48x256xf32>
    %119 = vector.shape_cast %118 : vector<1x48x256xf32> to vector<48x256xf32>
    %120 = arith.mulf %117, %119 : vector<48x256xf32>
    %121 = arith.addf %116, %120 : vector<48x256xf32>
    %c223_i32 = arith.constant 223 : i32
    %122 = tpu.dynamic_rotate %8 by %c223_i32 dim 1 : vector<48x256xf32>, i32 -> vector<48x256xf32>
    %c23 = arith.constant 23 : index
    %c0_59 = arith.constant 0 : index
    %c0_60 = arith.constant 0 : index
    %123 = vector.load %arg3[%c23, %c0_59, %c0_60] : memref<25x48x256xf32, #tpu.memory_space<vmem>>, vector<1x48x256xf32>
    %124 = vector.shape_cast %123 : vector<1x48x256xf32> to vector<48x256xf32>
    %125 = arith.mulf %122, %124 : vector<48x256xf32>
    %126 = arith.addf %121, %125 : vector<48x256xf32>
    %c222_i32 = arith.constant 222 : i32
    %127 = tpu.dynamic_rotate %8 by %c222_i32 dim 1 : vector<48x256xf32>, i32 -> vector<48x256xf32>
    %c24 = arith.constant 24 : index
    %c0_61 = arith.constant 0 : index
    %c0_62 = arith.constant 0 : index
    %128 = vector.load %arg3[%c24, %c0_61, %c0_62] : memref<25x48x256xf32, #tpu.memory_space<vmem>>, vector<1x48x256xf32>
    %129 = vector.shape_cast %128 : vector<1x48x256xf32> to vector<48x256xf32>
    %130 = arith.mulf %127, %129 : vector<48x256xf32>
    %131 = arith.addf %126, %130 : vector<48x256xf32>
    %132 = arith.truncf %131 : vector<48x256xf32> to vector<48x256xbf16>
    %cst_63 = arith.constant dense<0.000000e+00> : vector<48x256xf32>
    %133 = tpu.matmul %1, %132, %cst_63 {dimension_numbers = #tpu.dot_dimension_numbers<[1], [0], [0], [1], [0, 0, 1, 1], [], []>} : vector<48x48xbf16>, vector<48x256xbf16>, vector<48x256xf32> -> vector<48x256xf32>
    %134 = vector.extract_strided_slice %8 {offsets = [0, 0], sizes = [16, 256], strides = [1, 1]} : vector<48x256xf32> to vector<16x256xf32>
    %135 = vector.extract_strided_slice %133 {offsets = [0, 0], sizes = [16, 256], strides = [1, 1]} : vector<48x256xf32> to vector<16x256xf32>
    %136 = tpu.concatenate %134, %135 in 0 : vector<16x256xf32>, vector<16x256xf32> -> vector<32x256xf32>
    %cst_64 = arith.constant 0.000000e+00 : f32
    %137 = vector.broadcast %cst_64 : f32 to vector<32x256xf32>
    %138 = arith.maximumf %136, %137 : vector<32x256xf32>
    %139 = vector.extract_strided_slice %8 {offsets = [16, 0], sizes = [16, 256], strides = [1, 1]} : vector<48x256xf32> to vector<16x256xf32>
    %140 = vector.extract_strided_slice %133 {offsets = [16, 0], sizes = [16, 256], strides = [1, 1]} : vector<48x256xf32> to vector<16x256xf32>
    %141 = tpu.concatenate %139, %140 in 0 : vector<16x256xf32>, vector<16x256xf32> -> vector<32x256xf32>
    %cst_65 = arith.constant 0.000000e+00 : f32
    %142 = vector.broadcast %cst_65 : f32 to vector<32x256xf32>
    %143 = arith.maximumf %141, %142 : vector<32x256xf32>
    %144 = vector.extract_strided_slice %8 {offsets = [32, 0], sizes = [16, 256], strides = [1, 1]} : vector<48x256xf32> to vector<16x256xf32>
    %145 = vector.extract_strided_slice %133 {offsets = [32, 0], sizes = [16, 256], strides = [1, 1]} : vector<48x256xf32> to vector<16x256xf32>
    %146 = tpu.concatenate %144, %145 in 0 : vector<16x256xf32>, vector<16x256xf32> -> vector<32x256xf32>
    %147 = arith.truncf %138 : vector<32x256xf32> to vector<32x256xbf16>
    %148 = arith.truncf %146 : vector<32x256xf32> to vector<32x256xbf16>
    %149 = arith.truncf %143 : vector<32x256xf32> to vector<32x256xbf16>
    %cst_66 = arith.constant dense<0.000000e+00> : vector<32x32xf32>
    %150 = tpu.matmul %148, %149, %cst_66 {dimension_numbers = #tpu.dot_dimension_numbers<[1], [1], [0], [0], [0, 0, 1, 0], [], []>} : vector<32x256xbf16>, vector<32x256xbf16>, vector<32x32xf32> -> vector<32x32xf32>
    %151 = arith.mulf %150, %2 : vector<32x32xf32>
    %152 = arith.truncf %151 : vector<32x32xf32> to vector<32x32xbf16>
    %cst_67 = arith.constant dense<0.000000e+00> : vector<32x256xf32>
    %153 = tpu.matmul %152, %147, %cst_67 {dimension_numbers = #tpu.dot_dimension_numbers<[1], [0], [0], [1], [0, 0, 1, 1], [], []>} : vector<32x32xbf16>, vector<32x256xbf16>, vector<32x256xf32> -> vector<32x256xf32>
    %cst_68 = arith.constant dense<0.000000e+00> : vector<32xf32>
    %154 = vector.multi_reduction <add>, %143, %cst_68 [1] : vector<32x256xf32> to vector<32xf32>
    %155 = vector.shape_cast %154 : vector<32xf32> to vector<32x1xf32>
    %156 = vector.broadcast %155 : vector<32x1xf32> to vector<32x256xf32>
    %157 = arith.mulf %138, %156 : vector<32x256xf32>
    %158 = arith.truncf %157 : vector<32x256xf32> to vector<32x256xbf16>
    %cst_69 = arith.constant dense<0.000000e+00> : vector<32x256xf32>
    %159 = tpu.matmul %3, %158, %cst_69 {dimension_numbers = #tpu.dot_dimension_numbers<[1], [0], [0], [1], [0, 0, 1, 1], [], []>} : vector<32x32xbf16>, vector<32x256xbf16>, vector<32x256xf32> -> vector<32x256xf32>
    %cst_70 = arith.constant 1.000000e-15 : f32
    %160 = vector.broadcast %cst_70 : f32 to vector<32x256xf32>
    %161 = arith.addf %159, %160 : vector<32x256xf32>
    %162 = tpu.reciprocal %161 {approx = true} : vector<32x256xf32> -> vector<32x256xf32>
    %163 = arith.mulf %153, %162 : vector<32x256xf32>
    %cst_71 = arith.constant dense<0.000000e+00> : vector<16x256xf32>
    %164 = tpu.matmul %4, %163, %cst_71 {dimension_numbers = #tpu.dot_dimension_numbers<[1], [0], [0], [1], [0, 0, 1, 1], [], []>} : vector<16x32xf32>, vector<32x256xf32>, vector<16x256xf32> -> vector<16x256xf32>
    %165 = vector.broadcast %5 : vector<16x1xf32> to vector<16x256xf32>
    %166 = arith.addf %164, %165 : vector<16x256xf32>
    %c0_72 = arith.constant 0 : index
    %c0_73 = arith.constant 0 : index
    %c0_74 = arith.constant 0 : index
    %167 = vector.load %arg8[%c0_72, %c0_73, %c0_74] : memref<1x16x256xf32, #tpu.memory_space<vmem>>, vector<1x16x256xf32>
    %168 = vector.shape_cast %167 : vector<1x16x256xf32> to vector<16x256xf32>
    %169 = vector.shape_cast %166 : vector<16x256xf32> to vector<1x16x256xf32>
    tpu.vector_store %arg8[%c0_72, %c0_73, %c0_74], %169 {strides = array<i32>} : memref<1x16x256xf32, #tpu.memory_space<vmem>>, vector<1x16x256xf32>,
    return
  }
  func.func @transform_0(%arg0: i32) -> (i32, i32, i32) {
    %c0_i32 = arith.constant 0 : i32
    %c0_i32_0 = arith.constant 0 : i32
    %c0_i32_1 = arith.constant 0 : i32
    return %arg0, %c0_i32, %c0_i32_0 : i32, i32, i32
  }
  func.func @transform_1(%arg0: i32) -> (i32, i32) {
    %c0_i32 = arith.constant 0 : i32
    %c0_i32_0 = arith.constant 0 : i32
    %c0_i32_1 = arith.constant 0 : i32
    return %c0_i32, %c0_i32_0 : i32, i32
  }
  func.func @transform_2(%arg0: i32) -> (i32, i32, i32) {
    %c0_i32 = arith.constant 0 : i32
    %c0_i32_0 = arith.constant 0 : i32
    %c0_i32_1 = arith.constant 0 : i32
    %c0_i32_2 = arith.constant 0 : i32
    return %c0_i32, %c0_i32_0, %c0_i32_1 : i32, i32, i32
  }
  func.func @transform_3(%arg0: i32) -> (i32, i32) {
    %c0_i32 = arith.constant 0 : i32
    %c0_i32_0 = arith.constant 0 : i32
    %c0_i32_1 = arith.constant 0 : i32
    return %c0_i32, %c0_i32_0 : i32, i32
  }
  func.func @transform_4(%arg0: i32) -> (i32, i32) {
    %c0_i32 = arith.constant 0 : i32
    %c0_i32_0 = arith.constant 0 : i32
    %c0_i32_1 = arith.constant 0 : i32
    return %c0_i32, %c0_i32_0 : i32, i32
  }
  func.func @transform_5(%arg0: i32) -> (i32, i32) {
    %c0_i32 = arith.constant 0 : i32
    %c0_i32_0 = arith.constant 0 : i32
    %c0_i32_1 = arith.constant 0 : i32
    return %c0_i32, %c0_i32_0 : i32, i32
  }
  func.func @transform_6(%arg0: i32) -> (i32, i32) {
    %c0_i32 = arith.constant 0 : i32
    %c0_i32_0 = arith.constant 0 : i32
    %c0_i32_1 = arith.constant 0 : i32
    return %c0_i32, %c0_i32_0 : i32, i32
  }
  func.func @transform_7(%arg0: i32) -> (i32, i32, i32) {
    %c0_i32 = arith.constant 0 : i32
    %c0_i32_0 = arith.constant 0 : i32
    %c0_i32_1 = arith.constant 0 : i32
    return %arg0, %c0_i32, %c0_i32_0 : i32, i32, i32
  }
}

</mosaic_0001>

<bundles_post_ra>
// kernel: lite_mla_forward.1
= control target key start
LH: loop header
LB: loop body
LE: loop exit
PB: predicated region body
PF: predicated region fallthrough
CT: control target
= control target key end

     0   :  { %s3148_s24 = smov 0   ;;  %s6582_s0 = inlined_call_operand.vmem [shape: bf16[2,16,256], index: 0, kind: input, shape index: {}]   ;;  %s6583_s1 = inlined_call_operand.vmem [shape: bf16[48,16], index: 1, kind: input, shape index: {}]   ;;  %s6584_s2 = inlined_call_operand.vmem [shape: f32[25,48,256], index: 2, kind: input, shape index: {}]   ;;  %s6585_s3 = inlined_call_operand.vmem [shape: bf16[48,48], index: 3, kind: input, shape index: {}]   ;;  %s6586_s4 = inlined_call_operand.vmem [shape: f32[32,32], index: 4, kind: input, shape index: {}]   ;;  %s6587_s5 = inlined_call_operand.vmem [shape: f32[16,32], index: 5, kind: input, shape index: {}]   ;;  %s6588_s6 = inlined_call_operand.vmem [shape: f32[16,1], index: 6, kind: input, shape index: {}]   ;;  %s6589_s7 = inlined_call_operand.vmem [shape: f32[2,16,256], index: 7, kind: output, shape index: {}]  }
   0x1 LB: > { %s2692_s25 = sadd.s32 4294967295, %s3080_s24   ;;  %p2696_p0 = scmp.ge.s32.totalorder %s3080_s24, 1  ;;  %s3080_s24 = sphi %s3148_s24, %s17_s24  }
   0x2   : > { %p237_p1 = scmp.lt.s32.totalorder %s3080_s24, 3 }
   0x4   : > { %p238_p2 = pnand %p2696_p0, %p237_p1 }
   0x6   : > { %241 = sbr.rel (%p238_p2) target bundleno = 1766 (0x6e6), region = 48 }
   0xb   : > { %p269_p3 = scmp.lt.s32.totalorder %s2692_s25, 1  ;;  %v6590_v0 = vmov 0   ;;  %v3052_v3 = vld [vmem:[%s6583_s1] sm:$0xff]   ;;  %vm329_vm0 = vcmask 130048   ;;  %v3053_v4 = vld [vmem:[%s6583_s1 + $0x8] sm:$0xff]   ;;  %v3054_v5 = vld [vmem:[%s6583_s1 + $0x10] sm:$0xff]  }
   0xc   : > { %371 = vmatprep.mubr.bf16.mxu0 %v6590_v0  ;;  %2267 = vmatprep.mubr.bf16.mxu1 %v6590_v0  ;;  %s3083_s13 = smov 34   ;;  %s3084_s14 = smov 33  }
   0xd   : > { %s7066_s25 = smov (!%p269_p3, %s2692_s25), 1  ;;  %3047 = vset.pattern.permute.xlu1 %v6590_v0  ;;  %3048 = vset.pattern.permute.xlu0 %v6590_v0  ;;  %s3085_s15 = smov 32  }
   0xe   : > { %s3011_s26 = sshll.u32 %s7066_s25, 4  ;;  %s3086_s16 = smov 31  }
   0xf   : > { %s273_s29 = scalar_lea.vmem %s6582_s0, %s3011_s26  ;;  %s3087_s17 = smov 30  }
  0x10   : > { %v3049_v1 = vld [vmem:[%s273_s29 + $0x4] ss:$8 sps:$4 sm:$0xff]   ;;  %v3051_v2 = vld [vmem:[%s273_s29] ss:$8 sps:$4 sm:$0xff]   ;;  %s3088_s18 = smov 18   ;;  %s3089_s19 = smov 17  }
  0x11   : > { %353 = vmatprep.subr.bf16.mxu0 %v3049_v1  ;;  %s3090_s20 = smov 16   ;;  %s3091_s21 = smov 15  }
  0x12   : > { %354 = vmatpush1.bf16.msra.mxu0 %v3051_v2  ;;  %s3092_s22 = smov 14   ;;  %s3093_s23 = smov 2  }
  0x13   : > { %s3094_s26 = smov 1   ;;  %s3095_s27 = smov 127  }
  0x14   : > { %s3096_s28 = smov 126   ;;  %s3097_s29 = smov 114  }
  0x15   : > { %2706 = vmatmul.mubr.msk.bf16.vlgmr.msra.gmra.mxu0 %vm329_vm0, %v3052_v3  ;;  %s3098_s30 = smov 113   ;;  %s3099_s8 = smov 112  }
  0x16   : > { %381 = vmatprep.mubr.bf16.mxu0 %v6590_v0  ;;  %s3100_s9 = smov 111   ;;  %s3103_s11 = smov 97  }
  0x1d   : > { %2707 = vmatmul.mubr.msk.bf16.gmra.mxu0 %vm329_vm0, %v3053_v4 }
  0x1e   : > { %391 = vmatprep.mubr.bf16.mxu0 %v6590_v0 }
  0x25   : > { %2708 = vmatmul.mubr.msk.bf16.gmra.mxu0 %vm329_vm0, %v3054_v5 }
  0xd5   : > { %v3177_v6 = vpop.f32.mrf.mxu0 }
  0xd6   : > { %427 = vrot.lane.b32.xlu0 %v3177_v6, %s3083_s13 }
  0xd7   : > { %v3181_v7 = vpop.f32.mrf.mxu0 }
  0xd9   : > { %v3183_v8 = vpop.f32.mrf.mxu0 }
  0xda   : > { %502 = vrot.lane.b32.xlu0 %v3177_v6, %s3084_s14  ;;  %429 = vrot.lane.b32.xlu1 %v3183_v8, %s3083_s13 }
  0xdb   : > { %v3189_v9 = vpop.f32.mrf.mxu0 }
  0xdd   : > { %v3191_v10 = vpop.f32.mrf.mxu0 }
  0xde   : > { %576 = vrot.lane.b32.xlu0 %v3177_v6, %s3085_s15  ;;  %504 = vrot.lane.b32.xlu1 %v3183_v8, %s3084_s14 }
  0xdf   : > { %v3197_v11 = vpop.f32.mrf.mxu0 }
  0xe1   : > { %v3199_v12 = vpop.f32.mrf.mxu0 }
  0xe2   : > { %650 = vrot.lane.b32.xlu0 %v3177_v6, %s3086_s16  ;;  %578 = vrot.lane.b32.xlu1 %v3183_v8, %s3085_s15 }
  0xe3   : > { %v3205_v13 = vpop.f32.mrf.mxu0 }
  0xe5   : > { %v3207_v14 = vpop.f32.mrf.mxu0 }
  0xe6   : > { %724 = vrot.lane.b32.xlu0 %v3177_v6, %s3087_s17  ;;  %652 = vrot.lane.b32.xlu1 %v3183_v8, %s3086_s16 }
  0xe7   : > { %v3213_v15 = vpop.f32.mrf.mxu0 }
  0xe9   : > { %v3215_v16 = vpop.f32.mrf.mxu0 }
  0xea   : > { %798 = vrot.lane.b32.xlu0 %v3177_v6, %s3088_s18  ;;  %726 = vrot.lane.b32.xlu1 %v3183_v8, %s3087_s17 }
  0xeb   : > { %v3221_v17 = vpop.f32.mrf.mxu0 }
  0xec   : > { %6748 = vst [vmem:[#allocation2_spill] sm:$0xff] %v3221_v17  ;;  %v2319_v18 = vpack.c.bf16 %v3221_v17, %v3213_v15 }
  0xee   : > { %872 = vrot.lane.b32.xlu0 %v3177_v6, %s3089_s19  ;;  %800 = vrot.lane.b32.xlu1 %v3183_v8, %s3088_s18 }
  0xef   : > { %2358 = vmatprep.mubr.bf16.mxu0 %v2319_v18 }
  0xf2   : > { %946 = vrot.lane.b32.xlu0 %v3177_v6, %s3090_s20  ;;  %874 = vrot.lane.b32.xlu1 %v3183_v8, %s3089_s19 }
  0xf6   : > { %439 = vrot.lane.b32.xlu0 %v3181_v7, %s3083_s13  ;;  %948 = vrot.lane.b32.xlu1 %v3183_v8, %s3090_s20 }
  0xfa   : > { %514 = vrot.lane.b32.xlu0 %v3181_v7, %s3084_s14  ;;  %441 = vrot.lane.b32.xlu1 %v3189_v9, %s3083_s13 }
  0xfe   : > { %588 = vrot.lane.b32.xlu0 %v3181_v7, %s3085_s15  ;;  %516 = vrot.lane.b32.xlu1 %v3189_v9, %s3084_s14 }
 0x102   : > { %662 = vrot.lane.b32.xlu0 %v3181_v7, %s3086_s16  ;;  %590 = vrot.lane.b32.xlu1 %v3189_v9, %s3085_s15 }
 0x106   : > { %736 = vrot.lane.b32.xlu0 %v3181_v7, %s3087_s17  ;;  %664 = vrot.lane.b32.xlu1 %v3189_v9, %s3086_s16 }
 0x10a   : > { %810 = vrot.lane.b32.xlu0 %v3181_v7, %s3088_s18  ;;  %738 = vrot.lane.b32.xlu1 %v3189_v9, %s3087_s17 }
 0x10e   : > { %884 = vrot.lane.b32.xlu0 %v3181_v7, %s3089_s19  ;;  %812 = vrot.lane.b32.xlu1 %v3189_v9, %s3088_s18 }
 0x112   : > { %958 = vrot.lane.b32.xlu0 %v3181_v7, %s3090_s20  ;;  %886 = vrot.lane.b32.xlu1 %v3189_v9, %s3089_s19 }
 0x116   : > { %960 = vrot.lane.b32.xlu1 %v3189_v9, %s3090_s20  ;;  %431 = vrot.lane.b32.xlu0 %v3191_v10, %s3083_s13 }
 0x11a   : > { %506 = vrot.lane.b32.xlu0 %v3191_v10, %s3084_s14  ;;  %433 = vrot.lane.b32.xlu1 %v3199_v12, %s3083_s13 }
 0x11e   : > { %580 = vrot.lane.b32.xlu0 %v3191_v10, %s3085_s15  ;;  %508 = vrot.lane.b32.xlu1 %v3199_v12, %s3084_s14 }
 0x122   : > { %654 = vrot.lane.b32.xlu0 %v3191_v10, %s3086_s16  ;;  %582 = vrot.lane.b32.xlu1 %v3199_v12, %s3085_s15 }
 0x126   : > { %728 = vrot.lane.b32.xlu0 %v3191_v10, %s3087_s17  ;;  %656 = vrot.lane.b32.xlu1 %v3199_v12, %s3086_s16 }
 0x12a   : > { %802 = vrot.lane.b32.xlu0 %v3191_v10, %s3088_s18  ;;  %730 = vrot.lane.b32.xlu1 %v3199_v12, %s3087_s17 }
 0x12e   : > { %876 = vrot.lane.b32.xlu0 %v3191_v10, %s3089_s19  ;;  %804 = vrot.lane.b32.xlu1 %v3199_v12, %s3088_s18 }
 0x132   : > { %950 = vrot.lane.b32.xlu0 %v3191_v10, %s3090_s20  ;;  %878 = vrot.lane.b32.xlu1 %v3199_v12, %s3089_s19 }
 0x136   : > { %1024 = vrot.lane.b32.xlu0 %v3191_v10, %s3091_s21  ;;  %952 = vrot.lane.b32.xlu1 %v3199_v12, %s3090_s20 }
 0x13a   : > { %1098 = vrot.lane.b32.xlu0 %v3191_v10, %s3092_s22  ;;  %1026 = vrot.lane.b32.xlu1 %v3199_v12, %s3091_s21 }
 0x13e   : > { %443 = vrot.lane.b32.xlu0 %v3197_v11, %s3083_s13  ;;  %1100 = vrot.lane.b32.xlu1 %v3199_v12, %s3092_s22 }
 0x142   : > { %518 = vrot.lane.b32.xlu0 %v3197_v11, %s3084_s14  ;;  %445 = vrot.lane.b32.xlu1 %v3205_v13, %s3083_s13 }
 0x146   : > { %592 = vrot.lane.b32.xlu0 %v3197_v11, %s3085_s15  ;;  %520 = vrot.lane.b32.xlu1 %v3205_v13, %s3084_s14 }
 0x148   : > { %v3317_v19 = vpop.permute.xlu0 %427 }
 0x14a   : > { %666 = vrot.lane.b32.xlu0 %v3197_v11, %s3086_s16  ;;  %594 = vrot.lane.b32.xlu1 %v3205_v13, %s3085_s15 }
 0x14c   : > { %v3323_v20 = vpop.permute.xlu0 %502  ;;  %v3325_v21 = vpop.permute.xlu1 %429 }
 0x14e   : > { %740 = vrot.lane.b32.xlu0 %v3197_v11, %s3087_s17  ;;  %668 = vrot.lane.b32.xlu1 %v3205_v13, %s3086_s16 }
 0x150   : > { %v3331_v22 = vpop.permute.xlu0 %576  ;;  %v3333_v23 = vpop.permute.xlu1 %504 }
 0x152   : > { %814 = vrot.lane.b32.xlu0 %v3197_v11, %s3088_s18  ;;  %742 = vrot.lane.b32.xlu1 %v3205_v13, %s3087_s17 }
 0x154   : > { %v3339_v24 = vpop.permute.xlu0 %650  ;;  %v3341_v25 = vpop.permute.xlu1 %578 }
 0x156   : > { %888 = vrot.lane.b32.xlu0 %v3197_v11, %s3089_s19  ;;  %816 = vrot.lane.b32.xlu1 %v3205_v13, %s3088_s18 }
 0x158   : > { %v3347_v26 = vpop.permute.xlu0 %724  ;;  %v3349_v27 = vpop.permute.xlu1 %652 }
 0x15a   : > { %962 = vrot.lane.b32.xlu0 %v3197_v11, %s3090_s20  ;;  %890 = vrot.lane.b32.xlu1 %v3205_v13, %s3089_s19 }
 0x15c   : > { %v3355_v28 = vpop.permute.xlu0 %798  ;;  %v3357_v29 = vpop.permute.xlu1 %726 }
 0x15e   : > { %1036 = vrot.lane.b32.xlu0 %v3197_v11, %s3091_s21  ;;  %964 = vrot.lane.b32.xlu1 %v3205_v13, %s3090_s20 }
 0x160   : > { %v3363_v30 = vpop.permute.xlu0 %872  ;;  %v3365_v31 = vpop.permute.xlu1 %800 }
 0x162   : > { %1038 = vrot.lane.b32.xlu1 %v3205_v13, %s3091_s21  ;;  %435 = vrot.lane.b32.xlu0 %v3207_v14, %s3083_s13 }
 0x164   : > { %v3371_v32 = vpop.permute.xlu0 %946  ;;  %v3373_v33 = vpop.permute.xlu1 %874 }
 0x165   : > { %6749 = vst [vmem:[#allocation3_spill] sm:$0xff] %v3373_v33 }
 0x166   : > { %510 = vrot.lane.b32.xlu0 %v3207_v14, %s3084_s14  ;;  %447 = vrot.lane.b32.xlu1 %v3213_v15, %s3083_s13 }
 0x168   : > { %v3379_v34 = vpop.permute.xlu0 %439  ;;  %v3381_v35 = vpop.permute.xlu1 %948 }
 0x169   : > { %6750 = vst [vmem:[#allocation4_spill] sm:$0xff] %v3381_v35  ;;  %v2717_v35 = vld [vmem:[%s6584_s2 + $0x4c0] sm:$0xff] }
 0x16a   : > { %584 = vrot.lane.b32.xlu0 %v3207_v14, %s3085_s15  ;;  %1112 = vrot.lane.b32.xlu1 %v3205_v13, %s3092_s22 }
 0x16c   : > { %v3387_v36 = vpop.permute.xlu0 %514  ;;  %v3389_v37 = vpop.permute.xlu1 %441 }
 0x16e   : > { %658 = vrot.lane.b32.xlu0 %v3207_v14, %s3086_s16  ;;  %512 = vrot.lane.b32.xlu1 %v3215_v16, %s3084_s14 }
 0x170   : > { %v3395_v38 = vpop.permute.xlu0 %588  ;;  %v3397_v39 = vpop.permute.xlu1 %516 }
 0x172   : > { %732 = vrot.lane.b32.xlu0 %v3207_v14, %s3087_s17  ;;  %586 = vrot.lane.b32.xlu1 %v3215_v16, %s3085_s15 }
 0x174   : > { %v3403_v40 = vpop.permute.xlu0 %662  ;;  %v3405_v41 = vpop.permute.xlu1 %590 }
 0x176   : > { %806 = vrot.lane.b32.xlu0 %v3207_v14, %s3088_s18  ;;  %660 = vrot.lane.b32.xlu1 %v3215_v16, %s3086_s16 }
 0x178   : > { %v3411_v42 = vpop.permute.xlu0 %736  ;;  %v3413_v43 = vpop.permute.xlu1 %664 }
 0x17a   : > { %880 = vrot.lane.b32.xlu0 %v3207_v14, %s3089_s19  ;;  %734 = vrot.lane.b32.xlu1 %v3215_v16, %s3087_s17 }
 0x17c   : > { %v3419_v44 = vpop.permute.xlu0 %810  ;;  %v3421_v45 = vpop.permute.xlu1 %738 }
 0x17e   : > { %954 = vrot.lane.b32.xlu0 %v3207_v14, %s3090_s20  ;;  %808 = vrot.lane.b32.xlu1 %v3215_v16, %s3088_s18 }
 0x180   : > { %v3427_v46 = vpop.permute.xlu0 %884  ;;  %v3429_v47 = vpop.permute.xlu1 %812 }
 0x182   : > { %1028 = vrot.lane.b32.xlu0 %v3207_v14, %s3091_s21  ;;  %882 = vrot.lane.b32.xlu1 %v3215_v16, %s3089_s19 }
 0x184   : > { %v3435_v48 = vpop.permute.xlu0 %958  ;;  %v3437_v49 = vpop.permute.xlu1 %886 }
 0x185   : > { %6751 = vst [vmem:[#allocation5_spill] sm:$0xff] %v3437_v49  ;;  %v3930_v49 = vmul.f32 %v2717_v35, %v3207_v14 }
 0x186   : > { %1102 = vrot.lane.b32.xlu0 %v3207_v14, %s3092_s22  ;;  %956 = vrot.lane.b32.xlu1 %v3215_v16, %s3090_s20 }
 0x187   : > { %6856 = vst [vmem:[#allocation110_spill] sm:$0xff] %v3930_v49  ;;  %v468_v49 = vld [vmem:[%s6584_s2 + $0x10] sm:$0xff] }
 0x188   : > { %v3443_v50 = vpop.permute.xlu1 %960  ;;  %v3445_v51 = vpop.permute.xlu0 %431 }
 0x189   : > { %6752 = vst [vmem:[#allocation6_spill] sm:$0xff] %v3443_v50 }
 0x18a   : > { %1176 = vrot.lane.b32.xlu0 %v3207_v14, %s3093_s23  ;;  %1030 = vrot.lane.b32.xlu1 %v3215_v16, %s3091_s21 }
 0x18c   : > { %v3451_v52 = vpop.permute.xlu0 %506  ;;  %v3453_v53 = vpop.permute.xlu1 %433 }
 0x18d   : > { %6753 = vst [vmem:[#allocation7_spill] sm:$0xff] %v3451_v52  ;;  %6754 = vst [vmem:[#allocation8_spill] sm:$0xff] %v3453_v53 }
 0x18e   : > { %522 = vrot.lane.b32.xlu0 %v3213_v15, %s3084_s14  ;;  %1104 = vrot.lane.b32.xlu1 %v3215_v16, %s3092_s22 }
 0x190   : > { %v3459_v54 = vpop.permute.xlu0 %580  ;;  %v3461_v55 = vpop.permute.xlu1 %508 }
 0x191   : > { %6755 = vst [vmem:[#allocation9_spill] sm:$0xff] %v3459_v54  ;;  %6756 = vst [vmem:[#allocation10_spill] sm:$0xff] %v3461_v55  ;;  %v466_v54 = vld [vmem:[%s6584_s2] sm:$0xff] }
 0x192   : > { %596 = vrot.lane.b32.xlu0 %v3213_v15, %s3085_s15  ;;  %1178 = vrot.lane.b32.xlu1 %v3215_v16, %s3093_s23 }
 0x194   : > { %v3467_v56 = vpop.permute.xlu0 %654  ;;  %v3469_v57 = vpop.permute.xlu1 %582 }
 0x195   : > { %6757 = vst [vmem:[#allocation11_spill] sm:$0xff] %v3467_v56  ;;  %6758 = vst [vmem:[#allocation12_spill] sm:$0xff] %v3469_v57  ;;  %v2713_v57 = vld [vmem:[%s6584_s2 + $0x4a0] sm:$0xff] }
 0x196   : > { %670 = vrot.lane.b32.xlu0 %v3213_v15, %s3086_s16  ;;  %449 = vrot.lane.b32.xlu1 %v3221_v17, %s3083_s13  ;;  %v3916_v53 = vmul.f32 %v2713_v57, %v3191_v10 }
 0x198   : > { %v3475_v58 = vpop.permute.xlu0 %728  ;;  %v3477_v59 = vpop.permute.xlu1 %656 }
 0x199   : > { %6759 = vst [vmem:[#allocation13_spill] sm:$0xff] %v3475_v58  ;;  %6760 = vst [vmem:[#allocation14_spill] sm:$0xff] %v3477_v59 }
 0x19a   : > { %744 = vrot.lane.b32.xlu0 %v3213_v15, %s3087_s17  ;;  %524 = vrot.lane.b32.xlu1 %v3221_v17, %s3084_s14 }
 0x19c   : > { %v3483_v60 = vpop.permute.xlu0 %802  ;;  %v3485_v61 = vpop.permute.xlu1 %730 }
 0x19d   : > { %6761 = vst [vmem:[#allocation15_spill] sm:$0xff] %v3483_v60  ;;  %6762 = vst [vmem:[#allocation16_spill] sm:$0xff] %v3485_v61 }
 0x19e   : > { %818 = vrot.lane.b32.xlu0 %v3213_v15, %s3088_s18  ;;  %598 = vrot.lane.b32.xlu1 %v3221_v17, %s3085_s15 }
 0x1a0   : > { %v3491_v62 = vpop.permute.xlu0 %876  ;;  %v3493_v63 = vpop.permute.xlu1 %804 }
 0x1a1   : > { %6763 = vst [vmem:[#allocation17_spill] sm:$0xff] %v3491_v62  ;;  %6764 = vst [vmem:[#allocation18_spill] sm:$0xff] %v3493_v63 }
 0x1a2   : > { %892 = vrot.lane.b32.xlu0 %v3213_v15, %s3089_s19  ;;  %672 = vrot.lane.b32.xlu1 %v3221_v17, %s3086_s16  ;;  %s3012_s16 = sshll.u32 %s7066_s25, 5 }
 0x1a4   : > { %v3499_v1 = vpop.permute.xlu0 %950  ;;  %v3501_v2 = vpop.permute.xlu1 %878 }
 0x1a5   : > { %6765 = vst [vmem:[#allocation19_spill] sm:$0xff] %v3499_v1  ;;  %6766 = vst [vmem:[#allocation20_spill] sm:$0xff] %v3501_v2 }
 0x1a6   : > { %966 = vrot.lane.b32.xlu0 %v3213_v15, %s3090_s20  ;;  %746 = vrot.lane.b32.xlu1 %v3221_v17, %s3087_s17 }
 0x1a8   : > { %v3507_v3 = vpop.permute.xlu0 %1024  ;;  %v3509_v4 = vpop.permute.xlu1 %952 }
 0x1a9   : > { %6767 = vst [vmem:[#allocation21_spill] sm:$0xff] %v3507_v3  ;;  %6768 = vst [vmem:[#allocation22_spill] sm:$0xff] %v3509_v4 }
 0x1aa   : > { %1040 = vrot.lane.b32.xlu0 %v3213_v15, %s3091_s21  ;;  %820 = vrot.lane.b32.xlu1 %v3221_v17, %s3088_s18 }
 0x1ac   : > { %v3515_v5 = vpop.permute.xlu0 %1098  ;;  %v3517_v18 = vpop.permute.xlu1 %1026 }
 0x1ad   : > { %6769 = vst [vmem:[#allocation23_spill] sm:$0xff] %v3515_v5  ;;  %6770 = vst [vmem:[#allocation24_spill] sm:$0xff] %v3517_v18 }
 0x1ae   : > { %1114 = vrot.lane.b32.xlu0 %v3213_v15, %s3092_s22  ;;  %894 = vrot.lane.b32.xlu1 %v3221_v17, %s3089_s19  ;;  %s278_s19 = scalar_lea.vmem %s6589_s7, %s3012_s16 }
 0x1b0   : > { %v3523_v0 = vpop.permute.xlu0 %443  ;;  %v3525_v3 = vpop.permute.xlu1 %1100 }
 0x1b1   : > { %6771 = vst [vmem:[#allocation25_spill] sm:$0xff] %v3525_v3 }
 0x1b2   : > { %1188 = vrot.lane.b32.xlu0 %v3213_v15, %s3093_s23  ;;  %968 = vrot.lane.b32.xlu1 %v3221_v17, %s3090_s20  ;;  %s3102_s20 = smov 98  }
 0x1b4   : > { %v3531_v4 = vpop.permute.xlu0 %518  ;;  %v3533_v5 = vpop.permute.xlu1 %445 }
 0x1b5   : > { %6772 = vst [vmem:[#allocation26_spill] sm:$0xff] %v3531_v4  ;;  %6773 = vst [vmem:[#allocation27_spill] sm:$0xff] %v3533_v5 }
 0x1b6   : > { %437 = vrot.lane.b32.xlu0 %v3215_v16, %s3083_s13  ;;  %1042 = vrot.lane.b32.xlu1 %v3221_v17, %s3091_s21 }
 0x1b8   : > { %v3539_v18 = vpop.permute.xlu0 %592  ;;  %v3541_v2 = vpop.permute.xlu1 %520 }
 0x1b9   : > { %6774 = vst [vmem:[#allocation28_spill] sm:$0xff] %v3539_v18  ;;  %6775 = vst [vmem:[#allocation29_spill] sm:$0xff] %v3541_v2  ;;  %v2718_v2 = vld [vmem:[%s6584_s2 + $0x4c8] sm:$0xff] }
 0x1ba   : > { %1110 = vrot.lane.b32.xlu0 %v3197_v11, %s3092_s22  ;;  %1116 = vrot.lane.b32.xlu1 %v3221_v17, %s3092_s22 }
 0x1bc   : > { %v3547_v3 = vpop.permute.xlu0 %666  ;;  %v3549_v1 = vpop.permute.xlu1 %594 }
 0x1bd   : > { %6776 = vst [vmem:[#allocation30_spill] sm:$0xff] %v3547_v3  ;;  %6777 = vst [vmem:[#allocation31_spill] sm:$0xff] %v3549_v1  ;;  %v2714_v1 = vld [vmem:[%s6584_s2 + $0x4a8] sm:$0xff]  ;;  %v2716_v3 = vld [vmem:[%s6584_s2 + $0x4b8] sm:$0xff] }
 0x1be   : > { %1250 = vrot.lane.b32.xlu0 %v3207_v14, %s3094_s26  ;;  %1190 = vrot.lane.b32.xlu1 %v3221_v17, %s3093_s23  ;;  %v3921_v52 = vmul.f32 %v2714_v1, %v3197_v11  ;;  %v3927_v33 = vmul.f32 %v2716_v3, %v3205_v13  ;;  %v3956_v3 = vmul.f32 %v2718_v2, %v3213_v15 }
 0x1c0   : > { %v3555_v63 = vpop.permute.xlu0 %740  ;;  %v3557_v62 = vpop.permute.xlu1 %668  ;;  %6855 = vst [vmem:[#allocation109_spill] sm:$0xff] %v3927_v33  ;;  %6858 = vst [vmem:[#allocation112_spill] sm:$0xff] %v3956_v3  ;;  %v469_v33 = vld [vmem:[%s6584_s2 + $0x18] sm:$0xff] }
 0x1c1   : > { %6778 = vst [vmem:[#allocation32_spill] sm:$0xff] %v3555_v63  ;;  %6779 = vst [vmem:[#allocation33_spill] sm:$0xff] %v3557_v62 }
 0x1c2   : > { %1262 = vrot.lane.b32.xlu0 %v3213_v15, %s3094_s26  ;;  %1252 = vrot.lane.b32.xlu1 %v3215_v16, %s3094_s26 }
 0x1c4   : > { %v3563_v61 = vpop.permute.xlu0 %814  ;;  %v3565_v60 = vpop.permute.xlu1 %742 }
 0x1c5   : > { %6780 = vst [vmem:[#allocation34_spill] sm:$0xff] %v3563_v61  ;;  %6781 = vst [vmem:[#allocation35_spill] sm:$0xff] %v3565_v60 }
 0x1c6   : > { %1020 = vrot.lane.b32.xlu0 %v3177_v6, %s3091_s21  ;;  %1264 = vrot.lane.b32.xlu1 %v3221_v17, %s3094_s26 }
 0x1c8   : > { %v3571_v59 = vpop.permute.xlu0 %888  ;;  %v3573_v58 = vpop.permute.xlu1 %816 }
 0x1c9   : > { %6782 = vst [vmem:[#allocation36_spill] sm:$0xff] %v3571_v59  ;;  %6783 = vst [vmem:[#allocation37_spill] sm:$0xff] %v3573_v58 }
 0x1ca   : > { %1032 = vrot.lane.b32.xlu0 %v3181_v7, %s3091_s21  ;;  %1022 = vrot.lane.b32.xlu1 %v3183_v8, %s3091_s21 }
 0x1cc   : > { %v3579_v62 = vpop.permute.xlu0 %962  ;;  %v3581_v61 = vpop.permute.xlu1 %890 }
 0x1cd   : > { %6784 = vst [vmem:[#allocation38_spill] sm:$0xff] %v3579_v62  ;;  %6785 = vst [vmem:[#allocation39_spill] sm:$0xff] %v3581_v61 }
 0x1ce   : > { %1172 = vrot.lane.b32.xlu0 %v3191_v10, %s3093_s23  ;;  %1034 = vrot.lane.b32.xlu1 %v3189_v9, %s3091_s21 }
 0x1d0   : > { %v3587_v60 = vpop.permute.xlu0 %1036  ;;  %v3589_v59 = vpop.permute.xlu1 %964 }
 0x1d1   : > { %6786 = vst [vmem:[#allocation40_spill] sm:$0xff] %v3587_v60  ;;  %6787 = vst [vmem:[#allocation41_spill] sm:$0xff] %v3589_v59 }
 0x1d2   : > { %1184 = vrot.lane.b32.xlu0 %v3197_v11, %s3093_s23  ;;  %1174 = vrot.lane.b32.xlu1 %v3199_v12, %s3093_s23 }
 0x1d4   : > { %v3595_v58 = vpop.permute.xlu1 %1038  ;;  %v3597_v62 = vpop.permute.xlu0 %435 }
 0x1d5   : > { %6788 = vst [vmem:[#allocation42_spill] sm:$0xff] %v3595_v58  ;;  %6789 = vst [vmem:[#allocation43_spill] sm:$0xff] %v3597_v62 }
 0x1d6   : > { %1324 = vrot.lane.b32.xlu0 %v3207_v14, %s3095_s27  ;;  %1186 = vrot.lane.b32.xlu1 %v3205_v13, %s3093_s23 }
 0x1d8   : > { %v3603_v60 = vpop.permute.xlu0 %510  ;;  %v3605_v59 = vpop.permute.xlu1 %447 }
 0x1d9   : > { %6790 = vst [vmem:[#allocation44_spill] sm:$0xff] %v3603_v60  ;;  %6791 = vst [vmem:[#allocation45_spill] sm:$0xff] %v3605_v59 }
 0x1da   : > { %1336 = vrot.lane.b32.xlu0 %v3213_v15, %s3095_s27  ;;  %1326 = vrot.lane.b32.xlu1 %v3215_v16, %s3095_s27 }
 0x1dc   : > { %v3611_v58 = vpop.permute.xlu0 %584  ;;  %v3613_v62 = vpop.permute.xlu1 %1112 }
 0x1dd   : > { %6792 = vst [vmem:[#allocation46_spill] sm:$0xff] %v3611_v58  ;;  %6793 = vst [vmem:[#allocation47_spill] sm:$0xff] %v3613_v62 }
 0x1de   : > { %1094 = vrot.lane.b32.xlu0 %v3177_v6, %s3092_s22  ;;  %1338 = vrot.lane.b32.xlu1 %v3221_v17, %s3095_s27 }
 0x1e0   : > { %v3619_v61 = vpop.permute.xlu0 %658  ;;  %v3621_v60 = vpop.permute.xlu1 %512 }
 0x1e1   : > { %6794 = vst [vmem:[#allocation48_spill] sm:$0xff] %v3619_v61  ;;  %6795 = vst [vmem:[#allocation49_spill] sm:$0xff] %v3621_v60 }
 0x1e2   : > { %1106 = vrot.lane.b32.xlu0 %v3181_v7, %s3092_s22  ;;  %1096 = vrot.lane.b32.xlu1 %v3183_v8, %s3092_s22 }
 0x1e4   : > { %v3627_v59 = vpop.permute.xlu0 %732  ;;  %v3629_v58 = vpop.permute.xlu1 %586 }
 0x1e5   : > { %6796 = vst [vmem:[#allocation50_spill] sm:$0xff] %v3627_v59  ;;  %6797 = vst [vmem:[#allocation51_spill] sm:$0xff] %v3629_v58 }
 0x1e6   : > { %1246 = vrot.lane.b32.xlu0 %v3191_v10, %s3094_s26  ;;  %1108 = vrot.lane.b32.xlu1 %v3189_v9, %s3092_s22  ;;  %s3101_s22 = smov 110  }
 0x1e8   : > { %v3635_v62 = vpop.permute.xlu0 %806  ;;  %v3637_v61 = vpop.permute.xlu1 %660 }
 0x1e9   : > { %6798 = vst [vmem:[#allocation52_spill] sm:$0xff] %v3635_v62  ;;  %6799 = vst [vmem:[#allocation53_spill] sm:$0xff] %v3637_v61 }
 0x1ea   : > { %1258 = vrot.lane.b32.xlu0 %v3197_v11, %s3094_s26  ;;  %1248 = vrot.lane.b32.xlu1 %v3199_v12, %s3094_s26 }
 0x1ec   : > { %v3643_v60 = vpop.permute.xlu0 %880  ;;  %v3645_v59 = vpop.permute.xlu1 %734 }
 0x1ed   : > { %6800 = vst [vmem:[#allocation54_spill] sm:$0xff] %v3643_v60  ;;  %6801 = vst [vmem:[#allocation55_spill] sm:$0xff] %v3645_v59 }
 0x1ee   : > { %1398 = vrot.lane.b32.xlu0 %v3207_v14, %s3096_s28  ;;  %1260 = vrot.lane.b32.xlu1 %v3205_v13, %s3094_s26 }
 0x1f0   : > { %v3651_v62 = vpop.permute.xlu0 %954  ;;  %v3653_v61 = vpop.permute.xlu1 %808 }
 0x1f1   : > { %6802 = vst [vmem:[#allocation56_spill] sm:$0xff] %v3651_v62  ;;  %6803 = vst [vmem:[#allocation57_spill] sm:$0xff] %v3653_v61 }
 0x1f2   : > { %1410 = vrot.lane.b32.xlu0 %v3213_v15, %s3096_s28  ;;  %1400 = vrot.lane.b32.xlu1 %v3215_v16, %s3096_s28 }
 0x1f4   : > { %v3659_v60 = vpop.permute.xlu0 %1028  ;;  %v3661_v59 = vpop.permute.xlu1 %882 }
 0x1f5   : > { %6804 = vst [vmem:[#allocation58_spill] sm:$0xff] %v3659_v60  ;;  %6805 = vst [vmem:[#allocation59_spill] sm:$0xff] %v3661_v59 }
 0x1f6   : > { %1168 = vrot.lane.b32.xlu0 %v3177_v6, %s3093_s23  ;;  %1412 = vrot.lane.b32.xlu1 %v3221_v17, %s3096_s28 }
 0x1f8   : > { %v3667_v58 = vpop.permute.xlu0 %1102  ;;  %v3669_v62 = vpop.permute.xlu1 %956 }
 0x1f9   : > { %6806 = vst [vmem:[#allocation60_spill] sm:$0xff] %v3667_v58  ;;  %6807 = vst [vmem:[#allocation61_spill] sm:$0xff] %v3669_v62 }
 0x1fa   : > { %1180 = vrot.lane.b32.xlu0 %v3181_v7, %s3093_s23  ;;  %1170 = vrot.lane.b32.xlu1 %v3183_v8, %s3093_s23 }
 0x1fc   : > { %v3675_v61 = vpop.permute.xlu0 %1176  ;;  %v3677_v60 = vpop.permute.xlu1 %1030 }
 0x1fd   : > { %6808 = vst [vmem:[#allocation62_spill] sm:$0xff] %v3675_v61  ;;  %6809 = vst [vmem:[#allocation63_spill] sm:$0xff] %v3677_v60 }
 0x1fe   : > { %1320 = vrot.lane.b32.xlu0 %v3191_v10, %s3095_s27  ;;  %1182 = vrot.lane.b32.xlu1 %v3189_v9, %s3093_s23 }
 0x200   : > { %v3683_v59 = vpop.permute.xlu0 %522  ;;  %v3685_v58 = vpop.permute.xlu1 %1104 }
 0x201   : > { %6810 = vst [vmem:[#allocation64_spill] sm:$0xff] %v3683_v59  ;;  %6811 = vst [vmem:[#allocation65_spill] sm:$0xff] %v3685_v58 }
 0x202   : > { %1332 = vrot.lane.b32.xlu0 %v3197_v11, %s3095_s27  ;;  %1322 = vrot.lane.b32.xlu1 %v3199_v12, %s3095_s27 }
 0x204   : > { %v3691_v62 = vpop.permute.xlu0 %596  ;;  %v3693_v61 = vpop.permute.xlu1 %1178 }
 0x205   : > { %6812 = vst [vmem:[#allocation66_spill] sm:$0xff] %v3691_v62  ;;  %6813 = vst [vmem:[#allocation67_spill] sm:$0xff] %v3693_v61 }
 0x206   : > { %1472 = vrot.lane.b32.xlu0 %v3207_v14, %s3097_s29  ;;  %1334 = vrot.lane.b32.xlu1 %v3205_v13, %s3095_s27 }
 0x208   : > { %v3699_v60 = vpop.permute.xlu0 %670  ;;  %v3701_v58 = vpop.permute.xlu1 %449 }
 0x209   : > { %6814 = vst [vmem:[#allocation68_spill] sm:$0xff] %v3699_v60  ;;  %6815 = vst [vmem:[#allocation69_spill] sm:$0xff] %v3701_v58 }
 0x20a   : > { %1484 = vrot.lane.b32.xlu0 %v3213_v15, %s3097_s29  ;;  %1474 = vrot.lane.b32.xlu1 %v3215_v16, %s3097_s29 }
 0x20c   : > { %v3707_v62 = vpop.permute.xlu0 %744  ;;  %v3709_v61 = vpop.permute.xlu1 %524 }
 0x20d   : > { %6816 = vst [vmem:[#allocation70_spill] sm:$0xff] %v3707_v62  ;;  %6817 = vst [vmem:[#allocation71_spill] sm:$0xff] %v3709_v61 }
 0x20e   : > { %1242 = vrot.lane.b32.xlu0 %v3177_v6, %s3094_s26  ;;  %1486 = vrot.lane.b32.xlu1 %v3221_v17, %s3097_s29 }
 0x210   : > { %v3715_v59 = vpop.permute.xlu0 %818  ;;  %v3717_v60 = vpop.permute.xlu1 %598 }
 0x211   : > { %6818 = vst [vmem:[#allocation72_spill] sm:$0xff] %v3715_v59  ;;  %6819 = vst [vmem:[#allocation73_spill] sm:$0xff] %v3717_v60 }
 0x212   : > { %1254 = vrot.lane.b32.xlu0 %v3181_v7, %s3094_s26  ;;  %1244 = vrot.lane.b32.xlu1 %v3183_v8, %s3094_s26 }
 0x214   : > { %v3723_v58 = vpop.permute.xlu0 %892  ;;  %v3725_v62 = vpop.permute.xlu1 %672 }
 0x215   : > { %6820 = vst [vmem:[#allocation74_spill] sm:$0xff] %v3723_v58  ;;  %6821 = vst [vmem:[#allocation75_spill] sm:$0xff] %v3725_v62 }
 0x216   : > { %1394 = vrot.lane.b32.xlu0 %v3191_v10, %s3096_s28  ;;  %1256 = vrot.lane.b32.xlu1 %v3189_v9, %s3094_s26  ;;  %s3104_s26 = smov 96  }
 0x218   : > { %v3731_v61 = vpop.permute.xlu0 %966  ;;  %v3733_v59 = vpop.permute.xlu1 %746 }
 0x219   : > { %6822 = vst [vmem:[#allocation76_spill] sm:$0xff] %v3731_v61  ;;  %6823 = vst [vmem:[#allocation77_spill] sm:$0xff] %v3733_v59 }
 0x21a   : > { %1406 = vrot.lane.b32.xlu0 %v3197_v11, %s3096_s28  ;;  %1396 = vrot.lane.b32.xlu1 %v3199_v12, %s3096_s28 }
 0x21c   : > { %v3739_v60 = vpop.permute.xlu0 %1040  ;;  %v3741_v58 = vpop.permute.xlu1 %820 }
 0x21d   : > { %6824 = vst [vmem:[#allocation78_spill] sm:$0xff] %v3739_v60  ;;  %6825 = vst [vmem:[#allocation79_spill] sm:$0xff] %v3741_v58 }
 0x21e   : > { %1546 = vrot.lane.b32.xlu0 %v3207_v14, %s3098_s30  ;;  %1408 = vrot.lane.b32.xlu1 %v3205_v13, %s3096_s28 }
 0x220   : > { %v3747_v61 = vpop.permute.xlu0 %1114  ;;  %v3749_v59 = vpop.permute.xlu1 %894 }
 0x221   : > { %6826 = vst [vmem:[#allocation80_spill] sm:$0xff] %v3747_v61  ;;  %6827 = vst [vmem:[#allocation81_spill] sm:$0xff] %v3749_v59 }
 0x222   : > { %1558 = vrot.lane.b32.xlu0 %v3213_v15, %s3098_s30  ;;  %1548 = vrot.lane.b32.xlu1 %v3215_v16, %s3098_s30 }
 0x224   : > { %v3755_v60 = vpop.permute.xlu0 %1188  ;;  %v3757_v58 = vpop.permute.xlu1 %968 }
 0x225   : > { %6828 = vst [vmem:[#allocation82_spill] sm:$0xff] %v3755_v60  ;;  %6829 = vst [vmem:[#allocation83_spill] sm:$0xff] %v3757_v58 }
 0x226   : > { %1316 = vrot.lane.b32.xlu0 %v3177_v6, %s3095_s27  ;;  %1560 = vrot.lane.b32.xlu1 %v3221_v17, %s3098_s30 }
 0x228   : > { %v3763_v62 = vpop.permute.xlu0 %437  ;;  %v3765_v61 = vpop.permute.xlu1 %1042 }
 0x229   : > { %6830 = vst [vmem:[#allocation84_spill] sm:$0xff] %v3763_v62  ;;  %6831 = vst [vmem:[#allocation85_spill] sm:$0xff] %v3765_v61 }
 0x22a   : > { %1328 = vrot.lane.b32.xlu0 %v3181_v7, %s3095_s27  ;;  %1318 = vrot.lane.b32.xlu1 %v3183_v8, %s3095_s27 }
 0x22c   : > { %v3771_v59 = vpop.permute.xlu0 %1110  ;;  %v3773_v60 = vpop.permute.xlu1 %1116 }
 0x22d   : > { %6832 = vst [vmem:[#allocation86_spill] sm:$0xff] %v3771_v59  ;;  %6833 = vst [vmem:[#allocation87_spill] sm:$0xff] %v3773_v60 }
 0x22e   : > { %1468 = vrot.lane.b32.xlu0 %v3191_v10, %s3097_s29  ;;  %1330 = vrot.lane.b32.xlu1 %v3189_v9, %s3095_s27 }
 0x230   : > { %v3779_v58 = vpop.permute.xlu0 %1250  ;;  %v3781_v62 = vpop.permute.xlu1 %1190 }
 0x231   : > { %6834 = vst [vmem:[#allocation88_spill] sm:$0xff] %v3779_v58  ;;  %6835 = vst [vmem:[#allocation89_spill] sm:$0xff] %v3781_v62 }
 0x232   : > { %1480 = vrot.lane.b32.xlu0 %v3197_v11, %s3097_s29  ;;  %1470 = vrot.lane.b32.xlu1 %v3199_v12, %s3097_s29 }
 0x234   : > { %v3787_v61 = vpop.permute.xlu0 %1262  ;;  %v3789_v59 = vpop.permute.xlu1 %1252 }
 0x235   : > { %6836 = vst [vmem:[#allocation90_spill] sm:$0xff] %v3787_v61  ;;  %6837 = vst [vmem:[#allocation91_spill] sm:$0xff] %v3789_v59 }
 0x236   : > { %1620 = vrot.lane.b32.xlu0 %v3207_v14, %s3099_s8  ;;  %1482 = vrot.lane.b32.xlu1 %v3205_v13, %s3097_s29 }
 0x238   : > { %v3795_v60 = vpop.permute.xlu0 %1020  ;;  %v3797_v62 = vpop.permute.xlu1 %1264 }
 0x239   : > { %6838 = vst [vmem:[#allocation92_spill] sm:$0xff] %v3795_v60  ;;  %6839 = vst [vmem:[#allocation93_spill] sm:$0xff] %v3797_v62 }
 0x23a   : > { %1632 = vrot.lane.b32.xlu0 %v3213_v15, %s3099_s8  ;;  %1622 = vrot.lane.b32.xlu1 %v3215_v16, %s3099_s8 }
 0x23c   : > { %v3803_v58 = vpop.permute.xlu0 %1032  ;;  %v3805_v59 = vpop.permute.xlu1 %1022 }
 0x23d   : > { %6840 = vst [vmem:[#allocation94_spill] sm:$0xff] %v3803_v58  ;;  %6841 = vst [vmem:[#allocation95_spill] sm:$0xff] %v3805_v59 }
 0x23e   : > { %1390 = vrot.lane.b32.xlu0 %v3177_v6, %s3096_s28  ;;  %1634 = vrot.lane.b32.xlu1 %v3221_v17, %s3099_s8 }
 0x240   : > { %v3811_v61 = vpop.permute.xlu0 %1172  ;;  %v3813_v60 = vpop.permute.xlu1 %1034 }
 0x241   : > { %6842 = vst [vmem:[#allocation96_spill] sm:$0xff] %v3811_v61  ;;  %6843 = vst [vmem:[#allocation97_spill] sm:$0xff] %v3813_v60 }
 0x242   : > { %1402 = vrot.lane.b32.xlu0 %v3181_v7, %s3096_s28  ;;  %1392 = vrot.lane.b32.xlu1 %v3183_v8, %s3096_s28 }
 0x244   : > { %v3819_v62 = vpop.permute.xlu0 %1184  ;;  %v3821_v58 = vpop.permute.xlu1 %1174 }
 0x245   : > { %6844 = vst [vmem:[#allocation98_spill] sm:$0xff] %v3819_v62  ;;  %6845 = vst [vmem:[#allocation99_spill] sm:$0xff] %v3821_v58  ;;  %v451_v62 = vlaneseq }
 0x246   : > { %1542 = vrot.lane.b32.xlu0 %v3191_v10, %s3098_s30  ;;  %1404 = vrot.lane.b32.xlu1 %v3189_v9, %s3096_s28 }
 0x248   : > { %v3827_v59 = vpop.permute.xlu0 %1324  ;;  %v3829_v61 = vpop.permute.xlu1 %1186 }
 0x249   : > { %6846 = vst [vmem:[#allocation100_spill] sm:$0xff] %v3827_v59  ;;  %6847 = vst [vmem:[#allocation101_spill] sm:$0xff] %v3829_v61  ;;  %v3845_v61 = vand.u32 127, %v451_v62  ;;  %v2711_v62 = vld [vmem:[%s6584_s2 + $0x490] sm:$0xff] }
 0x24a   : > { %1554 = vrot.lane.b32.xlu0 %v3197_v11, %s3098_s30  ;;  %1544 = vrot.lane.b32.xlu1 %v3199_v12, %s3098_s30 }
 0x24b   : > { %vm453_vm1 = vcmp.lt.s32.totalorder %v3845_v61, 34  ;;  %vm526_vm2 = vcmp.lt.s32.totalorder %v3845_v61, 33  ;;  %vm600_vm3 = vcmp.lt.s32.totalorder %v3845_v61, 32  ;;  %vm674_vm4 = vcmp.lt.s32.totalorder %v3845_v61, 31 }
 0x24c   : > { %v3835_v60 = vpop.permute.xlu0 %1336  ;;  %v3837_v58 = vpop.permute.xlu1 %1326  ;;  %v527_v35 = vsel %vm526_vm2, %v3323_v20, %v3387_v36  ;;  %v533_v1 = vsel %vm526_vm2, %v3387_v36, %v3323_v20  ;;  %v455_v20 = vsel %vm453_vm1, %v3325_v21, %v3389_v37  ;;  %v461_v36 = vsel %vm453_vm1, %v3389_v37, %v3325_v21  ;;  %v2733_v21 = vld [vmem:[%s6584_s2 + $0xc0] sm:$0xff]  ;;  %v2734_v37 = vld [vmem:[%s6584_s2 + $0xc8] sm:$0xff] }
 0x24d   : > { %6848 = vst [vmem:[#allocation102_spill] sm:$0xff] %v3835_v60  ;;  %6849 = vst [vmem:[#allocation103_spill] sm:$0xff] %v3837_v58  ;;  %v2709_v58 = vld [vmem:[%s6584_s2 + $0x480] sm:$0xff]  ;;  %v2710_v60 = vld [vmem:[%s6584_s2 + $0x488] sm:$0xff]  ;;  %vm748_vm5 = vcmp.lt.s32.totalorder %v3845_v61, 30  ;;  %v528_v3 = vsel %vm526_vm2, %v3333_v23, %v3397_v39  ;;  %vm822_vm6 = vcmp.lt.s32.totalorder %v3845_v61, 18 }
 0x24e   : > { %1694 = vrot.lane.b32.xlu0 %v3207_v14, %s3100_s9  ;;  %1556 = vrot.lane.b32.xlu1 %v3205_v13, %s3098_s30  ;;  %v415_v50 = vmul.f32 %v2709_v58, %v3177_v6  ;;  %v416_v55 = vmul.f32 %v2710_v60, %v3181_v7  ;;  %v467_v58 = vld [vmem:[%s6584_s2 + $0x8] sm:$0xff]  ;;  %v454_v60 = vsel %vm453_vm1, %v3317_v19, %v3379_v34  ;;  %vm896_vm7 = vcmp.lt.s32.totalorder %v3845_v61, 17 }
 0x24f   : > { %vm970_vm8 = vcmp.lt.s32.totalorder %v3845_v61, 16  ;;  %vm1044_vm9 = vcmp.lt.s32.totalorder %v3845_v61, 15  ;;  %vm1118_vm10 = vcmp.lt.s32.totalorder %v3845_v61, 14  ;;  %vm1192_vm11 = vcmp.lt.s32.totalorder %v3845_v61, 2 }
 0x250   : > { %v3843_v59 = vpop.permute.xlu0 %1094  ;;  %v3847_v63 = vpop.permute.xlu1 %1338  ;;  %vm1266_vm12 = vcmp.lt.s32.totalorder %v3845_v61, 1  ;;  %vm1340_vm13 = vcmp.lt.s32.totalorder %v3845_v61, 127  ;;  %vm1414_vm14 = vcmp.lt.s32.totalorder %v3845_v61, 126  ;;  %vm1488_vm15 = vcmp.lt.s32.totalorder %v3845_v61, 114 }
 0x251   : > { %6850 = vst [vmem:[#allocation104_spill] sm:$0xff] %v3843_v59  ;;  %6851 = vst [vmem:[#allocation105_spill] sm:$0xff] %v3847_v63  ;;  %v2712_v63 = vld [vmem:[%s6584_s2 + $0x498] sm:$0xff]  ;;  %vm1562_vm0 = vcmp.lt.s32.totalorder %v3845_v61, 113 }
 0x252   : > { %1706 = vrot.lane.b32.xlu0 %v3213_v15, %s3100_s9  ;;  %1696 = vrot.lane.b32.xlu1 %v3215_v16, %s3100_s9  ;;  %v3913_v18 = vmul.f32 %v2712_v63, %v3189_v9  ;;  %v2722_v63 = vld [vmem:[%s6584_s2 + $0x68] sm:$0xff] }
 0x254   : > { %v3862_v59 = vpop.permute.xlu0 %1106  ;;  %v3874_v56 = vpop.permute.xlu1 %1096 }
 0x255   : > { %6852 = vst [vmem:[#allocation106_spill] sm:$0xff] %v3862_v59  ;;  %6853 = vst [vmem:[#allocation107_spill] sm:$0xff] %v3874_v56  ;;  %v2715_v59 = vld [vmem:[%s6584_s2 + $0x4b0] sm:$0xff]  ;;  %v3891_v56 = vmul.f32 %v2711_v62, %v3183_v8  ;;  %v460_v62 = vsel %vm453_vm1, %v3379_v34, %v3317_v19  ;;  %v2720_v34 = vld [vmem:[%s6584_s2 + $0x4d8] sm:$0xff] }
 0x256   : > { %1464 = vrot.lane.b32.xlu0 %v3177_v6, %s3097_s29  ;;  %1708 = vrot.lane.b32.xlu1 %v3221_v17, %s3100_s9  ;;  %v3924_v4 = vmul.f32 %v2715_v59, %v3199_v12  ;;  %v2719_v19 = vld [vmem:[%s6584_s2 + $0x4d0] sm:$0xff]  ;;  %v2721_v59 = vld [vmem:[%s6584_s2 + $0x60] sm:$0xff]  ;;  %v3982_v2 = vmul.f32 %v2720_v34, %v3221_v17  ;;  %v607_v34 = vsel %vm600_vm3, %v3395_v38, %v3331_v22 }
 0x258   : > { %v3918_v5 = vpop.permute.xlu0 %1246  ;;  %v3938_v57 = vpop.permute.xlu1 %1108 }
 0x259   : > { %6854 = vst [vmem:[#allocation108_spill] sm:$0xff] %v3918_v5  ;;  %6857 = vst [vmem:[#allocation111_spill] sm:$0xff] %v3938_v57  ;;  %v478_v5 = vmul.f32 %v466_v54, %v460_v62  ;;  %v479_v57 = vmul.f32 %v467_v58, %v454_v60  ;;  %v3979_v54 = vmul.f32 %v2719_v19, %v3215_v16 }
 0x25a   : > { %1476 = vrot.lane.b32.xlu0 %v3181_v7, %s3097_s29  ;;  %1466 = vrot.lane.b32.xlu1 %v3183_v8, %s3097_s29  ;;  %v552_v60 = vmul.f32 %v2721_v59, %v533_v1  ;;  %v553_v62 = vmul.f32 %v2722_v63, %v527_v35  ;;  %v601_v19 = vsel %vm600_vm3, %v3331_v22, %v3395_v38  ;;  %v2723_v1 = vld [vmem:[%s6584_s2 + $0x70] sm:$0xff] }
 0x25b   : > { %v480_v63 = vmul.f32 %v468_v49, %v461_v36  ;;  %v481_v35 = vmul.f32 %v469_v33, %v455_v20  ;;  %v534_v22 = vsel %vm526_vm2, %v3397_v39, %v3333_v23  ;;  %v490_v33 = vadd.f32 %v478_v5, %v415_v50  ;;  %v2745_v36 = vld [vmem:[%s6584_s2 + $0x120] sm:$0xff]  ;;  %v2746_v23 = vld [vmem:[%s6584_s2 + $0x128] sm:$0xff] }
 0x25c   : > { %v3984_v58 = vpop.permute.xlu0 %1258  ;;  %v4000_v59 = vpop.permute.xlu1 %1248  ;;  %v491_v38 = vadd.f32 %v479_v57, %v416_v55  ;;  %v626_v49 = vmul.f32 %v2733_v21, %v607_v34  ;;  %v627_v20 = vmul.f32 %v2734_v37, %v601_v19  ;;  %v675_v39 = vsel %vm674_vm4, %v3339_v24, %v3403_v40  ;;  %v2735_v21 = vld [vmem:[%s6584_s2 + $0xd0] sm:$0xff]  ;;  %v2736_v37 = vld [vmem:[%s6584_s2 + $0xd8] sm:$0xff] }
 0x25d   : > { %6859 = vst [vmem:[#allocation113_spill] sm:$0xff] %v3984_v58  ;;  %6860 = vst [vmem:[#allocation114_spill] sm:$0xff] %v4000_v59  ;;  %v2724_v58 = vld [vmem:[%s6584_s2 + $0x78] sm:$0xff]  ;;  %v681_v50 = vsel %vm674_vm4, %v3403_v40, %v3339_v24  ;;  %v554_v5 = vmul.f32 %v2723_v1, %v534_v22  ;;  %v602_v19 = vsel %vm600_vm3, %v3341_v25, %v3405_v41  ;;  %v2757_v59 = vld [vmem:[%s6584_s2 + $0x180] sm:$0xff] }
 0x25e   : > { %1616 = vrot.lane.b32.xlu0 %v3191_v10, %s3099_s8  ;;  %1478 = vrot.lane.b32.xlu1 %v3189_v9, %s3097_s29  ;;  %v555_v57 = vmul.f32 %v2724_v58, %v528_v3  ;;  %v608_v24 = vsel %vm600_vm3, %v3405_v41, %v3341_v25  ;;  %v564_v3 = vadd.f32 %v552_v60, %v490_v33  ;;  %v2758_v25 = vld [vmem:[%s6584_s2 + $0x188] sm:$0xff] }
 0x25f   : > { %v565_v58 = vadd.f32 %v553_v62, %v491_v38  ;;  %v492_v34 = vadd.f32 %v480_v63, %v3891_v56  ;;  %v493_v1 = vadd.f32 %v481_v35, %v3913_v18  ;;  %v700_v22 = vmul.f32 %v2745_v36, %v681_v50  ;;  %v2747_v62 = vld [vmem:[%s6584_s2 + $0x130] sm:$0xff]  ;;  %v2748_v63 = vld [vmem:[%s6584_s2 + $0x138] sm:$0xff] }
 0x260   : > { %v4036_v55 = vpop.permute.xlu0 %1398  ;;  %v4053_v40 = vpop.permute.xlu1 %1260  ;;  %v749_v41 = vsel %vm748_vm5, %v3347_v26, %v3411_v42  ;;  %v755_v56 = vsel %vm748_vm5, %v3411_v42, %v3347_v26  ;;  %v628_v18 = vmul.f32 %v2735_v21, %v608_v24  ;;  %v629_v60 = vmul.f32 %v2736_v37, %v602_v19  ;;  %v2769_v37 = vld [vmem:[%s6584_s2 + $0x1e0] sm:$0xff]  ;;  %v2770_v19 = vld [vmem:[%s6584_s2 + $0x1e8] sm:$0xff] }
 0x261   : > { %6861 = vst [vmem:[#allocation115_spill] sm:$0xff] %v4036_v55  ;;  %v701_v55 = vmul.f32 %v2746_v23, %v675_v39  ;;  %v676_v35 = vsel %vm674_vm4, %v3349_v27, %v3413_v43  ;;  %v682_v26 = vsel %vm674_vm4, %v3413_v43, %v3349_v27  ;;  %v638_v33 = vadd.f32 %v626_v49, %v564_v3 }
 0x262   : > { %1628 = vrot.lane.b32.xlu0 %v3197_v11, %s3099_s8  ;;  %1618 = vrot.lane.b32.xlu1 %v3199_v12, %s3099_s8  ;;  %v639_v38 = vadd.f32 %v627_v20, %v565_v58  ;;  %v566_v36 = vadd.f32 %v554_v5, %v492_v34  ;;  %v567_v23 = vadd.f32 %v555_v57, %v493_v1  ;;  %v2759_v20 = vld [vmem:[%s6584_s2 + $0x190] sm:$0xff]  ;;  %v2760_v5 = vld [vmem:[%s6584_s2 + $0x198] sm:$0xff] }
 0x263   : > { %v774_v50 = vmul.f32 %v2757_v59, %v755_v56  ;;  %v775_v21 = vmul.f32 %v2758_v25, %v749_v41  ;;  %v823_v27 = vsel %vm822_vm6, %v3355_v28, %v3419_v44  ;;  %v829_v43 = vsel %vm822_vm6, %v3419_v44, %v3355_v28  ;;  %v2781_v41 = vld [vmem:[%s6584_s2 + $0x240] sm:$0xff]  ;;  %v2782_v56 = vld [vmem:[%s6584_s2 + $0x248] sm:$0xff] }
 0x264   : > { %v4089_v42 = vpop.permute.xlu0 %1410  ;;  %v4091_v39 = vpop.permute.xlu1 %1400  ;;  %v702_v59 = vmul.f32 %v2747_v62, %v682_v26  ;;  %v703_v49 = vmul.f32 %v2748_v63, %v676_v35  ;;  %v750_v57 = vsel %vm748_vm5, %v3357_v29, %v3421_v45  ;;  %v756_v28 = vsel %vm748_vm5, %v3421_v45, %v3357_v29  ;;  %v2772_v62 = vld [vmem:[%s6584_s2 + $0x1f8] sm:$0xff] }
 0x265   : > { %6862 = vst [vmem:[#allocation116_spill] sm:$0xff] %v4091_v39  ;;  %v712_v44 = vadd.f32 %v700_v22, %v638_v33  ;;  %v713_v24 = vadd.f32 %v701_v55, %v639_v38  ;;  %v640_v3 = vadd.f32 %v628_v18, %v566_v36  ;;  %v641_v58 = vadd.f32 %v629_v60, %v567_v23  ;;  %v2771_v60 = vld [vmem:[%s6584_s2 + $0x1f0] sm:$0xff]  ;;  %v2793_v23 = vld [vmem:[%s6584_s2 + $0x2a0] sm:$0xff] }
 0x266   : > { %1768 = vrot.lane.b32.xlu0 %v3207_v14, %s3101_s22  ;;  %1630 = vrot.lane.b32.xlu1 %v3205_v13, %s3099_s8  ;;  %v848_v1 = vmul.f32 %v2769_v37, %v829_v43  ;;  %v849_v25 = vmul.f32 %v2770_v19, %v823_v27  ;;  %v897_v29 = vsel %vm896_vm7, %v3363_v30, %v3427_v46  ;;  %v470_v27 = vld [vmem:[%s6584_s2 + $0x20] sm:$0xff]  ;;  %v471_v43 = vld [vmem:[%s6584_s2 + $0x28] sm:$0xff] }
 0x267   : > { %v903_v45 = vsel %vm896_vm7, %v3427_v46, %v3363_v30  ;;  %v776_v22 = vmul.f32 %v2759_v20, %v756_v28  ;;  %v777_v18 = vmul.f32 %v2760_v5, %v750_v57  ;;  %v824_v63 = vsel %vm822_vm6, %v3365_v31, %v3429_v47 }
 0x268   : > { %v4125_v34 = vpop.permute.xlu0 %1168  ;;  %v4141_v55 = vpop.permute.xlu1 %1412  ;;  %v830_v30 = vsel %vm822_vm6, %v3429_v47, %v3365_v31  ;;  %v786_v46 = vadd.f32 %v774_v50, %v712_v44  ;;  %v787_v35 = vadd.f32 %v775_v21, %v713_v24  ;;  %v714_v26 = vadd.f32 %v702_v59, %v640_v3  ;;  %v2794_v31 = vld [vmem:[%s6584_s2 + $0x2a8] sm:$0xff]  ;;  %v2783_v24 = vld [vmem:[%s6584_s2 + $0x250] sm:$0xff]  ;;  %v2784_v3 = vld [vmem:[%s6584_s2 + $0x258] sm:$0xff] }
 0x269   : > { %6863 = vst [vmem:[#allocation117_spill] sm:$0xff] %v4125_v34  ;;  %v715_v33 = vadd.f32 %v703_v49, %v641_v58  ;;  %v922_v38 = vmul.f32 %v2781_v41, %v903_v45  ;;  %v923_v36 = vmul.f32 %v2782_v56, %v897_v29  ;;  %v971_v47 = vsel %vm970_vm8, %v3371_v32, %v3435_v48  ;;  %v2725_v56 = vld [vmem:[%s6584_s2 + $0x80] sm:$0xff]  ;;  %v2726_v29 = vld [vmem:[%s6584_s2 + $0x88] sm:$0xff] }
 0x26a   : > { %1780 = vrot.lane.b32.xlu0 %v3213_v15, %s3101_s22  ;;  %1770 = vrot.lane.b32.xlu1 %v3215_v16, %s3101_s22  ;;  %v977_v50 = vsel %vm970_vm8, %v3435_v48, %v3371_v32  ;;  %v850_v37 = vmul.f32 %v2771_v60, %v830_v30  ;;  %v851_v19 = vmul.f32 %v2772_v62, %v824_v63  ;;  %v6868_v45 = vld [vmem:[#allocation26_spill] sm:$0xff] }
 0x26b   : > { %v456_v59 = vsel %vm453_vm1, %v3445_v51, %v3523_v0  ;;  %v462_v32 = vsel %vm453_vm1, %v3523_v0, %v3445_v51  ;;  %v860_v49 = vadd.f32 %v848_v1, %v786_v46  ;;  %v861_v20 = vadd.f32 %v849_v25, %v787_v35  ;;  %v6866_v0 = vld [vmem:[#allocation5_spill] sm:$0xff]  ;;  %v6867_v51 = vld [vmem:[#allocation3_spill] sm:$0xff] }
 0x26c   : > { %v4175_v21 = vpop.permute.xlu0 %1180  ;;  %v4191_v48 = vpop.permute.xlu1 %1170  ;;  %v788_v5 = vadd.f32 %v776_v22, %v714_v26  ;;  %v789_v57 = vadd.f32 %v777_v18, %v715_v33  ;;  %v996_v28 = vmul.f32 %v2793_v23, %v977_v50  ;;  %v997_v44 = vmul.f32 %v2794_v31, %v971_v47  ;;  %v6869_v22 = vld [vmem:[#allocation7_spill] sm:$0xff]  ;;  %v472_v31 = vld [vmem:[%s6584_s2 + $0x30] sm:$0xff]  ;;  %v473_v47 = vld [vmem:[%s6584_s2 + $0x38] sm:$0xff] }
 0x26d   : > { %6864 = vst [vmem:[#allocation118_spill] sm:$0xff] %v4175_v21  ;;  %6865 = vst [vmem:[#allocation119_spill] sm:$0xff] %v4191_v48  ;;  %v898_v58 = vsel %vm896_vm7, %v6867_v51, %v6866_v0  ;;  %v904_v1 = vsel %vm896_vm7, %v6866_v0, %v6867_v51  ;;  %v482_v25 = vmul.f32 %v470_v27, %v462_v32  ;;  %v6874_v32 = vld [vmem:[#allocation28_spill] sm:$0xff] }
 0x26e   : > { %1538 = vrot.lane.b32.xlu0 %v3177_v6, %s3098_s30  ;;  %1782 = vrot.lane.b32.xlu1 %v3221_v17, %s3101_s22  ;;  %v483_v41 = vmul.f32 %v471_v43, %v456_v59  ;;  %v529_v18 = vsel %vm526_vm2, %v6869_v22, %v6868_v45  ;;  %v535_v60 = vsel %vm526_vm2, %v6868_v45, %v6869_v22  ;;  %v2737_v43 = vld [vmem:[%s6584_s2 + $0xe0] sm:$0xff]  ;;  %v2738_v59 = vld [vmem:[%s6584_s2 + $0xe8] sm:$0xff] }
 0x26f   : > { %v934_v63 = vadd.f32 %v922_v38, %v860_v49  ;;  %v935_v30 = vadd.f32 %v923_v36, %v861_v20  ;;  %v4227_v46 = vadd.f32 %v850_v37, %v788_v5  ;;  %v4229_v35 = vadd.f32 %v851_v19, %v789_v57  ;;  %v6872_v38 = vld [vmem:[#allocation27_spill] sm:$0xff]  ;;  %v6873_v36 = vld [vmem:[#allocation8_spill] sm:$0xff]  ;;  %v6875_v49 = vld [vmem:[#allocation9_spill] sm:$0xff] }
 0x270   : > { %v4225_v62 = vpop.permute.xlu0 %1320  ;;  %v4231_v26 = vpop.permute.xlu1 %1182  ;;  %v4233_v33 = vmul.f32 %v2783_v24, %v904_v1  ;;  %v4235_v23 = vmul.f32 %v2784_v3, %v898_v58  ;;  %v457_v50 = vsel %vm453_vm1, %v6873_v36, %v6872_v38  ;;  %v463_v37 = vsel %vm453_vm1, %v6872_v38, %v6873_v36  ;;  %v6878_v45 = vld [vmem:[#allocation10_spill] sm:$0xff]  ;;  %v2750_v38 = vld [vmem:[%s6584_s2 + $0x148] sm:$0xff] }
 0x271   : > { %6870 = vst [vmem:[#allocation5_spill] sm:$0xff] %v4225_v62  ;;  %6871 = vst [vmem:[#allocation3_spill] sm:$0xff] %v4231_v26  ;;  %v556_v19 = vmul.f32 %v2725_v56, %v535_v60  ;;  %v557_v27 = vmul.f32 %v2726_v29, %v529_v18  ;;  %v603_v20 = vsel %vm600_vm3, %v6875_v49, %v6874_v32  ;;  %v2727_v56 = vld [vmem:[%s6584_s2 + $0x90] sm:$0xff]  ;;  %v2728_v29 = vld [vmem:[%s6584_s2 + $0x98] sm:$0xff] }
 0x272   : > { %1550 = vrot.lane.b32.xlu0 %v3181_v7, %s3098_s30  ;;  %v609_v5 = vsel %vm600_vm3, %v6874_v32, %v6875_v49  ;;  %1540 = vrot.lane.b32.xlu1 %v3183_v8, %s3098_s30  ;;  %v4269_v57 = vadd.f32 %v996_v28, %v934_v63  ;;  %v4271_v24 = vadd.f32 %v997_v44, %v935_v30  ;;  %v6877_v28 = vld [vmem:[#allocation29_spill] sm:$0xff]  ;;  %v6882_v36 = vld [vmem:[#allocation30_spill] sm:$0xff]  ;;  %v6884_v49 = vld [vmem:[#allocation31_spill] sm:$0xff] }
 0x273   : > { %v494_v3 = vadd.f32 %v482_v25, %v3916_v53  ;;  %v495_v0 = vadd.f32 %v483_v41, %v3921_v52  ;;  %v484_v58 = vmul.f32 %v472_v31, %v463_v37  ;;  %v485_v1 = vmul.f32 %v473_v47, %v457_v50  ;;  %v6880_v25 = vld [vmem:[#allocation6_spill] sm:$0xff]  ;;  %v6881_v41 = vld [vmem:[#allocation4_spill] sm:$0xff]  ;;  %v6883_v50 = vld [vmem:[#allocation11_spill] sm:$0xff] }
 0x274   : > { %v4275_v51 = vpop.permute.xlu0 %1332  ;;  %v530_v44 = vsel %vm526_vm2, %v6878_v45, %v6877_v28  ;;  %v536_v52 = vsel %vm526_vm2, %v6877_v28, %v6878_v45  ;;  %v4291_v53 = vpop.permute.xlu1 %1322  ;;  %v972_v22 = vsel %vm970_vm8, %v6881_v41, %v6880_v25  ;;  %v978_v18 = vsel %vm970_vm8, %v6880_v25, %v6881_v41  ;;  %v2749_v47 = vld [vmem:[%s6584_s2 + $0x140] sm:$0xff]  ;;  %v2740_v32 = vld [vmem:[%s6584_s2 + $0xf8] sm:$0xff] }
 0x275   : > { %6876 = vst [vmem:[#allocation26_spill] sm:$0xff] %v4275_v51  ;;  %6879 = vst [vmem:[#allocation7_spill] sm:$0xff] %v4291_v53  ;;  %v630_v60 = vmul.f32 %v2737_v43, %v609_v5  ;;  %v631_v63 = vmul.f32 %v2738_v59, %v603_v20  ;;  %v568_v30 = vadd.f32 %v556_v19, %v494_v3  ;;  %v2739_v59 = vld [vmem:[%s6584_s2 + $0xf0] sm:$0xff]  ;;  %v2761_v45 = vld [vmem:[%s6584_s2 + $0x1a0] sm:$0xff] }
 0x276   : > { %1690 = vrot.lane.b32.xlu0 %v3191_v10, %s3100_s9  ;;  %v569_v31 = vadd.f32 %v557_v27, %v495_v0  ;;  %v677_v37 = vsel %vm674_vm4, %v6883_v50, %v6882_v36  ;;  %v683_v43 = vsel %vm674_vm4, %v6882_v36, %v6883_v50  ;;  %1552 = vrot.lane.b32.xlu1 %v3189_v9, %s3098_s30  ;;  %v6885_v20 = vld [vmem:[#allocation12_spill] sm:$0xff]  ;;  %v6889_v25 = vld [vmem:[#allocation13_spill] sm:$0xff]  ;;  %s3105_s30 = smov 95  }
 0x277   : > { %v558_v19 = vmul.f32 %v2727_v56, %v536_v52  ;;  %v559_v27 = vmul.f32 %v2728_v29, %v530_v44  ;;  %v604_v5 = vsel %vm600_vm3, %v6885_v20, %v6884_v49  ;;  %v610_v3 = vsel %vm600_vm3, %v6884_v49, %v6885_v20  ;;  %v6887_v29 = vld [vmem:[#allocation109_spill] sm:$0xff]  ;;  %v2762_v44 = vld [vmem:[%s6584_s2 + $0x1a8] sm:$0xff]  ;;  %v6888_v52 = vld [vmem:[#allocation32_spill] sm:$0xff] }
 0x278   : > { %v4333_v0 = vpop.permute.xlu0 %1472  ;;  %v496_v56 = vadd.f32 %v484_v58, %v3924_v4  ;;  %v497_v28 = vadd.f32 %v485_v1, %v6887_v29  ;;  %v751_v41 = vsel %vm748_vm5, %v6889_v25, %v6888_v52  ;;  %v757_v4 = vsel %vm748_vm5, %v6888_v52, %v6889_v25  ;;  %v4351_v58 = vpop.permute.xlu1 %1334  ;;  %v2795_v1 = vld [vmem:[%s6584_s2 + $0x2b0] sm:$0xff]  ;;  %v2796_v29 = vld [vmem:[%s6584_s2 + $0x2b8] sm:$0xff]  ;;  %v6894_v25 = vld [vmem:[#allocation34_spill] sm:$0xff] }
 0x279   : > { %6886 = vst [vmem:[#allocation27_spill] sm:$0xff] %v4333_v0  ;;  %6890 = vst [vmem:[#allocation8_spill] sm:$0xff] %v4351_v58  ;;  %v642_v36 = vadd.f32 %v630_v60, %v568_v30  ;;  %v643_v50 = vadd.f32 %v631_v63, %v569_v31  ;;  %v704_v49 = vmul.f32 %v2749_v47, %v683_v43  ;;  %v2751_v52 = vld [vmem:[%s6584_s2 + $0x150] sm:$0xff]  ;;  %v2752_v60 = vld [vmem:[%s6584_s2 + $0x158] sm:$0xff] }
 0x27a   : > { %v705_v20 = vmul.f32 %v2750_v38, %v677_v37  ;;  %1702 = vrot.lane.b32.xlu0 %v3197_v11, %s3100_s9  ;;  %v632_v0 = vmul.f32 %v2739_v59, %v610_v3  ;;  %v633_v53 = vmul.f32 %v2740_v32, %v604_v5  ;;  %v6891_v63 = vld [vmem:[#allocation33_spill] sm:$0xff]  ;;  %v6892_v30 = vld [vmem:[#allocation14_spill] sm:$0xff]  ;;  %1692 = vrot.lane.b32.xlu1 %v3199_v12, %s3100_s9  ;;  %v2774_v3 = vld [vmem:[%s6584_s2 + $0x208] sm:$0xff] }
 0x27b   : > { %v678_v31 = vsel %vm674_vm4, %v6892_v30, %v6891_v63  ;;  %v684_v47 = vsel %vm674_vm4, %v6891_v63, %v6892_v30  ;;  %v570_v38 = vadd.f32 %v558_v19, %v496_v56  ;;  %v571_v37 = vadd.f32 %v559_v27, %v497_v28  ;;  %v2773_v32 = vld [vmem:[%s6584_s2 + $0x200] sm:$0xff]  ;;  %v6895_v63 = vld [vmem:[#allocation15_spill] sm:$0xff]  ;;  %v2763_v56 = vld [vmem:[%s6584_s2 + $0x1b0] sm:$0xff] }
 0x27c   : > { %v778_v43 = vmul.f32 %v2761_v45, %v757_v4  ;;  %v779_v59 = vmul.f32 %v2762_v44, %v751_v41  ;;  %v4381_v5 = vpop.permute.xlu0 %1484  ;;  %v825_v19 = vsel %vm822_vm6, %v6895_v63, %v6894_v25  ;;  %v831_v27 = vsel %vm822_vm6, %v6894_v25, %v6895_v63  ;;  %v2764_v28 = vld [vmem:[%s6584_s2 + $0x1b8] sm:$0xff]  ;;  %v6896_v45 = vld [vmem:[#allocation35_spill] sm:$0xff]  ;;  %v6897_v44 = vld [vmem:[#allocation16_spill] sm:$0xff]  ;;  %v4408_v30 = vpop.permute.xlu1 %1474 }
 0x27d   : > { %6893 = vst [vmem:[#allocation28_spill] sm:$0xff] %v4381_v5  ;;  %v752_v41 = vsel %vm748_vm5, %v6897_v44, %v6896_v45  ;;  %v758_v4 = vsel %vm748_vm5, %v6896_v45, %v6897_v44  ;;  %6898 = vst [vmem:[#allocation9_spill] sm:$0xff] %v4408_v30  ;;  %v998_v25 = vmul.f32 %v2795_v1, %v978_v18 }
 0x27e   : > { %v999_v63 = vmul.f32 %v2796_v29, %v972_v22  ;;  %v706_v5 = vmul.f32 %v2751_v52, %v684_v47  ;;  %v707_v58 = vmul.f32 %v2752_v60, %v678_v31  ;;  %1842 = vrot.lane.b32.xlu0 %v3207_v14, %s3102_s20  ;;  %v716_v62 = vadd.f32 %v704_v49, %v642_v36  ;;  %v2785_v49 = vld [vmem:[%s6584_s2 + $0x260] sm:$0xff]  ;;  %v6901_v29 = vld [vmem:[#allocation36_spill] sm:$0xff]  ;;  %v6902_v52 = vld [vmem:[#allocation17_spill] sm:$0xff] }
 0x27f   : > { %v717_v51 = vadd.f32 %v705_v20, %v643_v50  ;;  %v644_v48 = vadd.f32 %v632_v0, %v570_v38  ;;  %v645_v26 = vadd.f32 %v633_v53, %v571_v37  ;;  %1704 = vrot.lane.b32.xlu1 %v3205_v13, %s3100_s9  ;;  %v852_v34 = vmul.f32 %v2773_v32, %v831_v27  ;;  %v2786_v20 = vld [vmem:[%s6584_s2 + $0x268] sm:$0xff] }
 0x280   : > { %v853_v21 = vmul.f32 %v2774_v3, %v825_v19  ;;  %v780_v45 = vmul.f32 %v2763_v56, %v758_v4  ;;  %v781_v44 = vmul.f32 %v2764_v28, %v752_v41  ;;  %v4414_v30 = vpop.permute.xlu0 %1242  ;;  %v936_v22 = vadd.f32 %v4233_v33, %v4227_v46  ;;  %v4420_v50 = vpop.permute.xlu1 %1486  ;;  %v2776_v33 = vld [vmem:[%s6584_s2 + $0x218] sm:$0xff]  ;;  %v2798_v3 = vld [vmem:[%s6584_s2 + $0x2c8] sm:$0xff]  ;;  %v6906_v19 = vld [vmem:[#allocation38_spill] sm:$0xff] }
 0x281   : > { %6899 = vst [vmem:[#allocation29_spill] sm:$0xff] %v4414_v30  ;;  %v937_v18 = vadd.f32 %v4235_v23, %v4229_v35  ;;  %v790_v1 = vadd.f32 %v778_v43, %v716_v62  ;;  %v791_v36 = vadd.f32 %v779_v59, %v717_v51  ;;  %6900 = vst [vmem:[#allocation10_spill] sm:$0xff] %v4420_v50  ;;  %v6903_v23 = vld [vmem:[#allocation37_spill] sm:$0xff]  ;;  %v6904_v51 = vld [vmem:[#allocation18_spill] sm:$0xff] }
 0x282   : > { %v718_v53 = vadd.f32 %v706_v5, %v644_v48  ;;  %v719_v0 = vadd.f32 %v707_v58, %v645_v26  ;;  %v899_v46 = vsel %vm896_vm7, %v6902_v52, %v6901_v29  ;;  %v905_v62 = vsel %vm896_vm7, %v6901_v29, %v6902_v52  ;;  %1854 = vrot.lane.b32.xlu0 %v3213_v15, %s3102_s20  ;;  %v2775_v26 = vld [vmem:[%s6584_s2 + $0x210] sm:$0xff]  ;;  %v2797_v5 = vld [vmem:[%s6584_s2 + $0x2c0] sm:$0xff]  ;;  %v6907_v27 = vld [vmem:[#allocation19_spill] sm:$0xff] }
 0x283   : > { %v4438_v48 = vadd.f32 %v998_v25, %v936_v22  ;;  %v4440_v35 = vadd.f32 %v999_v63, %v937_v18  ;;  %v826_v58 = vsel %vm822_vm6, %v6904_v51, %v6903_v23  ;;  %v832_v60 = vsel %vm822_vm6, %v6903_v23, %v6904_v51  ;;  %1844 = vrot.lane.b32.xlu1 %v3215_v16, %s3102_s20  ;;  %v2787_v4 = vld [vmem:[%s6584_s2 + $0x270] sm:$0xff]  ;;  %v2788_v25 = vld [vmem:[%s6584_s2 + $0x278] sm:$0xff]  ;;  %v6909_v63 = vld [vmem:[#allocation39_spill] sm:$0xff] }
 0x284   : > { %v864_v31 = vadd.f32 %v852_v34, %v790_v1  ;;  %v865_v47 = vadd.f32 %v853_v21, %v791_v36  ;;  %v792_v38 = vadd.f32 %v780_v45, %v718_v53  ;;  %v793_v37 = vadd.f32 %v781_v44, %v719_v0  ;;  %v4458_v43 = vpop.permute.xlu0 %1254  ;;  %v4474_v56 = vpop.permute.xlu1 %1244  ;;  %v6910_v45 = vld [vmem:[#allocation20_spill] sm:$0xff]  ;;  %v2809_v18 = vld [vmem:[%s6584_s2 + $0x320] sm:$0xff]  ;;  %v2810_v1 = vld [vmem:[%s6584_s2 + $0x328] sm:$0xff] }
 0x285   : > { %6905 = vst [vmem:[#allocation6_spill] sm:$0xff] %v4458_v43  ;;  %v926_v59 = vmul.f32 %v2785_v49, %v905_v62  ;;  %v927_v32 = vmul.f32 %v2786_v20, %v899_v46  ;;  %v973_v34 = vsel %vm970_vm8, %v6907_v27, %v6906_v19  ;;  %v979_v21 = vsel %vm970_vm8, %v6906_v19, %v6907_v27  ;;  %v6911_v36 = vld [vmem:[#allocation40_spill] sm:$0xff]  ;;  %v6912_v53 = vld [vmem:[#allocation21_spill] sm:$0xff]  ;;  %v6916_v19 = vld [vmem:[#allocation22_spill] sm:$0xff] }
 0x286   : > { %6908 = vst [vmem:[#allocation4_spill] sm:$0xff] %v4474_v56  ;;  %v854_v28 = vmul.f32 %v2775_v26, %v832_v60  ;;  %v855_v41 = vmul.f32 %v2776_v33, %v826_v58  ;;  %v900_v44 = vsel %vm896_vm7, %v6910_v45, %v6909_v63  ;;  %v906_v22 = vsel %vm896_vm7, %v6909_v63, %v6910_v45  ;;  %v476_v20 = vld [vmem:[%s6584_s2 + $0x50] sm:$0xff]  ;;  %v477_v29 = vld [vmem:[%s6584_s2 + $0x58] sm:$0xff] }
 0x287   : > { %1612 = vrot.lane.b32.xlu0 %v3177_v6, %s3099_s8  ;;  %v1047_v0 = vsel %vm1044_vm9, %v6912_v53, %v6911_v36  ;;  %v1053_v49 = vsel %vm1044_vm9, %v6911_v36, %v6912_v53  ;;  %v6913_v52 = vld [vmem:[#allocation69_spill] sm:$0xff]  ;;  %v6914_v46 = vld [vmem:[#allocation84_spill] sm:$0xff]  ;;  %1856 = vrot.lane.b32.xlu1 %v3221_v17, %s3102_s20  ;;  %v1000_v33 = vmul.f32 %v2797_v5, %v979_v21 }
 0x288   : > { %v459_v62 = vsel %vm453_vm1, %v6914_v46, %v6913_v52  ;;  %v465_v26 = vsel %vm453_vm1, %v6913_v52, %v6914_v46  ;;  %v1001_v23 = vmul.f32 %v2798_v3, %v973_v34  ;;  %v2799_v51 = vld [vmem:[%s6584_s2 + $0x2d0] sm:$0xff]  ;;  %v2800_v58 = vld [vmem:[%s6584_s2 + $0x2d8] sm:$0xff]  ;;  %v4536_v5 = vpop.permute.xlu0 %1394  ;;  %v938_v3 = vadd.f32 %v926_v59, %v864_v31  ;;  %v4538_v36 = vpop.permute.xlu1 %1256  ;;  %v474_v59 = vld [vmem:[%s6584_s2 + $0x40] sm:$0xff] }
 0x289   : > { %v6915_v60 = vld [vmem:[#allocation41_spill] sm:$0xff]  ;;  %v939_v34 = vadd.f32 %v927_v32, %v865_v47  ;;  %v928_v21 = vmul.f32 %v2787_v4, %v906_v22  ;;  %v929_v45 = vmul.f32 %v2788_v25, %v900_v44  ;;  %v1074_v53 = vmul.f32 %v2809_v18, %v1053_v49  ;;  %v475_v32 = vld [vmem:[%s6584_s2 + $0x48] sm:$0xff]  ;;  %v2731_v22 = vld [vmem:[%s6584_s2 + $0xb0] sm:$0xff] }
 0x28a   : > { %v974_v27 = vsel %vm970_vm8, %v6916_v19, %v6915_v60  ;;  %v980_v63 = vsel %vm970_vm8, %v6915_v60, %v6916_v19  ;;  %v1075_v52 = vmul.f32 %v2810_v1, %v1047_v0  ;;  %v488_v46 = vmul.f32 %v476_v20, %v465_v26  ;;  %v6917_v4 = vld [vmem:[#allocation45_spill] sm:$0xff]  ;;  %v6918_v25 = vld [vmem:[#allocation43_spill] sm:$0xff]  ;;  %v2729_v60 = vld [vmem:[%s6584_s2 + $0xa0] sm:$0xff] }
 0x28b   : > { %v489_v56 = vmul.f32 %v477_v29, %v459_v62  ;;  %1624 = vrot.lane.b32.xlu0 %v3181_v7, %s3099_s8  ;;  %v866_v30 = vadd.f32 %v854_v28, %v792_v38  ;;  %v867_v43 = vadd.f32 %v855_v41, %v793_v37  ;;  %v1002_v50 = vmul.f32 %v2799_v51, %v980_v63  ;;  %v2732_v18 = vld [vmem:[%s6584_s2 + $0xb8] sm:$0xff]  ;;  %v6919_v1 = vld [vmem:[#allocation71_spill] sm:$0xff] }
 0x28c   : > { %v1003_v39 = vmul.f32 %v2800_v58, %v974_v27  ;;  %1614 = vrot.lane.b32.xlu1 %v3183_v8, %s3099_s8  ;;  %v1012_v31 = vadd.f32 %v1000_v33, %v938_v3  ;;  %v1013_v47 = vadd.f32 %v1001_v23, %v939_v34  ;;  %v458_v38 = vsel %vm453_vm1, %v6918_v25, %v6917_v4  ;;  %v4558_v28 = vpop.permute.xlu0 %1406  ;;  %v6920_v0 = vld [vmem:[#allocation49_spill] sm:$0xff]  ;;  %v6925_v3 = vld [vmem:[#allocation42_spill] sm:$0xff]  ;;  %v6926_v34 = vld [vmem:[#allocation24_spill] sm:$0xff] }
 0x28d   : > { %v464_v37 = vsel %vm453_vm1, %v6917_v4, %v6918_v25  ;;  %v940_v41 = vadd.f32 %v928_v21, %v866_v30  ;;  %v941_v44 = vadd.f32 %v929_v45, %v867_v43  ;;  %v532_v49 = vsel %vm526_vm2, %v6920_v0, %v6919_v1  ;;  %v4574_v30 = vpop.permute.xlu1 %1396  ;;  %v2741_v4 = vld [vmem:[%s6584_s2 + $0x100] sm:$0xff]  ;;  %v2742_v25 = vld [vmem:[%s6584_s2 + $0x108] sm:$0xff] }
 0x28e   : > { %v538_v20 = vsel %vm526_vm2, %v6919_v1, %v6920_v0  ;;  %6921 = vst [vmem:[#allocation30_spill] sm:$0xff] %v4574_v30  ;;  %v4576_v43 = vadd.f32 %v1074_v53, %v1012_v31  ;;  %v4578_v29 = vadd.f32 %v1075_v52, %v1013_v47  ;;  %v500_v62 = vadd.f32 %v488_v46, %v3979_v54  ;;  %v2730_v54 = vld [vmem:[%s6584_s2 + $0xa8] sm:$0xff]  ;;  %v2743_v53 = vld [vmem:[%s6584_s2 + $0x110] sm:$0xff]  ;;  %v2744_v52 = vld [vmem:[%s6584_s2 + $0x118] sm:$0xff] }
 0x28f   : > { %v501_v26 = vadd.f32 %v489_v56, %v3982_v2  ;;  %1764 = vrot.lane.b32.xlu0 %v3191_v10, %s3101_s22  ;;  %v4584_v33 = vadd.f32 %v1002_v50, %v940_v41  ;;  %v4586_v23 = vadd.f32 %v1003_v39, %v941_v44  ;;  %v486_v51 = vmul.f32 %v474_v59, %v464_v37  ;;  %v6922_v2 = vld [vmem:[#allocation64_spill] sm:$0xff]  ;;  %v6927_v46 = vld [vmem:[#allocation73_spill] sm:$0xff]  ;;  %v6928_v31 = vld [vmem:[#allocation51_spill] sm:$0xff] }
 0x290   : > { %v487_v58 = vmul.f32 %v475_v32, %v458_v38  ;;  %1626 = vrot.lane.b32.xlu1 %v3189_v9, %s3099_s8  ;;  %v6923_v56 = vld [vmem:[#allocation44_spill] sm:$0xff]  ;;  %v562_v19 = vmul.f32 %v2731_v22, %v538_v20  ;;  %v563_v27 = vmul.f32 %v2732_v18, %v532_v49  ;;  %v4604_v63 = vpop.permute.xlu0 %1546  ;;  %v1048_v21 = vsel %vm1044_vm9, %v6926_v34, %v6925_v3  ;;  %v6930_v38 = vld [vmem:[#allocation66_spill] sm:$0xff]  ;;  %v2812_v0 = vld [vmem:[%s6584_s2 + $0x338] sm:$0xff]  ;;  %s3106_s8 = smov 94  }
 0x291   : > { %v531_v50 = vsel %vm526_vm2, %v6923_v56, %v6922_v2  ;;  %v537_v39 = vsel %vm526_vm2, %v6922_v2, %v6923_v56  ;;  %6924 = vst [vmem:[#allocation11_spill] sm:$0xff] %v4604_v63  ;;  %v1054_v45 = vsel %vm1044_vm9, %v6925_v3, %v6926_v34  ;;  %v606_v47 = vsel %vm600_vm3, %v6928_v31, %v6927_v46  ;;  %v4628_v32 = vpop.permute.xlu1 %1408  ;;  %v6931_v37 = vld [vmem:[#allocation46_spill] sm:$0xff]  ;;  %v2811_v1 = vld [vmem:[%s6584_s2 + $0x330] sm:$0xff] }
 0x292   : > { %v612_v59 = vsel %vm600_vm3, %v6927_v46, %v6928_v31  ;;  %6929 = vst [vmem:[#allocation31_spill] sm:$0xff] %v4628_v32  ;;  %v605_v41 = vsel %vm600_vm3, %v6931_v37, %v6930_v38  ;;  %v611_v44 = vsel %vm600_vm3, %v6930_v38, %v6931_v37  ;;  %v574_v22 = vadd.f32 %v562_v19, %v500_v62  ;;  %v6932_v49 = vld [vmem:[#allocation110_spill] sm:$0xff]  ;;  %v6933_v2 = vld [vmem:[#allocation112_spill] sm:$0xff]  ;;  %v2756_v38 = vld [vmem:[%s6584_s2 + $0x178] sm:$0xff] }
 0x293   : > { %v575_v18 = vadd.f32 %v563_v27, %v501_v26  ;;  %1776 = vrot.lane.b32.xlu0 %v3197_v11, %s3101_s22  ;;  %v498_v20 = vadd.f32 %v486_v51, %v6932_v49  ;;  %v499_v56 = vadd.f32 %v487_v58, %v6933_v2  ;;  %v560_v3 = vmul.f32 %v2729_v60, %v537_v39  ;;  %v2753_v62 = vld [vmem:[%s6584_s2 + $0x160] sm:$0xff]  ;;  %v2754_v26 = vld [vmem:[%s6584_s2 + $0x168] sm:$0xff]  ;;  %v6934_v19 = vld [vmem:[#allocation68_spill] sm:$0xff] }
 0x294   : > { %v561_v34 = vmul.f32 %v2730_v54, %v531_v50  ;;  %1766 = vrot.lane.b32.xlu1 %v3199_v12, %s3101_s22  ;;  %v6935_v27 = vld [vmem:[#allocation48_spill] sm:$0xff]  ;;  %v636_v60 = vmul.f32 %v2743_v53, %v612_v59  ;;  %v637_v54 = vmul.f32 %v2744_v52, %v606_v47  ;;  %v4670_v50 = vpop.permute.xlu0 %1558  ;;  %v634_v39 = vmul.f32 %v2741_v4, %v611_v44  ;;  %v6937_v37 = vld [vmem:[#allocation75_spill] sm:$0xff]  ;;  %v6938_v49 = vld [vmem:[#allocation53_spill] sm:$0xff] }
 0x295   : > { %v679_v51 = vsel %vm674_vm4, %v6935_v27, %v6934_v19  ;;  %v685_v58 = vsel %vm674_vm4, %v6934_v19, %v6935_v27  ;;  %6936 = vst [vmem:[#allocation12_spill] sm:$0xff] %v4670_v50  ;;  %v635_v46 = vmul.f32 %v2742_v25, %v605_v41  ;;  %v2755_v31 = vld [vmem:[%s6584_s2 + $0x170] sm:$0xff]  ;;  %v680_v2 = vsel %vm674_vm4, %v6938_v49, %v6937_v37  ;;  %v4686_v52 = vpop.permute.xlu1 %1548 }
 0x296   : > { %v686_v53 = vsel %vm674_vm4, %v6937_v37, %v6938_v49  ;;  %6939 = vst [vmem:[#allocation109_spill] sm:$0xff] %v4686_v52  ;;  %v1076_v47 = vmul.f32 %v2811_v1, %v1054_v45  ;;  %v1077_v59 = vmul.f32 %v2812_v0, %v1048_v21  ;;  %v648_v4 = vadd.f32 %v636_v60, %v574_v22  ;;  %v2765_v45 = vld [vmem:[%s6584_s2 + $0x1c0] sm:$0xff]  ;;  %v2766_v21 = vld [vmem:[%s6584_s2 + $0x1c8] sm:$0xff]  ;;  %v6946_v37 = vld [vmem:[#allocation72_spill] sm:$0xff] }
 0x297   : > { %v649_v25 = vadd.f32 %v637_v54, %v575_v18  ;;  %1916 = vrot.lane.b32.xlu0 %v3207_v14, %s3103_s11  ;;  %v572_v41 = vadd.f32 %v560_v3, %v498_v20  ;;  %v573_v44 = vadd.f32 %v561_v34, %v499_v56  ;;  %v708_v19 = vmul.f32 %v2753_v62, %v685_v58  ;;  %v6940_v22 = vld [vmem:[#allocation70_spill] sm:$0xff]  ;;  %v6943_v58 = vld [vmem:[#allocation77_spill] sm:$0xff]  ;;  %v6944_v60 = vld [vmem:[#allocation55_spill] sm:$0xff] }
 0x298   : > { %v709_v27 = vmul.f32 %v2754_v26, %v679_v51  ;;  %1778 = vrot.lane.b32.xlu1 %v3205_v13, %s3101_s22  ;;  %v6941_v18 = vld [vmem:[#allocation50_spill] sm:$0xff]  ;;  %v710_v20 = vmul.f32 %v2755_v31, %v686_v53  ;;  %v711_v56 = vmul.f32 %v2756_v38, %v680_v2  ;;  %v4707_v3 = vpop.permute.xlu0 %1316  ;;  %v2767_v26 = vld [vmem:[%s6584_s2 + $0x1d0] sm:$0xff]  ;;  %v2768_v51 = vld [vmem:[%s6584_s2 + $0x1d8] sm:$0xff]  ;;  %v754_v54 = vsel %vm748_vm5, %v6944_v60, %v6943_v58 }
 0x299   : > { %v753_v1 = vsel %vm748_vm5, %v6941_v18, %v6940_v22  ;;  %v759_v0 = vsel %vm748_vm5, %v6940_v22, %v6941_v18  ;;  %6942 = vst [vmem:[#allocation32_spill] sm:$0xff] %v4707_v3  ;;  %v646_v34 = vadd.f32 %v634_v39, %v572_v41  ;;  %v647_v62 = vadd.f32 %v635_v46, %v573_v44  ;;  %v4723_v39 = vpop.permute.xlu1 %1560  ;;  %v2777_v46 = vld [vmem:[%s6584_s2 + $0x220] sm:$0xff]  ;;  %v2778_v38 = vld [vmem:[%s6584_s2 + $0x228] sm:$0xff]  ;;  %v6947_v49 = vld [vmem:[#allocation52_spill] sm:$0xff] }
 0x29a   : > { %v760_v31 = vsel %vm748_vm5, %v6943_v58, %v6944_v60  ;;  %6945 = vst [vmem:[#allocation13_spill] sm:$0xff] %v4723_v39  ;;  %v827_v2 = vsel %vm822_vm6, %v6947_v49, %v6946_v37  ;;  %v833_v53 = vsel %vm822_vm6, %v6946_v37, %v6947_v49  ;;  %v722_v41 = vadd.f32 %v710_v20, %v648_v4  ;;  %v2789_v3 = vld [vmem:[%s6584_s2 + $0x280] sm:$0xff]  ;;  %v2790_v37 = vld [vmem:[%s6584_s2 + $0x288] sm:$0xff]  ;;  %v6952_v49 = vld [vmem:[#allocation57_spill] sm:$0xff] }
 0x29b   : > { %v723_v44 = vadd.f32 %v711_v56, %v649_v25  ;;  %1928 = vrot.lane.b32.xlu0 %v3213_v15, %s3103_s11  ;;  %v720_v22 = vadd.f32 %v708_v19, %v646_v34  ;;  %v721_v18 = vadd.f32 %v709_v27, %v647_v62  ;;  %v782_v58 = vmul.f32 %v2765_v45, %v759_v0  ;;  %v6948_v4 = vld [vmem:[#allocation74_spill] sm:$0xff]  ;;  %v2779_v56 = vld [vmem:[%s6584_s2 + $0x230] sm:$0xff]  ;;  %v2780_v34 = vld [vmem:[%s6584_s2 + $0x238] sm:$0xff] }
 0x29c   : > { %v783_v60 = vmul.f32 %v2766_v21, %v753_v1  ;;  %1918 = vrot.lane.b32.xlu1 %v3215_v16, %s3103_s11  ;;  %v6949_v25 = vld [vmem:[#allocation54_spill] sm:$0xff]  ;;  %v784_v27 = vmul.f32 %v2767_v26, %v760_v31  ;;  %v785_v45 = vmul.f32 %v2768_v51, %v754_v54  ;;  %v4757_v21 = vpop.permute.xlu0 %1328  ;;  %v856_v1 = vmul.f32 %v2777_v46, %v833_v53  ;;  %v6951_v62 = vld [vmem:[#allocation79_spill] sm:$0xff]  ;;  %v2803_v63 = vld [vmem:[%s6584_s2 + $0x2f0] sm:$0xff] }
 0x29d   : > { %v901_v20 = vsel %vm896_vm7, %v6949_v25, %v6948_v4  ;;  %v907_v19 = vsel %vm896_vm7, %v6948_v4, %v6949_v25  ;;  %6950 = vst [vmem:[#allocation33_spill] sm:$0xff] %v4757_v21  ;;  %v857_v0 = vmul.f32 %v2778_v38, %v827_v2  ;;  %v828_v52 = vsel %vm822_vm6, %v6952_v49, %v6951_v62  ;;  %v4774_v51 = vpop.permute.xlu1 %1318 }
 0x29e   : > { %v834_v26 = vsel %vm822_vm6, %v6951_v62, %v6952_v49  ;;  %6953 = vst [vmem:[#allocation14_spill] sm:$0xff] %v4774_v51  ;;  %v4777_v54 = vadd.f32 %v1076_v47, %v4584_v33  ;;  %v4780_v31 = vadd.f32 %v1077_v59, %v4586_v23  ;;  %v796_v46 = vadd.f32 %v784_v27, %v722_v41  ;;  %v2801_v33 = vld [vmem:[%s6584_s2 + $0x2e0] sm:$0xff]  ;;  %v2802_v23 = vld [vmem:[%s6584_s2 + $0x2e8] sm:$0xff]  ;;  %v6954_v47 = vld [vmem:[#allocation76_spill] sm:$0xff] }
 0x29f   : > { %v797_v38 = vadd.f32 %v785_v45, %v723_v44  ;;  %1686 = vrot.lane.b32.xlu0 %v3177_v6, %s3100_s9  ;;  %v794_v2 = vadd.f32 %v782_v58, %v720_v22  ;;  %v795_v53 = vadd.f32 %v783_v60, %v721_v18  ;;  %v930_v4 = vmul.f32 %v2789_v3, %v907_v19  ;;  %v6955_v59 = vld [vmem:[#allocation56_spill] sm:$0xff]  ;;  %v6957_v19 = vld [vmem:[#allocation81_spill] sm:$0xff]  ;;  %v6958_v27 = vld [vmem:[#allocation59_spill] sm:$0xff] }
 0x2a0   : > { %v931_v25 = vmul.f32 %v2790_v37, %v901_v20  ;;  %1930 = vrot.lane.b32.xlu1 %v3221_v17, %s3103_s11  ;;  %v975_v41 = vsel %vm970_vm8, %v6955_v59, %v6954_v47  ;;  %v981_v3 = vsel %vm970_vm8, %v6954_v47, %v6955_v59  ;;  %v858_v44 = vmul.f32 %v2779_v56, %v834_v26  ;;  %v4800_v18 = vpop.permute.xlu0 %1468  ;;  %v2791_v37 = vld [vmem:[%s6584_s2 + $0x290] sm:$0xff]  ;;  %v2792_v20 = vld [vmem:[%s6584_s2 + $0x298] sm:$0xff]  ;;  %v2814_v56 = vld [vmem:[%s6584_s2 + $0x348] sm:$0xff] }
 0x2a1   : > { %v859_v22 = vmul.f32 %v2780_v34, %v828_v52  ;;  %6956 = vst [vmem:[#allocation34_spill] sm:$0xff] %v4800_v18  ;;  %v868_v58 = vadd.f32 %v856_v1, %v794_v2  ;;  %v869_v60 = vadd.f32 %v857_v0, %v795_v53  ;;  %v902_v45 = vsel %vm896_vm7, %v6958_v27, %v6957_v19  ;;  %v4817_v1 = vpop.permute.xlu1 %1330  ;;  %v2813_v0 = vld [vmem:[%s6584_s2 + $0x340] sm:$0xff]  ;;  %v2823_v47 = vld [vmem:[%s6584_s2 + $0x390] sm:$0xff]  ;;  %v2824_v59 = vld [vmem:[%s6584_s2 + $0x398] sm:$0xff] }
 0x2a2   : > { %v908_v52 = vsel %vm896_vm7, %v6957_v19, %v6958_v27  ;;  %6959 = vst [vmem:[#allocation15_spill] sm:$0xff] %v4817_v1  ;;  %v6960_v34 = vld [vmem:[#allocation78_spill] sm:$0xff]  ;;  %v870_v2 = vadd.f32 %v858_v44, %v796_v46  ;;  %v6962_v19 = vld [vmem:[#allocation47_spill] sm:$0xff]  ;;  %v6963_v27 = vld [vmem:[#allocation25_spill] sm:$0xff]  ;;  %v1005_v44 = vmul.f32 %v2802_v23, %v975_v41  ;;  %v933_v51 = vmul.f32 %v2792_v20, %v902_v45 }
 0x2a3   : > { %v6961_v62 = vld [vmem:[#allocation58_spill] sm:$0xff]  ;;  %v871_v53 = vadd.f32 %v859_v22, %v797_v38  ;;  %1698 = vrot.lane.b32.xlu0 %v3181_v7, %s3100_s9  ;;  %v1122_v18 = vsel %vm1118_vm10, %v6963_v27, %v6962_v19  ;;  %v1128_v46 = vsel %vm1118_vm10, %v6962_v19, %v6963_v27  ;;  %v1004_v38 = vmul.f32 %v2801_v33, %v981_v3  ;;  %v2804_v33 = vld [vmem:[%s6584_s2 + $0x2f8] sm:$0xff]  ;;  %v6965_v23 = vld [vmem:[#allocation83_spill] sm:$0xff] }
 0x2a4   : > { %v1049_v49 = vsel %vm1044_vm9, %v6961_v62, %v6960_v34  ;;  %v1055_v26 = vsel %vm1044_vm9, %v6960_v34, %v6961_v62  ;;  %1688 = vrot.lane.b32.xlu1 %v3183_v8, %s3100_s9  ;;  %v942_v22 = vadd.f32 %v930_v4, %v868_v58  ;;  %v943_v34 = vadd.f32 %v931_v25, %v869_v60  ;;  %v4851_v1 = vpop.permute.xlu0 %1480  ;;  %v6966_v41 = vld [vmem:[#allocation61_spill] sm:$0xff] }
 0x2a5   : > { %v932_v62 = vmul.f32 %v2791_v37, %v908_v52  ;;  %6964 = vst [vmem:[#allocation35_spill] sm:$0xff] %v4851_v1  ;;  %v1078_v21 = vmul.f32 %v2813_v0, %v1055_v26  ;;  %v1079_v39 = vmul.f32 %v2814_v56, %v1049_v49  ;;  %v976_v4 = vsel %vm970_vm8, %v6966_v41, %v6965_v23  ;;  %v4867_v3 = vpop.permute.xlu1 %1470  ;;  %v2825_v0 = vld [vmem:[%s6584_s2 + $0x3a0] sm:$0xff]  ;;  %v6968_v56 = vld [vmem:[#allocation80_spill] sm:$0xff] }
 0x2a6   : > { %v982_v25 = vsel %vm970_vm8, %v6965_v23, %v6966_v41  ;;  %6967 = vst [vmem:[#allocation16_spill] sm:$0xff] %v4867_v3  ;;  %v1150_v58 = vmul.f32 %v2823_v47, %v1128_v46  ;;  %v1151_v60 = vmul.f32 %v2824_v59, %v1122_v18  ;;  %v945_v20 = vadd.f32 %v933_v51, %v871_v53  ;;  %v6969_v49 = vld [vmem:[#allocation60_spill] sm:$0xff]  ;;  %v2826_v51 = vld [vmem:[%s6584_s2 + $0x3a8] sm:$0xff]  ;;  %v6970_v47 = vld [vmem:[#allocation82_spill] sm:$0xff] }
 0x2a7   : > { %v944_v37 = vadd.f32 %v932_v62, %v870_v2  ;;  %1838 = vrot.lane.b32.xlu0 %v3191_v10, %s3102_s20  ;;  %v1016_v45 = vadd.f32 %v1004_v38, %v942_v22  ;;  %v1017_v52 = vadd.f32 %v1005_v44, %v943_v34  ;;  %v1123_v26 = vsel %vm1118_vm10, %v6969_v49, %v6968_v56  ;;  %v2837_v2 = vld [vmem:[%s6584_s2 + $0x400] sm:$0xff]  ;;  %v2838_v53 = vld [vmem:[%s6584_s2 + $0x408] sm:$0xff]  ;;  %v2815_v62 = vld [vmem:[%s6584_s2 + $0x350] sm:$0xff] }
 0x2a8   : > { %v1129_v18 = vsel %vm1118_vm10, %v6968_v56, %v6969_v49  ;;  %1700 = vrot.lane.b32.xlu1 %v3189_v9, %s3100_s9  ;;  %v6971_v59 = vld [vmem:[#allocation62_spill] sm:$0xff]  ;;  %v1006_v46 = vmul.f32 %v2803_v63, %v982_v25  ;;  %v1007_v38 = vmul.f32 %v2804_v33, %v976_v4  ;;  %v4901_v44 = vpop.permute.xlu0 %1620  ;;  %v2816_v23 = vld [vmem:[%s6584_s2 + $0x358] sm:$0xff]  ;;  %v6974_v56 = vld [vmem:[#allocation63_spill] sm:$0xff]  ;;  %vm1636_vm1 = vcmp.lt.s32.totalorder %v3845_v61, 112 }
 0x2a9   : > { %v1197_v19 = vsel %vm1192_vm11, %v6971_v59, %v6970_v47  ;;  %v1203_v27 = vsel %vm1192_vm11, %v6970_v47, %v6971_v59  ;;  %6972 = vst [vmem:[#allocation36_spill] sm:$0xff] %v4901_v44  ;;  %v1090_v22 = vadd.f32 %v1078_v21, %v1016_v45  ;;  %v1091_v34 = vadd.f32 %v1079_v39, %v1017_v52  ;;  %v6973_v41 = vld [vmem:[#allocation85_spill] sm:$0xff]  ;;  %v4917_v21 = vpop.permute.xlu1 %1482  ;;  %v2821_v4 = vld [vmem:[%s6584_s2 + $0x380] sm:$0xff]  ;;  %v2822_v25 = vld [vmem:[%s6584_s2 + $0x388] sm:$0xff] }
 0x2aa   : > { %v1050_v49 = vsel %vm1044_vm9, %v6974_v56, %v6973_v41  ;;  %v1056_v63 = vsel %vm1044_vm9, %v6973_v41, %v6974_v56  ;;  %6975 = vst [vmem:[#allocation17_spill] sm:$0xff] %v4917_v21  ;;  %v1018_v39 = vadd.f32 %v1006_v46, %v944_v37  ;;  %v1019_v33 = vadd.f32 %v1007_v38, %v945_v20  ;;  %v6976_v45 = vld [vmem:[#allocation86_spill] sm:$0xff]  ;;  %v6977_v52 = vld [vmem:[#allocation23_spill] sm:$0xff]  ;;  %v6979_v3 = vld [vmem:[#allocation88_spill] sm:$0xff] }
 0x2ab   : > { %v1121_v47 = vsel %vm1118_vm10, %v6977_v52, %v6976_v45  ;;  %v1127_v59 = vsel %vm1118_vm10, %v6976_v45, %v6977_v52  ;;  %1850 = vrot.lane.b32.xlu0 %v3197_v11, %s3102_s20  ;;  %v1152_v37 = vmul.f32 %v2825_v0, %v1129_v18  ;;  %v1153_v20 = vmul.f32 %v2826_v51, %v1123_v26  ;;  %v2849_v44 = vld [vmem:[%s6584_s2 + $0x460] sm:$0xff]  ;;  %v2850_v45 = vld [vmem:[%s6584_s2 + $0x468] sm:$0xff] }
 0x2ac   : > { %v1226_v46 = vmul.f32 %v2837_v2, %v1203_v27  ;;  %v1227_v38 = vmul.f32 %v2838_v53, %v1197_v19  ;;  %1840 = vrot.lane.b32.xlu1 %v3199_v12, %s3102_s20  ;;  %v1080_v41 = vmul.f32 %v2815_v62, %v1056_v63  ;;  %v1081_v56 = vmul.f32 %v2816_v23, %v1050_v49  ;;  %v6978_v52 = vld [vmem:[#allocation90_spill] sm:$0xff]  ;;  %v4952_v18 = vpop.permute.xlu0 %1632  ;;  %v2827_v53 = vld [vmem:[%s6584_s2 + $0x3b0] sm:$0xff]  ;;  %v2828_v19 = vld [vmem:[%s6584_s2 + $0x3b8] sm:$0xff] }
 0x2ad   : > { %v1271_v0 = vsel %vm1266_vm12, %v6979_v3, %v6978_v52  ;;  %v1277_v26 = vsel %vm1266_vm12, %v6978_v52, %v6979_v3  ;;  %6980 = vst [vmem:[#allocation37_spill] sm:$0xff] %v4952_v18  ;;  %v1148_v51 = vmul.f32 %v2821_v4, %v1127_v59  ;;  %v1149_v2 = vmul.f32 %v2822_v25, %v1121_v47  ;;  %v6981_v27 = vld [vmem:[#allocation87_spill] sm:$0xff]  ;;  %v6982_v62 = vld [vmem:[#allocation65_spill] sm:$0xff]  ;;  %v4968_v49 = vpop.permute.xlu1 %1622 }
 0x2ae   : > { %v1124_v23 = vsel %vm1118_vm10, %v6982_v62, %v6981_v27  ;;  %v1130_v3 = vsel %vm1118_vm10, %v6981_v27, %v6982_v62  ;;  %6983 = vst [vmem:[#allocation18_spill] sm:$0xff] %v4968_v49  ;;  %v4971_v63 = vadd.f32 %v1150_v58, %v4777_v54  ;;  %v4974_v4 = vadd.f32 %v1151_v60, %v4780_v31  ;;  %v2839_v54 = vld [vmem:[%s6584_s2 + $0x410] sm:$0xff]  ;;  %v2840_v31 = vld [vmem:[%s6584_s2 + $0x418] sm:$0xff]  ;;  %v6985_v60 = vld [vmem:[#allocation67_spill] sm:$0xff] }
 0x2af   : > { %v1092_v25 = vadd.f32 %v1080_v41, %v1018_v39  ;;  %v1093_v47 = vadd.f32 %v1081_v56, %v1019_v33  ;;  %1990 = vrot.lane.b32.xlu0 %v3207_v14, %s3104_s26  ;;  %v1164_v59 = vadd.f32 %v1152_v37, %v1090_v22  ;;  %v1165_v52 = vadd.f32 %v1153_v20, %v1091_v34  ;;  %v6984_v58 = vld [vmem:[#allocation89_spill] sm:$0xff] }
 0x2b0   : > { %v1300_v18 = vmul.f32 %v2849_v44, %v1277_v26  ;;  %v1301_v21 = vmul.f32 %v2850_v45, %v1271_v0  ;;  %1852 = vrot.lane.b32.xlu1 %v3205_v13, %s3102_s20  ;;  %v1154_v27 = vmul.f32 %v2827_v53, %v1130_v3  ;;  %v1155_v62 = vmul.f32 %v2828_v19, %v1124_v23  ;;  %v4994_v34 = vpop.permute.xlu0 %1390  ;;  %v2805_v0 = vld [vmem:[%s6584_s2 + $0x300] sm:$0xff]  ;;  %v2806_v26 = vld [vmem:[%s6584_s2 + $0x308] sm:$0xff]  ;;  %v6990_v23 = vld [vmem:[#allocation93_spill] sm:$0xff] }
 0x2b1   : > { %v1198_v22 = vsel %vm1192_vm11, %v6985_v60, %v6984_v58  ;;  %v1204_v44 = vsel %vm1192_vm11, %v6984_v58, %v6985_v60  ;;  %6986 = vst [vmem:[#allocation38_spill] sm:$0xff] %v4994_v34  ;;  %v1238_v39 = vadd.f32 %v1226_v46, %v1164_v59  ;;  %v1239_v33 = vadd.f32 %v1227_v38, %v1165_v52  ;;  %v5002_v41 = vpop.permute.xlu1 %1634  ;;  %v6988_v46 = vld [vmem:[#allocation94_spill] sm:$0xff]  ;;  %v6989_v38 = vld [vmem:[#allocation92_spill] sm:$0xff]  ;;  %v6991_v3 = vld [vmem:[#allocation91_spill] sm:$0xff] }
 0x2b2   : > { %v4997_v37 = vadd.f32 %v1148_v51, %v4576_v43  ;;  %v5000_v20 = vadd.f32 %v1149_v2, %v4578_v29  ;;  %6987 = vst [vmem:[#allocation19_spill] sm:$0xff] %v5002_v41  ;;  %v1166_v56 = vadd.f32 %v1154_v27, %v1092_v25  ;;  %v1167_v45 = vadd.f32 %v1155_v62, %v1093_v47  ;;  %v6992_v59 = vld [vmem:[#allocation97_spill] sm:$0xff]  ;;  %v6993_v52 = vld [vmem:[#allocation95_spill] sm:$0xff]  ;;  %v7000_v34 = vld [vmem:[#allocation102_spill] sm:$0xff] }
 0x2b3   : > { %v1045_v43 = vsel %vm1044_vm9, %v6989_v38, %v6988_v46  ;;  %v1051_v29 = vsel %vm1044_vm9, %v6988_v46, %v6989_v38  ;;  %2002 = vrot.lane.b32.xlu0 %v3213_v15, %s3104_s26  ;;  %v1228_v51 = vmul.f32 %v2839_v54, %v1204_v44  ;;  %v1229_v2 = vmul.f32 %v2840_v31, %v1198_v22  ;;  %v2851_v31 = vld [vmem:[%s6584_s2 + $0x470] sm:$0xff]  ;;  %v2833_v22 = vld [vmem:[%s6584_s2 + $0x3e0] sm:$0xff]  ;;  %v2834_v44 = vld [vmem:[%s6584_s2 + $0x3e8] sm:$0xff] }
 0x2b4   : > { %v5020_v53 = vadd.f32 %v1300_v18, %v1238_v39  ;;  %v5022_v19 = vadd.f32 %v1301_v21, %v1239_v33  ;;  %1992 = vrot.lane.b32.xlu1 %v3215_v16, %s3104_s26  ;;  %v1272_v25 = vsel %vm1266_vm12, %v6991_v3, %v6990_v23  ;;  %v1278_v47 = vsel %vm1266_vm12, %v6990_v23, %v6991_v3  ;;  %v2807_v18 = vld [vmem:[%s6584_s2 + $0x310] sm:$0xff]  ;;  %v2808_v21 = vld [vmem:[%s6584_s2 + $0x318] sm:$0xff]  ;;  %v5048_v54 = vpop.permute.xlu0 %1402  ;;  %v6995_v39 = vld [vmem:[#allocation98_spill] sm:$0xff] }
 0x2b5   : > { %v1046_v27 = vsel %vm1044_vm9, %v6993_v52, %v6992_v59  ;;  %v1052_v62 = vsel %vm1044_vm9, %v6992_v59, %v6993_v52  ;;  %6994 = vst [vmem:[#allocation39_spill] sm:$0xff] %v5048_v54  ;;  %v1070_v58 = vmul.f32 %v2805_v0, %v1051_v29  ;;  %v1071_v60 = vmul.f32 %v2806_v26, %v1045_v43  ;;  %v6996_v33 = vld [vmem:[#allocation96_spill] sm:$0xff]  ;;  %v5067_v0 = vpop.permute.xlu1 %1392  ;;  %v2852_v29 = vld [vmem:[%s6584_s2 + $0x478] sm:$0xff]  ;;  %v6999_v52 = vld [vmem:[#allocation99_spill] sm:$0xff] }
 0x2b6   : > { %v1195_v46 = vsel %vm1192_vm11, %v6996_v33, %v6995_v39  ;;  %v1201_v38 = vsel %vm1192_vm11, %v6995_v39, %v6996_v33  ;;  %6997 = vst [vmem:[#allocation20_spill] sm:$0xff] %v5067_v0  ;;  %v1240_v26 = vadd.f32 %v1228_v51, %v1166_v56  ;;  %v1241_v43 = vadd.f32 %v1229_v2, %v1167_v45  ;;  %v2835_v23 = vld [vmem:[%s6584_s2 + $0x3f0] sm:$0xff]  ;;  %v2836_v3 = vld [vmem:[%s6584_s2 + $0x3f8] sm:$0xff]  ;;  %v2861_v2 = vld [vmem:[%s6584_s2 + $0x520] sm:$0xff] }
 0x2b7   : > { %v6998_v59 = vld [vmem:[#allocation101_spill] sm:$0xff]  ;;  %1760 = vrot.lane.b32.xlu0 %v3177_v6, %s3101_s22  ;;  %v1072_v45 = vmul.f32 %v2807_v18, %v1052_v62  ;;  %v1073_v51 = vmul.f32 %v2808_v21, %v1046_v27  ;;  %v2862_v33 = vld [vmem:[%s6584_s2 + $0x528] sm:$0xff]  ;;  %v7001_v54 = vld [vmem:[#allocation100_spill] sm:$0xff]  ;;  %v1222_v18 = vmul.f32 %v2833_v22, %v1201_v38  ;;  %v1223_v21 = vmul.f32 %v2834_v44, %v1195_v46 }
 0x2b8   : > { %v1196_v39 = vsel %vm1192_vm11, %v6999_v52, %v6998_v59  ;;  %v1202_v56 = vsel %vm1192_vm11, %v6998_v59, %v6999_v52  ;;  %v1345_v59 = vsel %vm1340_vm13, %v7001_v54, %v7000_v34  ;;  %v1351_v52 = vsel %vm1340_vm13, %v7000_v34, %v7001_v54  ;;  %2004 = vrot.lane.b32.xlu1 %v3221_v17, %s3104_s26  ;;  %v2863_v27 = vld [vmem:[%s6584_s2 + $0x530] sm:$0xff]  ;;  %v2864_v62 = vld [vmem:[%s6584_s2 + $0x538] sm:$0xff]  ;;  %v7003_v41 = vld [vmem:[#allocation103_spill] sm:$0xff]  ;;  %v5119_v54 = vpop.permute.xlu0 %1542 }
 0x2b9   : > { %v7002_v49 = vld [vmem:[#allocation105_spill] sm:$0xff]  ;;  %7004 = vst [vmem:[#allocation40_spill] sm:$0xff] %v5119_v54  ;;  %v1302_v22 = vmul.f32 %v2851_v31, %v1278_v47  ;;  %v1303_v44 = vmul.f32 %v2852_v29, %v1272_v25  ;;  %v1224_v46 = vmul.f32 %v2835_v23, %v1202_v56  ;;  %v1225_v38 = vmul.f32 %v2836_v3, %v1196_v39  ;;  %v5121_v1 = vpop.permute.xlu1 %1404  ;;  %v2819_v23 = vld [vmem:[%s6584_s2 + $0x370] sm:$0xff]  ;;  %v7008_v39 = vld [vmem:[#allocation111_spill] sm:$0xff] }
 0x2ba   : > { %v1346_v0 = vsel %vm1340_vm13, %v7003_v41, %v7002_v49  ;;  %v1352_v34 = vsel %vm1340_vm13, %v7002_v49, %v7003_v41  ;;  %v5124_v50 = vadd.f32 %v1070_v58, %v4269_v57  ;;  %v5127_v30 = vadd.f32 %v1071_v60, %v4271_v24  ;;  %v2820_v3 = vld [vmem:[%s6584_s2 + $0x378] sm:$0xff]  ;;  %v7009_v56 = vld [vmem:[#allocation107_spill] sm:$0xff] }
 0x2bb   : > { %v1374_v32 = vmul.f32 %v2861_v2, %v1345_v59  ;;  %v1375_v17 = vmul.f32 %v2862_v33, %v1351_v52  ;;  %1772 = vrot.lane.b32.xlu0 %v3181_v7, %s3101_s22  ;;  %v1314_v49 = vadd.f32 %v1302_v22, %v1240_v26  ;;  %v1315_v41 = vadd.f32 %v1303_v44, %v1241_v43  ;;  %v7006_v26 = vld [vmem:[#allocation104_spill] sm:$0xff]  ;;  %v7010_v2 = vld [vmem:[#allocation113_spill] sm:$0xff] }
 0x2bc   : > { %v1376_v54 = vmul.f32 %v2863_v27, %v1346_v0  ;;  %v1377_v47 = vmul.f32 %v2864_v62, %v1352_v34  ;;  %1762 = vrot.lane.b32.xlu1 %v3183_v8, %s3101_s22  ;;  %v5134_v25 = vadd.f32 %v1072_v45, %v4438_v48  ;;  %v5137_v57 = vadd.f32 %v1073_v51, %v4440_v35  ;;  %v5145_v58 = vpop.permute.xlu0 %1554  ;;  %v2817_v48 = vld [vmem:[%s6584_s2 + $0x360] sm:$0xff]  ;;  %v2818_v35 = vld [vmem:[%s6584_s2 + $0x368] sm:$0xff]  ;;  %v7011_v33 = vld [vmem:[#allocation108_spill] sm:$0xff] }
 0x2bd   : > { %v5140_v24 = vadd.f32 %v1222_v18, %v4997_v37  ;;  %v5143_v31 = vadd.f32 %v1223_v21, %v5000_v20  ;;  %v5148_v60 = vadd.f32 %v1224_v46, %v4971_v63  ;;  %v5151_v0 = vadd.f32 %v1225_v38, %v4974_v4  ;;  %v7005_v37 = vld [vmem:[#allocation106_spill] sm:$0xff]  ;;  %v5167_v4 = vpop.permute.xlu1 %1544  ;;  %v2846_v51 = vld [vmem:[%s6584_s2 + $0x448] sm:$0xff]  ;;  %v2847_v27 = vld [vmem:[%s6584_s2 + $0x450] sm:$0xff] }
 0x2be   : > { %v1119_v20 = vsel %vm1118_vm10, %v7006_v26, %v7005_v37  ;;  %v1125_v63 = vsel %vm1118_vm10, %v7005_v37, %v7006_v26  ;;  %7007 = vst [vmem:[#allocation21_spill] sm:$0xff] %v5167_v4  ;;  %v5170_v43 = vadd.f32 %v1374_v32, %v5020_v53  ;;  %v5173_v29 = vadd.f32 %v1375_v17, %v5022_v19  ;;  %v2845_v19 = vld [vmem:[%s6584_s2 + $0x440] sm:$0xff]  ;;  %v2848_v62 = vld [vmem:[%s6584_s2 + $0x458] sm:$0xff] }
 0x2bf   : > { %v1120_v45 = vsel %vm1118_vm10, %v7009_v56, %v7008_v39  ;;  %v1126_v32 = vsel %vm1118_vm10, %v7008_v39, %v7009_v56  ;;  %1912 = vrot.lane.b32.xlu0 %v3191_v10, %s3103_s11  ;;  %v5191_v17 = vadd.f32 %v1376_v54, %v1314_v49  ;;  %v5193_v53 = vadd.f32 %v1377_v47, %v1315_v41  ;;  %v7012_v34 = vld [vmem:[#allocation114_spill] sm:$0xff]  ;;  %v2874_v41 = vld [vmem:[%s6584_s2 + $0x588] sm:$0xff] }
 0x2c0   : > { %v1269_v59 = vsel %vm1266_vm12, %v7011_v33, %v7010_v2  ;;  %v1275_v52 = vsel %vm1266_vm12, %v7010_v2, %v7011_v33  ;;  %1774 = vrot.lane.b32.xlu1 %v3189_v9, %s3101_s22  ;;  %v1144_v18 = vmul.f32 %v2817_v48, %v1125_v63  ;;  %v1145_v21 = vmul.f32 %v2818_v35, %v1119_v20  ;;  %v5226_v44 = vpop.permute.xlu0 %1694  ;;  %v2873_v49 = vld [vmem:[%s6584_s2 + $0x580] sm:$0xff]  ;;  %v7014_v47 = vld [vmem:[#allocation115_spill] sm:$0xff]  ;;  %v2875_v20 = vld [vmem:[%s6584_s2 + $0x590] sm:$0xff] }
 0x2c1   : > { %v1270_v54 = vsel %vm1266_vm12, %v7012_v34, %v4053_v40  ;;  %v1276_v22 = vsel %vm1266_vm12, %v4053_v40, %v7012_v34  ;;  %7013 = vst [vmem:[#allocation69_spill] sm:$0xff] %v5226_v44  ;;  %v1146_v46 = vmul.f32 %v2819_v23, %v1126_v32  ;;  %v1147_v38 = vmul.f32 %v2820_v3, %v1120_v45  ;;  %v5242_v35 = vpop.permute.xlu1 %1556  ;;  %v2876_v63 = vld [vmem:[%s6584_s2 + $0x598] sm:$0xff]  ;;  %v7015_v23 = vld [vmem:[#allocation116_spill] sm:$0xff]  ;;  %v2829_v45 = vld [vmem:[%s6584_s2 + $0x3c0] sm:$0xff] }
 0x2c2   : > { %v1419_v48 = vsel %vm1414_vm14, %v7014_v47, %v4089_v42  ;;  %v1425_v40 = vsel %vm1414_vm14, %v4089_v42, %v7014_v47  ;;  %v1296_v37 = vmul.f32 %v2845_v19, %v1275_v52  ;;  %v1297_v26 = vmul.f32 %v2846_v51, %v1269_v59  ;;  %v2830_v32 = vld [vmem:[%s6584_s2 + $0x3c8] sm:$0xff]  ;;  %v7016_v19 = vld [vmem:[#allocation118_spill] sm:$0xff]  ;;  %v7017_v51 = vld [vmem:[#allocation117_spill] sm:$0xff] }
 0x2c3   : > { %v1420_v3 = vsel %vm1414_vm14, %v7015_v23, %v4141_v55  ;;  %v1426_v42 = vsel %vm1414_vm14, %v4141_v55, %v7015_v23  ;;  %1924 = vrot.lane.b32.xlu0 %v3197_v11, %s3103_s11  ;;  %v1298_v39 = vmul.f32 %v2847_v27, %v1276_v22  ;;  %v1299_v56 = vmul.f32 %v2848_v62, %v1270_v54  ;;  %v2831_v52 = vld [vmem:[%s6584_s2 + $0x3d0] sm:$0xff]  ;;  %v2832_v27 = vld [vmem:[%s6584_s2 + $0x3d8] sm:$0xff]  ;;  %v7018_v62 = vld [vmem:[#allocation3_spill] sm:$0xff] }
 0x2c4   : > { %v1193_v2 = vsel %vm1192_vm11, %v7017_v51, %v7016_v19  ;;  %v1199_v55 = vsel %vm1192_vm11, %v7016_v19, %v7017_v51  ;;  %1914 = vrot.lane.b32.xlu1 %v3199_v12, %s3103_s11  ;;  %v1448_v33 = vmul.f32 %v2873_v49, %v1419_v48  ;;  %v1449_v59 = vmul.f32 %v2874_v41, %v1425_v40  ;;  %v7019_v34 = vld [vmem:[#allocation119_spill] sm:$0xff]  ;;  %v5290_v49 = vpop.permute.xlu0 %1706 }
 0x2c5   : > { %v1194_v54 = vsel %vm1192_vm11, %v7019_v34, %v7018_v62  ;;  %v1200_v22 = vsel %vm1192_vm11, %v7018_v62, %v7019_v34  ;;  %v1156_v41 = vadd.f32 %v1144_v18, %v5124_v50  ;;  %v1157_v47 = vadd.f32 %v1145_v21, %v5127_v30  ;;  %v5294_v23 = vpop.permute.xlu1 %1696 }
 0x2c6   : > { %v1450_v48 = vmul.f32 %v2875_v20, %v1420_v3  ;;  %v1451_v40 = vmul.f32 %v2876_v63, %v1426_v42  ;;  %7020 = vst [vmem:[#allocation84_spill] sm:$0xff] %v5294_v23  ;;  %v1158_v19 = vadd.f32 %v1146_v46, %v5134_v25  ;;  %v1159_v51 = vadd.f32 %v1147_v38, %v5137_v57  ;;  %v2859_v63 = vld [vmem:[%s6584_s2 + $0x510] sm:$0xff]  ;;  %v2860_v3 = vld [vmem:[%s6584_s2 + $0x518] sm:$0xff] }
 0x2c7   : > { %v1218_v44 = vmul.f32 %v2829_v45, %v1199_v55  ;;  %v1219_v4 = vmul.f32 %v2830_v32, %v1193_v2  ;;  %2064 = vrot.lane.b32.xlu0 %v3207_v14, %s3105_s30  ;;  %v5301_v62 = vadd.f32 %v1296_v37, %v5140_v24  ;;  %v5304_v50 = vadd.f32 %v1297_v26, %v5143_v31  ;;  %v7023_v37 = vld [vmem:[#allocation5_spill] sm:$0xff]  ;;  %v7025_v42 = vld [vmem:[#allocation8_spill] sm:$0xff]  ;;  %v2885_v32 = vld [vmem:[%s6584_s2 + $0x5e0] sm:$0xff] }
 0x2c8   : > { %v1220_v30 = vmul.f32 %v2831_v52, %v1200_v22  ;;  %v1221_v18 = vmul.f32 %v2832_v27, %v1194_v54  ;;  %1926 = vrot.lane.b32.xlu1 %v3205_v13, %s3103_s11  ;;  %v5309_v25 = vadd.f32 %v1298_v39, %v5148_v60  ;;  %v5312_v57 = vadd.f32 %v1299_v56, %v5151_v0  ;;  %v5320_v46 = vpop.permute.xlu0 %1464  ;;  %v2857_v60 = vld [vmem:[%s6584_s2 + $0x500] sm:$0xff]  ;;  %v2858_v0 = vld [vmem:[%s6584_s2 + $0x508] sm:$0xff]  ;;  %v7027_v55 = vld [vmem:[#allocation28_spill] sm:$0xff] }
 0x2c9   : > { %v5315_v21 = vadd.f32 %v1448_v33, %v5170_v43  ;;  %v5318_v24 = vadd.f32 %v1449_v59, %v5173_v29  ;;  %7021 = vst [vmem:[#allocation41_spill] sm:$0xff] %v5320_v46  ;;  %v5323_v31 = vadd.f32 %v1450_v48, %v5191_v17  ;;  %v5326_v38 = vadd.f32 %v1451_v40, %v5193_v53  ;;  %v7022_v43 = vld [vmem:[#allocation26_spill] sm:$0xff]  ;;  %v5342_v53 = vpop.permute.xlu1 %1708  ;;  %v7026_v39 = vld [vmem:[#allocation7_spill] sm:$0xff]  ;;  %v2887_v54 = vld [vmem:[%s6584_s2 + $0x5f0] sm:$0xff] }
 0x2ca   : > { %v1343_v29 = vsel %vm1340_vm13, %v7023_v37, %v7022_v43  ;;  %v1349_v17 = vsel %vm1340_vm13, %v7022_v43, %v7023_v37  ;;  %7024 = vst [vmem:[#allocation22_spill] sm:$0xff] %v5342_v53  ;;  %v5344_v26 = vadd.f32 %v1218_v44, %v1156_v41  ;;  %v5346_v20 = vadd.f32 %v1219_v4, %v1157_v47  ;;  %v2886_v2 = vld [vmem:[%s6584_s2 + $0x5e8] sm:$0xff]  ;;  %v2888_v22 = vld [vmem:[%s6584_s2 + $0x5f8] sm:$0xff]  ;;  %v7029_v41 = vld [vmem:[#allocation10_spill] sm:$0xff] }
 0x2cb   : > { %v1344_v56 = vsel %vm1340_vm13, %v7026_v39, %v7025_v42  ;;  %v1350_v44 = vsel %vm1340_vm13, %v7025_v42, %v7026_v39  ;;  %2076 = vrot.lane.b32.xlu0 %v3213_v15, %s3105_s30  ;;  %v5365_v4 = vadd.f32 %v1220_v30, %v1158_v19  ;;  %v5367_v45 = vadd.f32 %v1221_v18, %v1159_v51  ;;  %v7028_v33 = vld [vmem:[#allocation27_spill] sm:$0xff]  ;;  %v7030_v47 = vld [vmem:[#allocation9_spill] sm:$0xff]  ;;  %v2841_v18 = vld [vmem:[%s6584_s2 + $0x420] sm:$0xff] }
 0x2cc   : > { %v1493_v59 = vsel %vm1488_vm15, %v7028_v33, %v7027_v55  ;;  %v1499_v52 = vsel %vm1488_vm15, %v7027_v55, %v7028_v33  ;;  %2066 = vrot.lane.b32.xlu1 %v3215_v16, %s3105_s30  ;;  %v1370_v27 = vmul.f32 %v2857_v60, %v1343_v29  ;;  %v1371_v34 = vmul.f32 %v2858_v0, %v1349_v17  ;;  %v5399_v19 = vpop.permute.xlu0 %1476  ;;  %v2842_v60 = vld [vmem:[%s6584_s2 + $0x428] sm:$0xff]  ;;  %v7032_v0 = vld [vmem:[#allocation6_spill] sm:$0xff]  ;;  %v7033_v43 = vld [vmem:[#allocation29_spill] sm:$0xff] }
 0x2cd   : > { %v1494_v48 = vsel %vm1488_vm15, %v7030_v47, %v7029_v41  ;;  %v1500_v40 = vsel %vm1488_vm15, %v7029_v41, %v7030_v47  ;;  %7031 = vst [vmem:[#allocation45_spill] sm:$0xff] %v5399_v19  ;;  %v1372_v51 = vmul.f32 %v2859_v63, %v1344_v56  ;;  %v1373_v30 = vmul.f32 %v2860_v3, %v1350_v44  ;;  %v5415_v17 = vpop.permute.xlu1 %1466  ;;  %v2843_v42 = vld [vmem:[%s6584_s2 + $0x430] sm:$0xff]  ;;  %v2844_v39 = vld [vmem:[%s6584_s2 + $0x438] sm:$0xff]  ;;  %v2869_v33 = vld [vmem:[%s6584_s2 + $0x560] sm:$0xff] }
 0x2ce   : > { %v1267_v37 = vsel %vm1266_vm12, %v7033_v43, %v7032_v0  ;;  %v1273_v29 = vsel %vm1266_vm12, %v7032_v0, %v7033_v43  ;;  %v1522_v63 = vmul.f32 %v2885_v32, %v1493_v59  ;;  %v1523_v3 = vmul.f32 %v2886_v2, %v1499_v52  ;;  %v7034_v56 = vld [vmem:[#allocation4_spill] sm:$0xff]  ;;  %v2870_v59 = vld [vmem:[%s6584_s2 + $0x568] sm:$0xff]  ;;  %v7037_v0 = vld [vmem:[#allocation30_spill] sm:$0xff] }
 0x2cf   : > { %v1268_v44 = vsel %vm1266_vm12, %v7034_v56, %v4538_v36  ;;  %v1274_v55 = vsel %vm1266_vm12, %v4538_v36, %v7034_v56  ;;  %1834 = vrot.lane.b32.xlu0 %v3177_v6, %s3102_s20  ;;  %v1524_v32 = vmul.f32 %v2887_v54, %v1494_v48  ;;  %v1525_v2 = vmul.f32 %v2888_v22, %v1500_v40  ;;  %v7035_v54 = vld [vmem:[#allocation2_spill] sm:$0xff]  ;;  %v2871_v47 = vld [vmem:[%s6584_s2 + $0x570] sm:$0xff]  ;;  %v2872_v48 = vld [vmem:[%s6584_s2 + $0x578] sm:$0xff] }
 0x2d0   : > { %v1417_v52 = vsel %vm1414_vm14, %v4536_v5, %v4558_v28  ;;  %v1423_v36 = vsel %vm1414_vm14, %v4558_v28, %v4536_v5  ;;  %2078 = vrot.lane.b32.xlu1 %v7035_v54, %s3105_s30  ;;  %v1292_v22 = vmul.f32 %v2841_v18, %v1273_v29  ;;  %v1293_v41 = vmul.f32 %v2842_v60, %v1267_v37  ;;  %v7036_v40 = vld [vmem:[#allocation31_spill] sm:$0xff]  ;;  %v5463_v28 = vpop.permute.xlu0 %1616 }
 0x2d1   : > { %v1418_v43 = vsel %vm1414_vm14, %v7037_v0, %v7036_v40  ;;  %v1424_v5 = vsel %vm1414_vm14, %v7036_v40, %v7037_v0  ;;  %v1382_v18 = vadd.f32 %v1370_v27, %v5301_v62  ;;  %v1383_v60 = vadd.f32 %v1371_v34, %v5304_v50  ;;  %v5468_v56 = vpop.permute.xlu1 %1478  ;;  %v2855_v40 = vld [vmem:[%s6584_s2 + $0x4f0] sm:$0xff]  ;;  %v2856_v0 = vld [vmem:[%s6584_s2 + $0x4f8] sm:$0xff] }
 0x2d2   : > { %v1294_v37 = vmul.f32 %v2843_v42, %v1274_v55  ;;  %v1295_v29 = vmul.f32 %v2844_v39, %v1268_v44  ;;  %v1384_v46 = vadd.f32 %v1372_v51, %v5309_v25  ;;  %v1385_v19 = vadd.f32 %v1373_v30, %v5312_v57  ;;  %v2899_v44 = vld [vmem:[%s6584_s2 + $0x650] sm:$0xff]  ;;  %v2900_v55 = vld [vmem:[%s6584_s2 + $0x658] sm:$0xff] }
 0x2d3   : > { %v1444_v23 = vmul.f32 %v2869_v33, %v1417_v52  ;;  %v1445_v53 = vmul.f32 %v2870_v59, %v1423_v36  ;;  %1846 = vrot.lane.b32.xlu0 %v3181_v7, %s3102_s20  ;;  %vm1784_vm2 = vcmp.lt.s32.totalorder %v3845_v61, 110  ;;  %v1534_v62 = vadd.f32 %v1522_v63, %v5315_v21  ;;  %v7039_v63 = vld [vmem:[#allocation11_spill] sm:$0xff]  ;;  %v2853_v52 = vld [vmem:[%s6584_s2 + $0x4e0] sm:$0xff] }
 0x2d4   : > { %v1535_v50 = vadd.f32 %v1523_v3, %v5318_v24  ;;  %v1446_v27 = vmul.f32 %v2871_v47, %v1418_v43  ;;  %v1447_v34 = vmul.f32 %v2872_v48, %v1424_v5  ;;  %1836 = vrot.lane.b32.xlu1 %v3183_v8, %s3102_s20  ;;  %v1536_v25 = vadd.f32 %v1524_v32, %v5323_v31  ;;  %v5487_v42 = vpop.permute.xlu0 %1628  ;;  %v2897_v31 = vld [vmem:[%s6584_s2 + $0x640] sm:$0xff]  ;;  %v7040_v32 = vld [vmem:[#allocation13_spill] sm:$0xff]  ;;  %v2854_v36 = vld [vmem:[%s6584_s2 + $0x4e8] sm:$0xff] }
 0x2d5   : > { %v1537_v57 = vadd.f32 %v1525_v2, %v5326_v38  ;;  %v5482_v51 = vadd.f32 %v1292_v22, %v5344_v26  ;;  %v5485_v30 = vadd.f32 %v1293_v41, %v5346_v20  ;;  %v5490_v21 = vadd.f32 %v1294_v37, %v5365_v4  ;;  %v2898_v38 = vld [vmem:[%s6584_s2 + $0x648] sm:$0xff]  ;;  %v7038_v26 = vld [vmem:[#allocation12_spill] sm:$0xff]  ;;  %v7041_v2 = vld [vmem:[#allocation109_spill] sm:$0xff] }
 0x2d6   : > { %v5493_v24 = vadd.f32 %v1295_v29, %v5367_v45  ;;  %v1567_v20 = vsel %vm1562_vm0, %v7039_v63, %v7038_v26  ;;  %v1573_v4 = vsel %vm1562_vm0, %v7038_v26, %v7039_v63  ;;  %v1619_v45 = vpop.permute.xlu1 %1618  ;;  %v5509_v3 = vadd.f32 %v1444_v23, %v1382_v18  ;;  %v7042_v22 = vld [vmem:[#allocation33_spill] sm:$0xff]  ;;  %v7043_v41 = vld [vmem:[#allocation32_spill] sm:$0xff]  ;;  %v7044_v43 = vld [vmem:[#allocation15_spill] sm:$0xff] }
 0x2d7   : > { %v5511_v39 = vadd.f32 %v1445_v53, %v1383_v60  ;;  %v1568_v33 = vsel %vm1562_vm0, %v7041_v2, %v7040_v32  ;;  %v1574_v23 = vsel %vm1562_vm0, %v7040_v32, %v7041_v2  ;;  %1986 = vrot.lane.b32.xlu0 %v3191_v10, %s3104_s26  ;;  %v5529_v53 = vadd.f32 %v1446_v27, %v1384_v46  ;;  %v7045_v5 = vld [vmem:[#allocation14_spill] sm:$0xff] }
 0x2d8   : > { %v5531_v59 = vadd.f32 %v1447_v34, %v1385_v19  ;;  %v1341_v47 = vsel %vm1340_vm13, %v7043_v41, %v7042_v22  ;;  %v1347_v46 = vsel %vm1340_vm13, %v7042_v22, %v7043_v41  ;;  %1848 = vrot.lane.b32.xlu1 %v3189_v9, %s3102_s20  ;;  %v1596_v19 = vmul.f32 %v2897_v31, %v1567_v20  ;;  %v1769_v37 = vpop.permute.xlu0 %1768  ;;  %v2881_v34 = vld [vmem:[%s6584_s2 + $0x5c0] sm:$0xff]  ;;  %v2882_v31 = vld [vmem:[%s6584_s2 + $0x5c8] sm:$0xff]  ;;  %v2883_v22 = vld [vmem:[%s6584_s2 + $0x5d0] sm:$0xff] }
 0x2d9   : > { %v1597_v48 = vmul.f32 %v2898_v38, %v1573_v4  ;;  %v1342_v18 = vsel %vm1340_vm13, %v7045_v5, %v7044_v43  ;;  %v1348_v60 = vsel %vm1340_vm13, %v7044_v43, %v7045_v5  ;;  %v1598_v29 = vmul.f32 %v2899_v44, %v1568_v33  ;;  %v7046_v38 = vld [vmem:[#allocation35_spill] sm:$0xff]  ;;  %v7047_v26 = vld [vmem:[#allocation34_spill] sm:$0xff]  ;;  %v7049_v41 = vld [vmem:[#allocation16_spill] sm:$0xff] }
 0x2da   : > { %v1599_v27 = vmul.f32 %v2900_v55, %v1574_v23  ;;  %v1491_v63 = vsel %vm1488_vm15, %v7047_v26, %v7046_v38  ;;  %v1497_v20 = vsel %vm1488_vm15, %v7046_v38, %v7047_v26  ;;  %v1631_v4 = vpop.permute.xlu1 %1630  ;;  %v1366_v44 = vmul.f32 %v2853_v52, %v1341_v47  ;;  %v2884_v52 = vld [vmem:[%s6584_s2 + $0x5d8] sm:$0xff] }
 0x2db   : > { %v1367_v55 = vmul.f32 %v2854_v36, %v1347_v46  ;;  %v5579_v32 = vsel %vm1636_vm1, %v1619_v45, %v1631_v4  ;;  %v5583_v2 = vsel %vm1636_vm1, %v1631_v4, %v1619_v45  ;;  %1998 = vrot.lane.b32.xlu0 %v3197_v11, %s3104_s26  ;;  %v1368_v33 = vmul.f32 %v2855_v40, %v1342_v18  ;;  %v7048_v36 = vld [vmem:[#allocation17_spill] sm:$0xff] }
 0x2dc   : > { %v1369_v23 = vmul.f32 %v2856_v0, %v1348_v60  ;;  %v1492_v47 = vsel %vm1488_vm15, %v7049_v41, %v7048_v36  ;;  %v1498_v45 = vsel %vm1488_vm15, %v7048_v36, %v7049_v41  ;;  %1988 = vrot.lane.b32.xlu1 %v3199_v12, %s3104_s26  ;;  %v1608_v46 = vadd.f32 %v1596_v19, %v1534_v62  ;;  %v1781_v5 = vpop.permute.xlu0 %1780  ;;  %v2909_v62 = vld [vmem:[%s6584_s2 + $0x6a0] sm:$0xff] }
 0x2dd   : > { %v1609_v40 = vadd.f32 %v1597_v48, %v1535_v50  ;;  %v1518_v0 = vmul.f32 %v2881_v34, %v1491_v63  ;;  %v1519_v43 = vmul.f32 %v2882_v31, %v1497_v20  ;;  %v5603_v18 = vadd.f32 %v1598_v29, %v1536_v25  ;;  %v2910_v50 = vld [vmem:[%s6584_s2 + $0x6a8] sm:$0xff]  ;;  %v7050_v25 = vld [vmem:[#allocation37_spill] sm:$0xff]  ;;  %v2867_v20 = vld [vmem:[%s6584_s2 + $0x550] sm:$0xff] }
 0x2de   : > { %v5605_v60 = vadd.f32 %v1599_v27, %v1537_v57  ;;  %v5609_v38 = vsel %vm1784_vm2, %v1769_v37, %v1781_v5  ;;  %v5613_v26 = vsel %vm1784_vm2, %v1781_v5, %v1769_v37  ;;  %v1771_v4 = vpop.permute.xlu1 %1770  ;;  %v1520_v36 = vmul.f32 %v2883_v22, %v1492_v47  ;;  %v7051_v57 = vld [vmem:[#allocation36_spill] sm:$0xff]  ;;  %v7055_v5 = vld [vmem:[#allocation18_spill] sm:$0xff] }
 0x2df   : > { %v1521_v41 = vmul.f32 %v2884_v52, %v1498_v45  ;;  %v1641_v19 = vsel %vm1636_vm1, %v7051_v57, %v7050_v25  ;;  %v1647_v48 = vsel %vm1636_vm1, %v7050_v25, %v7051_v57  ;;  %vm1710_vm3 = vcmp.lt.s32.totalorder %v3845_v61, 111  ;;  %2138 = vrot.lane.b32.xlu0 %v3207_v14, %s3106_s8  ;;  %v2879_v25 = vld [vmem:[%s6584_s2 + $0x5b0] sm:$0xff]  ;;  %v2880_v57 = vld [vmem:[%s6584_s2 + $0x5b8] sm:$0xff] }
 0x2e0   : > { %v5633_v37 = vadd.f32 %v1366_v44, %v5482_v51  ;;  %v5636_v29 = vadd.f32 %v1367_v55, %v5485_v30  ;;  %v1380_v27 = vadd.f32 %v1368_v33, %v5490_v21  ;;  %v1381_v34 = vadd.f32 %v1369_v23, %v5493_v24  ;;  %2000 = vrot.lane.b32.xlu1 %v3205_v13, %s3104_s26  ;;  %v2868_v51 = vld [vmem:[%s6584_s2 + $0x558] sm:$0xff]  ;;  %v7052_v30 = vld [vmem:[#allocation20_spill] sm:$0xff]  ;;  %v2893_v55 = vld [vmem:[%s6584_s2 + $0x620] sm:$0xff] }
 0x2e1   : > { %v1530_v31 = vadd.f32 %v1518_v0, %v5509_v3  ;;  %v1531_v63 = vadd.f32 %v1519_v43, %v5511_v39  ;;  %v1416_v21 = vsel %vm1414_vm14, %v7052_v30, %v5121_v1  ;;  %v1422_v24 = vsel %vm1414_vm14, %v5121_v1, %v7052_v30  ;;  %v1539_v3 = vpop.permute.xlu0 %1538  ;;  %v2894_v33 = vld [vmem:[%s6584_s2 + $0x628] sm:$0xff]  ;;  %v7053_v23 = vld [vmem:[#allocation40_spill] sm:$0xff] }
 0x2e2   : > { %v1670_v39 = vmul.f32 %v2909_v62, %v1641_v19  ;;  %v1671_v44 = vmul.f32 %v2910_v50, %v1647_v48  ;;  %v1565_v22 = vsel %vm1562_vm0, %v7053_v23, %v5145_v58  ;;  %v1571_v1 = vsel %vm1562_vm0, %v5145_v58, %v7053_v23  ;;  %v1783_v52 = vpop.permute.xlu1 %1782  ;;  %v2911_v58 = vld [vmem:[%s6584_s2 + $0x6b0] sm:$0xff] }
 0x2e3   : > { %v5673_v47 = vadd.f32 %v1520_v36, %v5529_v53  ;;  %v5676_v45 = vadd.f32 %v1521_v41, %v5531_v59  ;;  %v5680_v0 = vsel %vm1784_vm2, %v1771_v4, %v1783_v52  ;;  %v5684_v43 = vsel %vm1784_vm2, %v1783_v52, %v1771_v4  ;;  %2150 = vrot.lane.b32.xlu0 %v3213_v15, %s3106_s8  ;;  %v2912_v53 = vld [vmem:[%s6584_s2 + $0x6b8] sm:$0xff]  ;;  %v7054_v59 = vld [vmem:[#allocation19_spill] sm:$0xff] }
 0x2e4   : > { %v1642_v36 = vsel %vm1636_vm1, %v7055_v5, %v7054_v59  ;;  %v1648_v4 = vsel %vm1636_vm1, %v7054_v59, %v7055_v5  ;;  %v1442_v41 = vmul.f32 %v2867_v20, %v1416_v21  ;;  %v1443_v15 = vmul.f32 %v2868_v51, %v1422_v24  ;;  %2140 = vrot.lane.b32.xlu1 %v3215_v16, %s3106_s8 }
 0x2e5   : > { %v1592_v62 = vmul.f32 %v2893_v55, %v1565_v22  ;;  %v1593_v50 = vmul.f32 %v2894_v33, %v1571_v1  ;;  %v1490_v19 = vsel %vm1488_vm15, %v5415_v17, %v5468_v56  ;;  %v1496_v48 = vsel %vm1488_vm15, %v5468_v56, %v5415_v17  ;;  %v1551_v20 = vpop.permute.xlu0 %1550  ;;  %v7056_v22 = vld [vmem:[#allocation39_spill] sm:$0xff]  ;;  %v7057_v17 = vld [vmem:[#allocation38_spill] sm:$0xff] }
 0x2e6   : > { %v5718_v51 = vadd.f32 %v1670_v39, %v1608_v46  ;;  %v5720_v30 = vadd.f32 %v1671_v44, %v1609_v40  ;;  %v5724_v21 = vsel %vm1562_vm0, %v1539_v3, %v1551_v20  ;;  %v5728_v24 = vsel %vm1562_vm0, %v1551_v20, %v1539_v3  ;;  %v1541_v55 = vpop.permute.xlu1 %1540  ;;  %v2905_v39 = vld [vmem:[%s6584_s2 + $0x680] sm:$0xff]  ;;  %v2906_v44 = vld [vmem:[%s6584_s2 + $0x688] sm:$0xff] }
 0x2e7   : > { %v5730_v33 = vmul.f32 %v2911_v58, %v1642_v36  ;;  %v5732_v23 = vmul.f32 %v2912_v53, %v1648_v4  ;;  %v1415_v56 = vsel %vm1414_vm14, %v7057_v17, %v7056_v22  ;;  %v1421_v46 = vsel %vm1414_vm14, %v7056_v22, %v7057_v17  ;;  %1908 = vrot.lane.b32.xlu0 %v3177_v6, %s3103_s11  ;;  %v2895_v36 = vld [vmem:[%s6584_s2 + $0x630] sm:$0xff]  ;;  %v2865_v20 = vld [vmem:[%s6584_s2 + $0x540] sm:$0xff] }
 0x2e8   : > { %v1516_v40 = vmul.f32 %v2879_v25, %v1490_v19  ;;  %v1517_v3 = vmul.f32 %v2880_v57, %v1496_v48  ;;  %v1639_v1 = vsel %vm1636_vm1, %v5463_v28, %v5487_v42  ;;  %v1645_v52 = vsel %vm1636_vm1, %v5487_v42, %v5463_v28  ;;  %2152 = vrot.lane.b32.xlu1 %v7035_v54, %s3106_s8  ;;  %v2891_v25 = vld [vmem:[%s6584_s2 + $0x610] sm:$0xff]  ;;  %v2892_v28 = vld [vmem:[%s6584_s2 + $0x618] sm:$0xff] }
 0x2e9   : > { %v1454_v58 = vadd.f32 %v1442_v41, %v1380_v27  ;;  %v1455_v53 = vadd.f32 %v1443_v15, %v1381_v34  ;;  %v1604_v59 = vadd.f32 %v1592_v62, %v1530_v31  ;;  %v1605_v5 = vadd.f32 %v1593_v50, %v1531_v63  ;;  %v1691_v4 = vpop.permute.xlu0 %1690  ;;  %v2896_v54 = vld [vmem:[%s6584_s2 + $0x638] sm:$0xff]  ;;  %v2921_v31 = vld [vmem:[%s6584_s2 + $0x700] sm:$0xff]  ;;  %v2922_v63 = vld [vmem:[%s6584_s2 + $0x708] sm:$0xff] }
 0x2ea   : > { %v7058_v42 = vld [vmem:[#allocation21_spill] sm:$0xff]  ;;  %v1553_v50 = vpop.permute.xlu1 %1552  ;;  %v1667_v57 = vmul.f32 %v2906_v44, %v1645_v52  ;;  %vm1858_vm4 = vcmp.lt.s32.totalorder %v3845_v61, 98  ;;  %v2918_v44 = vld [vmem:[%s6584_s2 + $0x6e8] sm:$0xff]  ;;  %vm1932_vm5 = vcmp.lt.s32.totalorder %v3845_v61, 97  ;;  %vm2006_vm6 = vcmp.lt.s32.totalorder %v3845_v61, 96 }
 0x2eb   : > { %v1566_v27 = vsel %vm1562_vm0, %v7058_v42, %v5242_v35  ;;  %v1572_v34 = vsel %vm1562_vm0, %v5242_v35, %v7058_v42  ;;  %v7059_v41 = vld [vmem:[#allocation69_spill] sm:$0xff]  ;;  %v1666_v35 = vmul.f32 %v2905_v39, %v1639_v1  ;;  %v1564_v19 = vsel %vm1562_vm0, %v1541_v55, %v1553_v50  ;;  %1920 = vrot.lane.b32.xlu0 %v3181_v7, %s3103_s11  ;;  %v2866_v1 = vld [vmem:[%s6584_s2 + $0x548] sm:$0xff] }
 0x2ec   : > { %v1715_v15 = vsel %vm1710_vm3, %v7059_v41, %v5290_v49  ;;  %v1721_v62 = vsel %vm1710_vm3, %v5290_v49, %v7059_v41  ;;  %v1570_v48 = vsel %vm1562_vm0, %v1553_v50, %v1541_v55  ;;  %v1528_v22 = vadd.f32 %v1516_v40, %v1454_v58  ;;  %1910 = vrot.lane.b32.xlu1 %v3183_v8, %s3103_s11  ;;  %v2917_v55 = vld [vmem:[%s6584_s2 + $0x6e0] sm:$0xff] }
 0x2ed   : > { %v1529_v49 = vadd.f32 %v1517_v3, %v1455_v53  ;;  %v1590_v17 = vmul.f32 %v2891_v25, %v1564_v19  ;;  %v1591_v39 = vmul.f32 %v2892_v28, %v1570_v48  ;;  %v1594_v52 = vmul.f32 %v2895_v36, %v1566_v27  ;;  %v2907_v53 = vld [vmem:[%s6584_s2 + $0x690] sm:$0xff]  ;;  %v2908_v25 = vld [vmem:[%s6584_s2 + $0x698] sm:$0xff]  ;;  %v1703_v28 = vpop.permute.xlu0 %1702 }
 0x2ee   : > { %v1595_v40 = vmul.f32 %v2896_v54, %v1572_v34  ;;  %v1744_v3 = vmul.f32 %v2921_v31, %v1715_v15  ;;  %v1745_v58 = vmul.f32 %v2922_v63, %v1721_v62  ;;  %v1713_v50 = vsel %vm1710_vm3, %v1691_v4, %v1703_v28  ;;  %v1693_v54 = vpop.permute.xlu1 %1692 }
 0x2ef   : > { %v5821_v42 = vadd.f32 %v1590_v17, %v1528_v22  ;;  %v5823_v41 = vadd.f32 %v1591_v39, %v1529_v49  ;;  %v1719_v36 = vsel %vm1710_vm3, %v1703_v28, %v1691_v4  ;;  %v1678_v27 = vadd.f32 %v1666_v35, %v1604_v59  ;;  %2060 = vrot.lane.b32.xlu0 %v3191_v10, %s3105_s30  ;;  %v2933_v4 = vld [vmem:[%s6584_s2 + $0x760] sm:$0xff]  ;;  %v2934_v59 = vld [vmem:[%s6584_s2 + $0x768] sm:$0xff]  ;;  %v2919_v35 = vld [vmem:[%s6584_s2 + $0x6f0] sm:$0xff] }
 0x2f0   : > { %v1679_v34 = vadd.f32 %v1667_v57, %v1605_v5  ;;  %v1740_v31 = vmul.f32 %v2917_v55, %v1713_v50  ;;  %v1741_v63 = vmul.f32 %v2918_v44, %v1719_v36  ;;  %v5831_v15 = vmul.f32 %v2865_v20, %v1415_v56  ;;  %1922 = vrot.lane.b32.xlu1 %v3189_v9, %s3103_s11  ;;  %v2920_v57 = vld [vmem:[%s6584_s2 + $0x6f8] sm:$0xff]  ;;  %v7060_v49 = vld [vmem:[#allocation22_spill] sm:$0xff]  ;;  %v7061_v17 = vld [vmem:[#allocation84_spill] sm:$0xff] }
 0x2f1   : > { %v5833_v62 = vmul.f32 %v2866_v1, %v1421_v46  ;;  %v1668_v19 = vmul.f32 %v2907_v53, %v5579_v32  ;;  %v1669_v48 = vmul.f32 %v2908_v25, %v5583_v2  ;;  %v1606_v56 = vadd.f32 %v1594_v52, %v5673_v47  ;;  %v1843_v2 = vpop.permute.xlu0 %1842  ;;  %v2923_v47 = vld [vmem:[%s6584_s2 + $0x710] sm:$0xff]  ;;  %v7062_v50 = vld [vmem:[#allocation45_spill] sm:$0xff] }
 0x2f2   : > { %v1607_v46 = vadd.f32 %v1595_v40, %v5676_v45  ;;  %v5847_v5 = vadd.f32 %v1740_v31, %v1678_v27  ;;  %v5849_v32 = vadd.f32 %v1741_v63, %v1679_v34  ;;  %v1756_v20 = vadd.f32 %v1744_v3, %v5718_v51  ;;  %v2924_v45 = vld [vmem:[%s6584_s2 + $0x718] sm:$0xff]  ;;  %v1705_v55 = vpop.permute.xlu1 %1704  ;;  %v2935_v34 = vld [vmem:[%s6584_s2 + $0x770] sm:$0xff] }
 0x2f3   : > { %v1757_v22 = vadd.f32 %v1745_v58, %v5720_v30  ;;  %v1716_v39 = vsel %vm1710_vm3, %v7061_v17, %v7060_v49  ;;  %v1722_v51 = vsel %vm1710_vm3, %v7060_v49, %v7061_v17  ;;  %v1818_v30 = vmul.f32 %v2933_v4, %v5609_v38  ;;  %2072 = vrot.lane.b32.xlu0 %v3197_v11, %s3105_s30  ;;  %v2945_v38 = vld [vmem:[%s6584_s2 + $0x7c0] sm:$0xff]  ;;  %v7063_v36 = vld [vmem:[#allocation41_spill] sm:$0xff] }
 0x2f4   : > { %v1819_v44 = vmul.f32 %v2934_v59, %v5613_v26  ;;  %v1714_v1 = vsel %vm1710_vm3, %v1693_v54, %v1705_v55  ;;  %v1720_v52 = vsel %vm1710_vm3, %v1705_v55, %v1693_v54  ;;  %v1680_v40 = vadd.f32 %v1668_v19, %v1606_v56  ;;  %2062 = vrot.lane.b32.xlu1 %v3199_v12, %s3105_s30  ;;  %v2946_v26 = vld [vmem:[%s6584_s2 + $0x7c8] sm:$0xff]  ;;  %v2936_v31 = vld [vmem:[%s6584_s2 + $0x778] sm:$0xff]  ;;  %v2877_v19 = vld [vmem:[%s6584_s2 + $0x5a0] sm:$0xff] }
 0x2f5   : > { %v1681_v3 = vadd.f32 %v1669_v48, %v1607_v46  ;;  %v1742_v58 = vmul.f32 %v2919_v35, %v1714_v1  ;;  %v1743_v53 = vmul.f32 %v2920_v57, %v1720_v52  ;;  %v1746_v25 = vmul.f32 %v2923_v47, %v1716_v39  ;;  %v1855_v63 = vpop.permute.xlu0 %1854  ;;  %v2878_v48 = vld [vmem:[%s6584_s2 + $0x5a8] sm:$0xff] }
 0x2f6   : > { %v1747_v28 = vmul.f32 %v2924_v45, %v1722_v51  ;;  %v1489_v54 = vsel %vm1488_vm15, %v7063_v36, %v7062_v50  ;;  %v1495_v27 = vsel %vm1488_vm15, %v7062_v50, %v7063_v36  ;;  %v1863_v56 = vsel %vm1858_vm4, %v1843_v2, %v1855_v63  ;;  %v1845_v35 = vpop.permute.xlu1 %1844 }
 0x2f7   : > { %v5909_v4 = vadd.f32 %v1742_v58, %v1680_v40  ;;  %v5911_v59 = vadd.f32 %v1743_v53, %v1681_v3  ;;  %v1869_v46 = vsel %vm1858_vm4, %v1855_v63, %v1843_v2  ;;  %v1830_v57 = vadd.f32 %v1818_v30, %v1756_v20  ;;  %1982 = vrot.lane.b32.xlu0 %v3177_v6, %s3104_s26  ;;  %v2889_v2 = vld [vmem:[%s6584_s2 + $0x600] sm:$0xff]  ;;  %v2890_v20 = vld [vmem:[%s6584_s2 + $0x608] sm:$0xff] }
 0x2f8   : > { %v1831_v47 = vadd.f32 %v1819_v44, %v1757_v22  ;;  %v1892_v45 = vmul.f32 %v2945_v38, %v1863_v56  ;;  %v1893_v49 = vmul.f32 %v2946_v26, %v1869_v46  ;;  %v1684_v17 = vadd.f32 %v5730_v33, %v5603_v18  ;;  %2074 = vrot.lane.b32.xlu1 %v3205_v13, %s3105_s30 }
 0x2f9   : > { %v1685_v39 = vadd.f32 %v5732_v23, %v5605_v60  ;;  %v1820_v51 = vmul.f32 %v2935_v34, %v5680_v0  ;;  %v1821_v55 = vmul.f32 %v2936_v31, %v5684_v43  ;;  %v1514_v22 = vmul.f32 %v2877_v19, %v1489_v54  ;;  %v1613_v0 = vpop.permute.xlu0 %1612  ;;  %v2947_v43 = vld [vmem:[%s6584_s2 + $0x7d0] sm:$0xff]  ;;  %v2948_v23 = vld [vmem:[%s6584_s2 + $0x7d8] sm:$0xff] }
 0x2fa   : > { %v1515_v18 = vmul.f32 %v2878_v48, %v1495_v27  ;;  %v5933_v33 = vadd.f32 %v1892_v45, %v1830_v57  ;;  %v5935_v60 = vadd.f32 %v1893_v49, %v1831_v47  ;;  %v1452_v30 = vadd.f32 %v5831_v15, %v5633_v37  ;;  %v1857_v40 = vpop.permute.xlu1 %1856  ;;  %v2903_v57 = vld [vmem:[%s6584_s2 + $0x670] sm:$0xff]  ;;  %v2904_v47 = vld [vmem:[%s6584_s2 + $0x678] sm:$0xff] }
 0x2fb   : > { %v1453_v44 = vadd.f32 %v5833_v62, %v5636_v29  ;;  %v1758_v1 = vadd.f32 %v1746_v25, %v1684_v17  ;;  %v1759_v52 = vadd.f32 %v1747_v28, %v1685_v39  ;;  %v1588_v3 = vmul.f32 %v2889_v2, %v5724_v21  ;;  %1994 = vrot.lane.b32.xlu0 %v3181_v7, %s3104_s26  ;;  %v2901_v21 = vld [vmem:[%s6584_s2 + $0x660] sm:$0xff]  ;;  %v2930_v2 = vld [vmem:[%s6584_s2 + $0x748] sm:$0xff] }
 0x2fc   : > { %v1589_v58 = vmul.f32 %v2890_v20, %v5728_v24  ;;  %v1864_v53 = vsel %vm1858_vm4, %v1845_v35, %v1857_v40  ;;  %v1870_v38 = vsel %vm1858_vm4, %v1857_v40, %v1845_v35  ;;  %1984 = vrot.lane.b32.xlu1 %v3183_v8, %s3104_s26  ;;  %v2902_v24 = vld [vmem:[%s6584_s2 + $0x668] sm:$0xff]  ;;  %v1526_v62 = vadd.f32 %v1514_v22, %v1452_v30  ;;  %v2932_v40 = vld [vmem:[%s6584_s2 + $0x758] sm:$0xff] }
 0x2fd   : > { %v1832_v37 = vadd.f32 %v1820_v51, %v1758_v1  ;;  %v1833_v15 = vadd.f32 %v1821_v55, %v1759_v52  ;;  %v1894_v26 = vmul.f32 %v2947_v43, %v1864_v53  ;;  %v1895_v29 = vmul.f32 %v2948_v23, %v1870_v38  ;;  %v1625_v28 = vpop.permute.xlu0 %1624  ;;  %v2929_v55 = vld [vmem:[%s6584_s2 + $0x740] sm:$0xff]  ;;  %v2931_v52 = vld [vmem:[%s6584_s2 + $0x750] sm:$0xff] }
 0x2fe   : > { %v1527_v25 = vadd.f32 %v1515_v18, %v1453_v44  ;;  %v1637_v54 = vsel %vm1636_vm1, %v1613_v0, %v1625_v28  ;;  %v1643_v27 = vsel %vm1636_vm1, %v1625_v28, %v1613_v0  ;;  %v1615_v34 = vpop.permute.xlu1 %1614  ;;  %v1600_v31 = vadd.f32 %v1588_v3, %v1526_v62  ;;  %v2957_v38 = vld [vmem:[%s6584_s2 + $0x820] sm:$0xff] }
 0x2ff   : > { %v5963_v50 = vadd.f32 %v1894_v26, %v1832_v37  ;;  %v5965_v36 = vadd.f32 %v1895_v29, %v1833_v15  ;;  %v1662_v19 = vmul.f32 %v2901_v21, %v1637_v54  ;;  %v1663_v48 = vmul.f32 %v2902_v24, %v1643_v27  ;;  %2134 = vrot.lane.b32.xlu0 %v3191_v10, %s3106_s8  ;;  %v2958_v37 = vld [vmem:[%s6584_s2 + $0x828] sm:$0xff]  ;;  %v2959_v27 = vld [vmem:[%s6584_s2 + $0x830] sm:$0xff] }
 0x300   : > { %v1601_v63 = vadd.f32 %v1589_v58, %v1527_v25  ;;  %1996 = vrot.lane.b32.xlu1 %v3189_v9, %s3104_s26  ;;  %vm2080_vm7 = vcmp.lt.s32.totalorder %v3845_v61, 95  ;;  %vm2154_vm8 = vcmp.lt.s32.totalorder %v3845_v61, 94  ;;  %vm2225_vm9 = vcmask 392192  }
 0x301   : > { %v5975_v56 = vadd.f32 %v1662_v19, %v1600_v31  ;;  %v1765_v35 = vpop.permute.xlu0 %1764  ;;  %v7064_v61 = vmov 0   ;;  %vm2381_vm10 = vcmask 261120  }
 0x302   : > { %v5977_v46 = vadd.f32 %v1663_v48, %v1601_v63  ;;  %v1627_v45 = vpop.permute.xlu1 %1626  ;;  %v2913_v48 = vld [vmem:[%s6584_s2 + $0x6c0] sm:$0xff] }
 0x303   : > { %v1638_v49 = vsel %vm1636_vm1, %v1615_v34, %v1627_v45  ;;  %v1644_v17 = vsel %vm1636_vm1, %v1627_v45, %v1615_v34  ;;  %2146 = vrot.lane.b32.xlu0 %v3197_v11, %s3106_s8  ;;  %v2960_v34 = vld [vmem:[%s6584_s2 + $0x838] sm:$0xff] }
 0x304   : > { %v1664_v39 = vmul.f32 %v2903_v57, %v1638_v49  ;;  %v1665_v51 = vmul.f32 %v2904_v47, %v1644_v17  ;;  %2136 = vrot.lane.b32.xlu1 %v3199_v12, %s3106_s8 }
 0x305   : > { %v1777_v20 = vpop.permute.xlu0 %1776 }
 0x306   : > { %v6000_v22 = vadd.f32 %v1664_v39, %v5821_v42  ;;  %v6003_v18 = vadd.f32 %v1665_v51, %v5823_v41  ;;  %v1787_v0 = vsel %vm1784_vm2, %v1765_v35, %v1777_v20  ;;  %v1793_v43 = vsel %vm1784_vm2, %v1777_v20, %v1765_v35  ;;  %v1767_v23 = vpop.permute.xlu1 %1766  ;;  %v2914_v35 = vld [vmem:[%s6584_s2 + $0x6c8] sm:$0xff] }
 0x307   : > { %v1814_v30 = vmul.f32 %v2929_v55, %v1787_v0  ;;  %v1815_v44 = vmul.f32 %v2930_v2, %v1793_v43  ;;  %2056 = vrot.lane.b32.xlu0 %v3177_v6, %s3105_s30  ;;  %v2916_v0 = vld [vmem:[%s6584_s2 + $0x6d8] sm:$0xff] }
 0x308   : > { %2148 = vrot.lane.b32.xlu1 %v3205_v13, %s3106_s8 }
 0x309   : > { %v6014_v42 = vadd.f32 %v1814_v30, %v5847_v5  ;;  %v6017_v41 = vadd.f32 %v1815_v44, %v5849_v32  ;;  %v1917_v1 = vpop.permute.xlu0 %1916 }
 0x30a   : > { %v1779_v3 = vpop.permute.xlu1 %1778 }
 0x30b   : > { %v1788_v58 = vsel %vm1784_vm2, %v1767_v23, %v1779_v3  ;;  %v1794_v5 = vsel %vm1784_vm2, %v1779_v3, %v1767_v23  ;;  %2068 = vrot.lane.b32.xlu0 %v3181_v7, %s3105_s30 }
 0x30c   : > { %v1816_v32 = vmul.f32 %v2931_v52, %v1788_v58  ;;  %v1817_v53 = vmul.f32 %v2932_v40, %v1794_v5  ;;  %2058 = vrot.lane.b32.xlu1 %v3183_v8, %s3105_s30 }
 0x30d   : > { %v1929_v15 = vpop.permute.xlu0 %1928 }
 0x30e   : > { %v6041_v26 = vadd.f32 %v1816_v32, %v5909_v4  ;;  %v6044_v29 = vadd.f32 %v1817_v53, %v5911_v59  ;;  %v1937_v21 = vsel %vm1932_vm5, %v1917_v1, %v1929_v15  ;;  %v1943_v24 = vsel %vm1932_vm5, %v1929_v15, %v1917_v1  ;;  %v1919_v62 = vpop.permute.xlu1 %1918  ;;  %v2942_v1 = vld [vmem:[%s6584_s2 + $0x7a8] sm:$0xff] }
 0x30f   : > { %v1966_v25 = vmul.f32 %v2957_v38, %v1937_v21  ;;  %v1967_v28 = vmul.f32 %v2958_v37, %v1943_v24  ;;  %2130 = vrot.lane.b32.xlu0 %v3177_v6, %s3106_s8 }
 0x310   : > { %2070 = vrot.lane.b32.xlu1 %v3189_v9, %s3105_s30 }
 0x311   : > { %v6055_v4 = vadd.f32 %v1966_v25, %v5933_v33  ;;  %v6058_v59 = vadd.f32 %v1967_v28, %v5935_v60  ;;  %v1687_v54 = vpop.permute.xlu0 %1686 }
 0x312   : > { %v1931_v31 = vpop.permute.xlu1 %1930 }
 0x313   : > { %v1938_v63 = vsel %vm1932_vm5, %v1919_v62, %v1931_v31  ;;  %v1944_v33 = vsel %vm1932_vm5, %v1931_v31, %v1919_v62  ;;  %2142 = vrot.lane.b32.xlu0 %v3181_v7, %s3106_s8 }
 0x314   : > { %v1968_v60 = vmul.f32 %v2959_v27, %v1938_v63  ;;  %v1969_v19 = vmul.f32 %v2960_v34, %v1944_v33  ;;  %2132 = vrot.lane.b32.xlu1 %v3183_v8, %s3106_s8  ;;  %v2925_v33 = vld [vmem:[%s6584_s2 + $0x720] sm:$0xff] }
 0x315   : > { %v1699_v57 = vpop.permute.xlu0 %1698 }
 0x316   : > { %v6081_v47 = vadd.f32 %v1968_v60, %v5963_v50  ;;  %v6084_v45 = vadd.f32 %v1969_v19, %v5965_v36  ;;  %v1711_v49 = vsel %vm1710_vm3, %v1687_v54, %v1699_v57  ;;  %v1717_v17 = vsel %vm1710_vm3, %v1699_v57, %v1687_v54  ;;  %v1689_v39 = vpop.permute.xlu1 %1688  ;;  %v2915_v36 = vld [vmem:[%s6584_s2 + $0x6d0] sm:$0xff]  ;;  %v2926_v60 = vld [vmem:[%s6584_s2 + $0x728] sm:$0xff] }
 0x317   : > { %v1736_v51 = vmul.f32 %v2913_v48, %v1711_v49  ;;  %v1737_v55 = vmul.f32 %v2914_v35, %v1717_v17 }
 0x318   : > { %2144 = vrot.lane.b32.xlu1 %v3189_v9, %s3106_s8 }
 0x319   : > { %v1748_v2 = vadd.f32 %v1736_v51, %v5975_v56  ;;  %v1749_v50 = vadd.f32 %v1737_v55, %v5977_v46  ;;  %v1839_v20 = vpop.permute.xlu0 %1838  ;;  %v2941_v46 = vld [vmem:[%s6584_s2 + $0x7a0] sm:$0xff]  ;;  %v2927_v51 = vld [vmem:[%s6584_s2 + $0x730] sm:$0xff]  ;;  %v2928_v55 = vld [vmem:[%s6584_s2 + $0x738] sm:$0xff] }
 0x31a   : > { %v1701_v43 = vpop.permute.xlu1 %1700 }
 0x31b   : > { %v1712_v23 = vsel %vm1710_vm3, %v1689_v39, %v1701_v43  ;;  %v1718_v30 = vsel %vm1710_vm3, %v1701_v43, %v1689_v39 }
 0x31c   : > { %v1738_v44 = vmul.f32 %v2915_v36, %v1712_v23  ;;  %v1739_v56 = vmul.f32 %v2916_v0, %v1718_v30 }
 0x31d   : > { %v1851_v52 = vpop.permute.xlu0 %1850 }
 0x31e   : > { %v1750_v40 = vadd.f32 %v1738_v44, %v6000_v22  ;;  %v1751_v3 = vadd.f32 %v1739_v56, %v6003_v18  ;;  %v1861_v58 = vsel %vm1858_vm4, %v1839_v20, %v1851_v52  ;;  %v1867_v5 = vsel %vm1858_vm4, %v1851_v52, %v1839_v20  ;;  %v1841_v32 = vpop.permute.xlu1 %1840  ;;  %v2943_v22 = vld [vmem:[%s6584_s2 + $0x7b0] sm:$0xff]  ;;  %v2944_v18 = vld [vmem:[%s6584_s2 + $0x7b8] sm:$0xff] }
 0x31f   : > { %v1888_v53 = vmul.f32 %v2941_v46, %v1861_v58  ;;  %v1889_v38 = vmul.f32 %v2942_v1, %v1867_v5 }
 0x321   : > { %v6117_v37 = vadd.f32 %v1888_v53, %v6014_v42  ;;  %v6120_v15 = vadd.f32 %v1889_v38, %v6017_v41  ;;  %v1991_v21 = vpop.permute.xlu0 %1990 }
 0x322   : > { %v1853_v24 = vpop.permute.xlu1 %1852 }
 0x323   : > { %v1862_v62 = vsel %vm1858_vm4, %v1841_v32, %v1853_v24  ;;  %v1868_v42 = vsel %vm1858_vm4, %v1853_v24, %v1841_v32  ;;  %v2969_v24 = vld [vmem:[%s6584_s2 + $0x880] sm:$0xff] }
 0x324   : > { %v1890_v25 = vmul.f32 %v2943_v22, %v1862_v62  ;;  %v1891_v28 = vmul.f32 %v2944_v18, %v1868_v42  ;;  %v2970_v62 = vld [vmem:[%s6584_s2 + $0x888] sm:$0xff] }
 0x325   : > { %v2003_v41 = vpop.permute.xlu0 %2002 }
 0x326   : > { %v6133_v54 = vadd.f32 %v1890_v25, %v6041_v26  ;;  %v6136_v27 = vadd.f32 %v1891_v28, %v6044_v29  ;;  %v1993_v34 = vpop.permute.xlu1 %1992  ;;  %v2011_v42 = vsel %vm2006_vm6, %v1991_v21, %v2003_v41  ;;  %v2017_v25 = vsel %vm2006_vm6, %v2003_v41, %v1991_v21  ;;  %v2981_v21 = vld [vmem:[%s6584_s2 + $0x8e0] sm:$0xff]  ;;  %v2982_v41 = vld [vmem:[%s6584_s2 + $0x8e8] sm:$0xff] }
 0x329   : > { %v1761_v31 = vpop.permute.xlu0 %1760 }
 0x32a   : > { %v2005_v63 = vpop.permute.xlu1 %2004 }
 0x32d   : > { %v1773_v19 = vpop.permute.xlu0 %1772 }
 0x32e   : > { %v1785_v48 = vsel %vm1784_vm2, %v1761_v31, %v1773_v19  ;;  %v1791_v26 = vsel %vm1784_vm2, %v1773_v19, %v1761_v31  ;;  %v1763_v29 = vpop.permute.xlu1 %1762  ;;  %v2971_v31 = vld [vmem:[%s6584_s2 + $0x890] sm:$0xff]  ;;  %v2018_v19 = vsel %vm2006_vm6, %v2005_v63, %v1993_v34 }
 0x32f   : > { %v1810_v35 = vmul.f32 %v2925_v33, %v1785_v48  ;;  %v1811_v57 = vmul.f32 %v2926_v60, %v1791_v26  ;;  %v2972_v33 = vld [vmem:[%s6584_s2 + $0x898] sm:$0xff]  ;;  %v2012_v60 = vsel %vm2006_vm6, %v1993_v34, %v2005_v63  ;;  %v2983_v34 = vld [vmem:[%s6584_s2 + $0x8f0] sm:$0xff] }
 0x330   : > { %v2984_v63 = vld [vmem:[%s6584_s2 + $0x8f8] sm:$0xff] }
 0x331   : > { %v6148_v49 = vadd.f32 %v1810_v35, %v1748_v2  ;;  %v6150_v17 = vadd.f32 %v1811_v57, %v1749_v50  ;;  %v6152_v39 = vpop.permute.xlu0 %1912  ;;  %v2041_v35 = vmul.f32 %v2970_v62, %v2017_v25 }
 0x332   : > { %v1775_v20 = vpop.permute.xlu1 %1774 }
 0x333   : > { %v1786_v36 = vsel %vm1784_vm2, %v1763_v29, %v1775_v20  ;;  %v1792_v2 = vsel %vm1784_vm2, %v1775_v20, %v1763_v29  ;;  %v2040_v29 = vmul.f32 %v2969_v24, %v2011_v42  ;;  %v2042_v20 = vmul.f32 %v2971_v31, %v2012_v60  ;;  %v2996_v60 = vld [vmem:[%s6584_s2 + $0x958] sm:$0xff] }
 0x334   : > { %v1812_v0 = vmul.f32 %v2927_v51, %v1786_v36  ;;  %v1813_v50 = vmul.f32 %v2928_v55, %v1792_v2  ;;  %v2043_v36 = vmul.f32 %v2972_v33, %v2018_v19  ;;  %v2053_v25 = vadd.f32 %v2041_v35, %v6058_v59  ;;  %v2995_v33 = vld [vmem:[%s6584_s2 + $0x950] sm:$0xff] }
 0x335   : > { %v6164_v43 = vpop.permute.xlu0 %1924  ;;  %v2052_v42 = vadd.f32 %v2040_v29, %v6055_v4  ;;  %v2054_v19 = vadd.f32 %v2042_v20, %v6081_v47 }
 0x336   : > { %v6166_v23 = vadd.f32 %v1812_v0, %v1750_v40  ;;  %v6168_v30 = vadd.f32 %v1813_v50, %v1751_v3  ;;  %v6170_v44 = vpop.permute.xlu1 %1914 }
 0x339   : > { %v2065_v56 = vpop.permute.xlu0 %2064 }
 0x33a   : > { %v6172_v46 = vpop.permute.xlu1 %1926 }
 0x33d   : > { %v2077_v1 = vpop.permute.xlu0 %2076 }
 0x33e   : > { %v2067_v52 = vpop.permute.xlu1 %2066  ;;  %v2085_v48 = vsel %vm2080_vm7, %v2065_v56, %v2077_v1  ;;  %v2091_v26 = vsel %vm2080_vm7, %v2077_v1, %v2065_v56  ;;  %v2993_v56 = vld [vmem:[%s6584_s2 + $0x940] sm:$0xff]  ;;  %v2994_v1 = vld [vmem:[%s6584_s2 + $0x948] sm:$0xff] }
 0x33f   : > { %v2114_v0 = vmul.f32 %v2981_v21, %v2085_v48  ;;  %v2115_v50 = vmul.f32 %v2982_v41, %v2091_v26 }
 0x341   : > { %v6174_v58 = vpop.permute.xlu0 %1834  ;;  %v2126_v4 = vadd.f32 %v2114_v0, %v2052_v42  ;;  %v2127_v29 = vadd.f32 %v2115_v50, %v2053_v25  ;;  %v2954_v42 = vld [vmem:[%s6584_s2 + $0x808] sm:$0xff]  ;;  %v1935_v25 = vsel %vm1932_vm5, %v6152_v39, %v6164_v43 }
 0x342   : > { %v2079_v5 = vpop.permute.xlu1 %2078 }
 0x343   : > { %v2086_v57 = vsel %vm2080_vm7, %v2067_v52, %v2079_v5  ;;  %v2092_v51 = vsel %vm2080_vm7, %v2079_v5, %v2067_v52 }
 0x344   : > { %v2116_v5 = vmul.f32 %v2983_v34, %v2086_v57  ;;  %v2117_v62 = vmul.f32 %v2984_v63, %v2092_v51 }
 0x345   : > { %v6176_v32 = vpop.permute.xlu0 %1846 }
 0x346   : > { %v6178_v53 = vpop.permute.xlu1 %1836  ;;  %v2128_v35 = vadd.f32 %v2116_v5, %v2054_v19 }
 0x349   : > { %v6180_v38 = vpop.permute.xlu0 %1986 }
 0x34a   : > { %v6182_v40 = vpop.permute.xlu1 %1848 }
 0x34d   : > { %v6184_v3 = vpop.permute.xlu0 %1998 }
 0x34e   : > { %v6186_v22 = vpop.permute.xlu1 %1988 }
 0x351   : > { %v2139_v18 = vpop.permute.xlu0 %2138 }
 0x352   : > { %v6200_v28 = vpop.permute.xlu1 %2000 }
 0x355   : > { %v2151_v55 = vpop.permute.xlu0 %2150 }
 0x356   : > { %v2141_v2 = vpop.permute.xlu1 %2140  ;;  %v2159_v24 = vsel %vm2154_vm8, %v2139_v18, %v2151_v55  ;;  %v2165_v52 = vsel %vm2154_vm8, %v2151_v55, %v2139_v18  ;;  %v2055_v18 = vadd.f32 %v2043_v36, %v6084_v45 }
 0x357   : > { %v2188_v21 = vmul.f32 %v2993_v56, %v2159_v24  ;;  %v2189_v41 = vmul.f32 %v2994_v1, %v2165_v52 }
 0x358   : > { %v2129_v57 = vadd.f32 %v2117_v62, %v2055_v18  ;;  %v2953_v62 = vld [vmem:[%s6584_s2 + $0x800] sm:$0xff]  ;;  %v2955_v18 = vld [vmem:[%s6584_s2 + $0x810] sm:$0xff] }
 0x359   : > { %v6245_v31 = vpop.permute.xlu0 %1908  ;;  %v2201_v45 = vadd.f32 %v2189_v41, %v2127_v29  ;;  %v2200_v20 = vadd.f32 %v2188_v21, %v2126_v4  ;;  %v2956_v21 = vld [vmem:[%s6584_s2 + $0x818] sm:$0xff]  ;;  %v1936_v41 = vsel %vm1932_vm5, %v6170_v44, %v6172_v46  ;;  %v2965_v29 = vld [vmem:[%s6584_s2 + $0x860] sm:$0xff] }
 0x35a   : > { %v2153_v48 = vpop.permute.xlu1 %2152 }
 0x35b   : > { %v2160_v59 = vsel %vm2154_vm8, %v2141_v2, %v2153_v48  ;;  %v2166_v26 = vsel %vm2154_vm8, %v2153_v48, %v2141_v2 }
 0x35c   : > { %v2190_v34 = vmul.f32 %v2995_v33, %v2160_v59  ;;  %v2191_v63 = vmul.f32 %v2996_v60, %v2166_v26  ;;  %v1941_v33 = vsel %vm1932_vm5, %v6164_v43, %v6152_v39  ;;  %v1942_v39 = vsel %vm1932_vm5, %v6172_v46, %v6170_v44 }
 0x35d   : > { %v6259_v51 = vpop.permute.xlu0 %1920  ;;  %v1962_v43 = vmul.f32 %v2953_v62, %v1935_v25  ;;  %v1963_v48 = vmul.f32 %v2954_v42, %v1941_v33  ;;  %v1964_v59 = vmul.f32 %v2955_v18, %v1936_v41  ;;  %v1965_v26 = vmul.f32 %v2956_v21, %v1942_v39 }
 0x35e   : > { %v6261_v47 = vpop.permute.xlu1 %1910  ;;  %v2203_v55 = vadd.f32 %v2191_v63, %v2129_v57  ;;  %v2202_v36 = vadd.f32 %v2190_v34, %v2128_v35  ;;  %v2966_v35 = vld [vmem:[%s6584_s2 + $0x868] sm:$0xff]  ;;  %v2009_v34 = vsel %vm2006_vm6, %v6180_v38, %v6184_v3  ;;  %v2015_v44 = vsel %vm2006_vm6, %v6184_v3, %v6180_v38  ;;  %v2967_v63 = vld [vmem:[%s6584_s2 + $0x870] sm:$0xff]  ;;  %v2968_v57 = vld [vmem:[%s6584_s2 + $0x878] sm:$0xff] }
 0x35f   : > { %v2016_v38 = vsel %vm2006_vm6, %v6200_v28, %v6186_v22  ;;  %v1974_v3 = vadd.f32 %v1962_v43, %v6117_v37  ;;  %v2036_v62 = vmul.f32 %v2965_v29, %v2009_v34  ;;  %v2979_v37 = vld [vmem:[%s6584_s2 + $0x8d0] sm:$0xff]  ;;  %v1976_v33 = vadd.f32 %v1964_v59, %v6133_v54  ;;  %v2989_v43 = vld [vmem:[%s6584_s2 + $0x920] sm:$0xff] }
 0x360   : > { %v2209_v0 = vpack.c.bf16 %v2203_v55, %v2201_v45  ;;  %v2208_v56 = vpack.c.bf16 %v2202_v36, %v2200_v20  ;;  %v2010_v45 = vsel %vm2006_vm6, %v6186_v22, %v6200_v28  ;;  %v1975_v55 = vadd.f32 %v1963_v48, %v6120_v15  ;;  %v2977_v20 = vld [vmem:[%s6584_s2 + $0x8c0] sm:$0xff]  ;;  %v2978_v36 = vld [vmem:[%s6584_s2 + $0x8c8] sm:$0xff]  ;;  %v2980_v15 = vld [vmem:[%s6584_s2 + $0x8d8] sm:$0xff] }
 0x361   : > { %v2061_v1 = vpop.permute.xlu0 %2060  ;;  %v2037_v22 = vmul.f32 %v2966_v35, %v2015_v44  ;;  %v2039_v18 = vmul.f32 %v2968_v57, %v2016_v38  ;;  %v2990_v48 = vld [vmem:[%s6584_s2 + $0x928] sm:$0xff]  ;;  %v1860_v29 = vsel %vm1858_vm4, %v6178_v53, %v6182_v40  ;;  %v2048_v35 = vadd.f32 %v2036_v62, %v1974_v3  ;;  %v2940_v62 = vld [vmem:[%s6584_s2 + $0x798] sm:$0xff] }
 0x362   : > { %v6263_v24 = vpop.permute.xlu1 %1922  ;;  %2245 = vmatprep.subr.bf16.mxu1 %v2209_v0 }
 0x363   : > { %2246 = vmatpush1.bf16.msra.mxu1 %v2208_v56  ;;  %v2049_v34 = vadd.f32 %v2037_v22, %v1975_v55 }
 0x365   : > { %v2073_v2 = vpop.permute.xlu0 %2072 }
 0x366   : > { %v2063_v50 = vpop.permute.xlu1 %2062  ;;  %v2083_v0 = vsel %vm2080_vm7, %v2061_v1, %v2073_v2  ;;  %v2089_v56 = vsel %vm2080_vm7, %v2073_v2, %v2061_v1  ;;  %v1977_v1 = vadd.f32 %v1965_v26, %v6136_v27  ;;  %v2038_v2 = vmul.f32 %v2967_v63, %v2010_v45  ;;  %v2937_v63 = vld [vmem:[%s6584_s2 + $0x780] sm:$0xff] }
 0x367   : > { %v2110_v41 = vmul.f32 %v2977_v20, %v2083_v0  ;;  %v2111_v39 = vmul.f32 %v2978_v36, %v2089_v56  ;;  %v1859_v27 = vsel %vm1858_vm4, %v6174_v58, %v6176_v32  ;;  %v2939_v56 = vld [vmem:[%s6584_s2 + $0x790] sm:$0xff] }
 0x368   : > { %v2051_v57 = vadd.f32 %v2039_v18, %v1977_v1 }
 0x369   : > { %v6265_v52 = vpop.permute.xlu0 %1982  ;;  %v2122_v55 = vadd.f32 %v2110_v41, %v2048_v35  ;;  %v2123_v20 = vadd.f32 %v2111_v39, %v2049_v34  ;;  %v1886_v39 = vmul.f32 %v2939_v56, %v1860_v29  ;;  %v2952_v35 = vld [vmem:[%s6584_s2 + $0x7f8] sm:$0xff]  ;;  %v1934_v34 = vsel %vm1932_vm5, %v6261_v47, %v6263_v24 }
 0x36a   : > { %v2075_v5 = vpop.permute.xlu1 %2074 }
 0x36b   : > { %v2084_v28 = vsel %vm2080_vm7, %v2063_v50, %v2075_v5  ;;  %v2090_v42 = vsel %vm2080_vm7, %v2075_v5, %v2063_v50  ;;  %v1865_v5 = vsel %vm1858_vm4, %v6176_v32, %v6174_v58  ;;  %v2991_v58 = vld [vmem:[%s6584_s2 + $0x930] sm:$0xff]  ;;  %v2992_v32 = vld [vmem:[%s6584_s2 + $0x938] sm:$0xff] }
 0x36c   : > { %v2112_v59 = vmul.f32 %v2979_v37, %v2084_v28  ;;  %v2113_v26 = vmul.f32 %v2980_v15, %v2090_v42  ;;  %v1884_v42 = vmul.f32 %v2937_v63, %v1859_v27  ;;  %v1939_v27 = vsel %vm1932_vm5, %v6259_v51, %v6245_v31 }
 0x36d   : > { %v6281_v60 = vpop.permute.xlu0 %1994 }
 0x36e   : > { %v6283_v19 = vpop.permute.xlu1 %1984  ;;  %v2125_v37 = vadd.f32 %v2113_v26, %v2051_v57  ;;  %v1896_v26 = vadd.f32 %v1884_v42, %v6148_v49  ;;  %v1940_v49 = vsel %vm1932_vm5, %v6263_v24, %v6261_v47  ;;  %v2007_v63 = vsel %vm2006_vm6, %v6265_v52, %v6281_v60  ;;  %v2963_v57 = vld [vmem:[%s6584_s2 + $0x850] sm:$0xff] }
 0x36f   : > { %v2013_v47 = vsel %vm2006_vm6, %v6281_v60, %v6265_v52  ;;  %v1961_v52 = vmul.f32 %v2952_v35, %v1940_v49  ;;  %v2973_v60 = vld [vmem:[%s6584_s2 + $0x8a0] sm:$0xff] }
 0x371   : > { %v2135_v4 = vpop.permute.xlu0 %2134 }
 0x372   : > { %v6313_v46 = vpop.permute.xlu1 %1996 }
 0x375   : > { %v2147_v25 = vpop.permute.xlu0 %2146 }
 0x376   : > { %v2137_v21 = vpop.permute.xlu1 %2136  ;;  %v2157_v50 = vsel %vm2154_vm8, %v2135_v4, %v2147_v25  ;;  %v2163_v54 = vsel %vm2154_vm8, %v2147_v25, %v2135_v4  ;;  %v1866_v4 = vsel %vm1858_vm4, %v6182_v40, %v6178_v53  ;;  %v2938_v53 = vld [vmem:[%s6584_s2 + $0x788] sm:$0xff]  ;;  %v2050_v40 = vadd.f32 %v2038_v2, %v1976_v33 }
 0x377   : > { %v2184_v45 = vmul.f32 %v2989_v43, %v2157_v50  ;;  %v2185_v38 = vmul.f32 %v2990_v48, %v2163_v54  ;;  %v1885_v25 = vmul.f32 %v2938_v53, %v1865_v5  ;;  %v1887_v43 = vmul.f32 %v2940_v62, %v1866_v4  ;;  %v2949_v48 = vld [vmem:[%s6584_s2 + $0x7e0] sm:$0xff]  ;;  %v2950_v50 = vld [vmem:[%s6584_s2 + $0x7e8] sm:$0xff]  ;;  %v2951_v4 = vld [vmem:[%s6584_s2 + $0x7f0] sm:$0xff] }
 0x378   : > { %v2124_v22 = vadd.f32 %v2112_v59, %v2050_v40  ;;  %v1933_v54 = vsel %vm1932_vm5, %v6245_v31, %v6259_v51  ;;  %v1959_v51 = vmul.f32 %v2950_v50, %v1939_v27  ;;  %v1898_v53 = vadd.f32 %v1886_v39, %v6166_v23  ;;  %v2987_v27 = vld [vmem:[%s6584_s2 + $0x910] sm:$0xff] }
 0x379   : > { %v6379_v44 = vpop.permute.xlu0 %2056  ;;  %v2196_v1 = vadd.f32 %v2184_v45, %v2122_v55  ;;  %v2197_v2 = vadd.f32 %v2185_v38, %v2123_v20  ;;  %v1897_v29 = vadd.f32 %v1885_v25, %v6150_v17  ;;  %v1958_v17 = vmul.f32 %v2949_v48, %v1933_v54  ;;  %v2964_v45 = vld [vmem:[%s6584_s2 + $0x858] sm:$0xff] }
 0x37a   : > { %v2149_v3 = vpop.permute.xlu1 %2148  ;;  %v1899_v40 = vadd.f32 %v1887_v43, %v6168_v30  ;;  %v2008_v38 = vsel %vm2006_vm6, %v6283_v19, %v6313_v46  ;;  %v2014_v23 = vsel %vm2006_vm6, %v6313_v46, %v6283_v19  ;;  %v1960_v30 = vmul.f32 %v2951_v4, %v1934_v34 }
 0x37b   : > { %v2158_v36 = vsel %vm2154_vm8, %v2137_v21, %v2149_v3  ;;  %v2164_v0 = vsel %vm2154_vm8, %v2149_v3, %v2137_v21  ;;  %v2974_v3 = vld [vmem:[%s6584_s2 + $0x8a8] sm:$0xff] }
 0x37c   : > { %v2186_v15 = vmul.f32 %v2991_v58, %v2158_v36  ;;  %v2187_v28 = vmul.f32 %v2992_v32, %v2164_v0  ;;  %v2961_v58 = vld [vmem:[%s6584_s2 + $0x840] sm:$0xff]  ;;  %v2962_v32 = vld [vmem:[%s6584_s2 + $0x848] sm:$0xff]  ;;  %v2975_v36 = vld [vmem:[%s6584_s2 + $0x8b0] sm:$0xff]  ;;  %v1973_v39 = vadd.f32 %v1961_v52, %v1899_v40 }
 0x37d   : > { %v2069_v33 = vpop.permute.xlu0 %2068  ;;  %v2032_v19 = vmul.f32 %v2961_v58, %v2007_v63  ;;  %v2033_v46 = vmul.f32 %v2962_v32, %v2013_v47  ;;  %v2976_v0 = vld [vmem:[%s6584_s2 + $0x8b8] sm:$0xff] }
 0x37e   : > { %v2198_v18 = vadd.f32 %v2186_v15, %v2124_v22  ;;  %v2199_v41 = vadd.f32 %v2187_v28, %v2125_v37  ;;  %v2059_v21 = vpop.permute.xlu1 %2058  ;;  %v2081_v55 = vsel %vm2080_vm7, %v6379_v44, %v2069_v33  ;;  %v2087_v20 = vsel %vm2080_vm7, %v2069_v33, %v6379_v44 }
 0x37f   : > { %v1970_v37 = vadd.f32 %v1958_v17, %v1896_v26  ;;  %v1971_v15 = vadd.f32 %v1959_v51, %v1897_v29  ;;  %v2034_v44 = vmul.f32 %v2963_v57, %v2008_v38  ;;  %v2035_v28 = vmul.f32 %v2964_v45, %v2014_v23  ;;  %v3055_v38 = vld [vmem:[%s6585_s3] sm:$0xff]   ;;  %v3056_v23 = vld [vmem:[%s6585_s3 + $0x8] sm:$0xff]  }
 0x380   : > { %v2207_v5 = vpack.c.bf16 %v2199_v41, %v2197_v2  ;;  %v2206_v59 = vpack.c.bf16 %v2198_v18, %v2196_v1  ;;  %v2106_v25 = vmul.f32 %v2973_v60, %v2081_v55  ;;  %v2107_v33 = vmul.f32 %v2974_v3, %v2087_v20  ;;  %v2985_v1 = vld [vmem:[%s6584_s2 + $0x900] sm:$0xff]  ;;  %v2986_v2 = vld [vmem:[%s6584_s2 + $0x908] sm:$0xff] }
 0x381   : > { %v2131_v31 = vpop.permute.xlu0 %2130  ;;  %v2044_v50 = vadd.f32 %v2032_v19, %v1970_v37  ;;  %v2045_v54 = vadd.f32 %v2033_v46, %v1971_v15  ;;  %v2047_v26 = vadd.f32 %v2035_v28, %v1973_v39 }
 0x382   : > { %v2071_v24 = vpop.permute.xlu1 %2070  ;;  %2247 = vmatprep.subr.bf16.mxu1 %v2207_v5  ;;  %v2988_v5 = vld [vmem:[%s6584_s2 + $0x918] sm:$0xff] }
 0x383   : > { %2248 = vmatpush1.bf16.msra.mxu1 %v2206_v59  ;;  %v2082_v56 = vsel %vm2080_vm7, %v2059_v21, %v2071_v24  ;;  %v2088_v62 = vsel %vm2080_vm7, %v2071_v24, %v2059_v21  ;;  %v1972_v21 = vadd.f32 %v1960_v30, %v1898_v53  ;;  %v2118_v34 = vadd.f32 %v2106_v25, %v2044_v50  ;;  %v3057_v30 = vld [vmem:[%s6585_s3 + $0x10] sm:$0xff]  }
 0x384   : > { %v2108_v43 = vmul.f32 %v2975_v36, %v2082_v56  ;;  %v2109_v48 = vmul.f32 %v2976_v0, %v2088_v62  ;;  %v2119_v49 = vadd.f32 %v2107_v33, %v2045_v54  ;;  %v2301_v36 = vmax.f32 %v3189_v9, 0.0  ;;  %v294_v9 = vld [vmem:[%s6586_s4 + $0x10] sm:$0xff] }
 0x385   : > { %v2143_v22 = vpop.permute.xlu0 %2142  ;;  %v2046_v59 = vadd.f32 %v2034_v44, %v1972_v21  ;;  %v2300_v44 = vmax.f32 %v3183_v8, 0.0 }
 0x386   : > { %v2133_v42 = vpop.permute.xlu1 %2132  ;;  %v2155_v18 = vsel %vm2154_vm8, %v2131_v31, %v2143_v22  ;;  %v2161_v41 = vsel %vm2154_vm8, %v2143_v22, %v2131_v31  ;;  %v2121_v58 = vadd.f32 %v2109_v48, %v2047_v26  ;;  %v2299_v22 = vmax.f32 %v3181_v7, 0.0 }
 0x387   : > { %v2180_v29 = vmul.f32 %v2985_v1, %v2155_v18  ;;  %v2181_v4 = vmul.f32 %v2986_v2, %v2161_v41  ;;  %v2120_v51 = vadd.f32 %v2108_v43, %v2046_v59  ;;  %v2298_v1 = vmax.f32 %v3177_v6, 0.0 }
 0x388   : > { %v2315_v25 = vpack.c.bf16 %v2301_v36, %v2299_v22  ;;  %v2306_v18 = vmax.f32 %v3191_v10, 0.0  ;;  %v2307_v7 = vmax.f32 %v3197_v11, 0.0  ;;  %v2309_v43 = vmax.f32 %v3205_v13, 0.0 }
 0x389   : > { %v2192_v47 = vadd.f32 %v2180_v29, %v2118_v34  ;;  %v2193_v24 = vadd.f32 %v2181_v4, %v2119_v49  ;;  %v2314_v21 = vpack.c.bf16 %v2300_v44, %v2298_v1 }
 0x38a   : > { %v2145_v35 = vpop.permute.xlu1 %2144  ;;  %v2441_v54 = vadd.f32 %v2307_v7, %v2306_v18  ;;  %v2323_v10 = vpack.c.bf16 %v2309_v43, %v2307_v7 }
 0x38b   : > { %v2156_v31 = vsel %vm2154_vm8, %v2133_v42, %v2145_v35  ;;  %v2162_v17 = vsel %vm2154_vm8, %v2145_v35, %v2133_v42  ;;  %v2318_v35 = vpack.c.bf16 %v3215_v16, %v3207_v14  ;;  %v292_v16 = vld [vmem:[%s6586_s4] sm:$0xff] }
 0x38c   : > { %v2182_v32 = vmul.f32 %v2987_v27, %v2156_v31  ;;  %v2183_v63 = vmul.f32 %v2988_v5, %v2162_v17  ;;  %v2308_v27 = vmax.f32 %v3199_v12, 0.0 }
 0x38e   : > { %v2194_v53 = vadd.f32 %v2182_v32, %v2120_v51  ;;  %v2195_v40 = vadd.f32 %v2183_v63, %v2121_v58  ;;  %v2444_v11 = vadd.f32 %v2309_v43, %v2308_v27  ;;  %v2322_v29 = vpack.c.bf16 %v2308_v27, %v2306_v18 }
 0x390   : > { %v2205_v57 = vpack.c.bf16 %v2195_v40, %v2193_v24  ;;  %v2204_v45 = vpack.c.bf16 %v2194_v53, %v2192_v47 }
 0x392   : > { %2249 = vmatprep.subr.bf16.mxu1 %v2205_v57 }
 0x393   : > { %2250 = vmatpush1.bf16.msra.mxu1 %v2204_v45  ;;  %v293_v45 = vld [vmem:[%s6586_s4 + $0x8] sm:$0xff] }
 0x396   : > { %3000 = vmatmul.mubr.msk.bf16.vlgmr.msra.gmra.mxu1 %vm2225_vm9, %v3055_v38 }
 0x397   : > { %2277 = vmatprep.mubr.bf16.mxu1 %v7064_v61 }
 0x39e   : > { %3001 = vmatmul.mubr.msk.bf16.gmra.mxu1 %vm2225_vm9, %v3056_v23 }
 0x39f   : > { %2287 = vmatprep.mubr.bf16.mxu1 %v7064_v61 }
 0x3a6   : > { %3002 = vmatmul.mubr.msk.bf16.gmra.mxu1 %vm2225_vm9, %v3057_v30  ;;  %v296_v30 = vpack.c.bf16 %v293_v45, %v292_v16 }
 0x3a7   : > { %2420 = vmatprep.mubr.bf16.mxu1 %v7064_v61 }
 0x456   : > { %v6517_v52 = vpop.f32.mrf.mxu1 }
 0x457   : > { %v2302_v0 = vmax.f32 %v6517_v52, 0.0  ;;  %v295_v52 = vld [vmem:[%s6586_s4 + $0x18] sm:$0xff] }
 0x458   : > { %v6519_v60 = vpop.f32.mrf.mxu1 }
 0x459   : > { %v2303_v19 = vmax.f32 %v6519_v60, 0.0  ;;  %v297_v60 = vpack.c.bf16 %v295_v52, %v294_v9 }
 0x45a   : > { %v6521_v3 = vpop.f32.mrf.mxu1 }
 0x45b   : > { %v2304_v55 = vmax.f32 %v6521_v3, 0.0 }
 0x45c   : > { %v2275_v20 = vpop.f32.mrf.mxu1 }
 0x45d   : > { %v2305_v46 = vmax.f32 %v2275_v20, 0.0  ;;  %v2316_v37 = vpack.c.bf16 %v2304_v55, %v2302_v0 }
 0x45e   : > { %v2279_v56 = vpop.f32.mrf.mxu1 }
 0x45f   : > { %v2317_v62 = vpack.c.bf16 %v2305_v46, %v2303_v19  ;;  %v2310_v28 = vmax.f32 %v2279_v56, 0.0 }
 0x460   : > { %v2281_v15 = vpop.f32.mrf.mxu1 }
 0x461   : > { %v2311_v42 = vmax.f32 %v2281_v15, 0.0  ;;  %2400 = vmatprep.subr.bf16.mxu1 %v2317_v62 }
 0x462   : > { %v2283_v33 = vpop.f32.mrf.mxu1  ;;  %2401 = vmatpush1.bf16.msra.mxu1 %v2316_v37 }
 0x463   : > { %v2447_v2 = vadd.f32 %v2311_v42, %v2310_v28  ;;  %2402 = vmatprep.subr.bf16.mxu1 %v2315_v25  ;;  %v2312_v39 = vmax.f32 %v2283_v33, 0.0  ;;  %v300_v25 = vld [vmem:[%s6588_s6] sm:$0xff]  ;;  %v301_v33 = vld [vmem:[%s6588_s6 + $0x8] sm:$0xff] }
 0x464   : > { %v2285_v41 = vpop.f32.mrf.mxu1 }
 0x465   : > { %v2313_v8 = vmax.f32 %v2285_v41, 0.0  ;;  %2448 = vadd.xlane.f32.xlu0 %v2447_v2  ;;  %v2324_v5 = vpack.c.bf16 %v2312_v39, %v2310_v28 }
 0x466   : > { %2403 = vmatpush1.bf16.msra.mxu1 %v2314_v21  ;;  %v2289_v6 = vpop.f32.mrf.mxu1 }
 0x467   : > { %v2325_v48 = vpack.c.bf16 %v2313_v8, %v2311_v42  ;;  %v2450_v50 = vadd.f32 %v2313_v8, %v2312_v39  ;;  %v3107_v42 = vmov 0.0  }
 0x468   : > { %v2291_v59 = vpop.f32.mrf.mxu1 }
 0x469   : > { %2442 = vadd.xlane.f32.xlu0 %v2441_v54  ;;  %2451 = vadd.xlane.f32.xlu1 %v2450_v50 }
 0x46a   : > { %2338 = vmatprep.subr.bf16.mxu0 %v2325_v48  ;;  %v2293_v26 = vpop.f32.mrf.mxu1 }
 0x46b   : > { %2339 = vmatpush1.bf16.xpose.msra.mxu0 %v2324_v5  ;;  %v2320_v12 = vpack.c.bf16 %v2293_v26, %v2289_v6 }
 0x46c   : > { %2340 = vmatprep.subr.bf16.mxu0 %v2323_v10  ;;  %v2295_v13 = vpop.f32.mrf.mxu1 }
 0x46d   : > { %2445 = vadd.xlane.f32.xlu0 %v2444_v11  ;;  %v2321_v4 = vpack.c.bf16 %v2295_v13, %v2291_v59 }
 0x473   : > { %2341 = vmatpush1.bf16.xpose.msra.mxu0 %v2322_v29 }
 0x47a   : > { %2359 = vmatmul.mubr.bf16.vlgmr.msra.gmra.mxu0 %v2318_v35  ;;  %2542 = vperm.xlu1 %3047, %v300_v25  }
 0x47b   : > { %2366 = vmatprep.mubr.bf16.mxu0 %v2321_v4 }
 0x482   : > { %2367 = vmatmul.mubr.bf16.gmra.mxu0 %v2320_v12 }
 0x483   : > { %2503 = vmatprep.mubr.bf16.mxu0 %v7064_v61  ;;  %2547 = vperm.xlu0 %3048, %v301_v33  }
 0x4ee   : > { %v2449_v34 = vpop.xlane.xlu0 %2448 }
 0x4ef   : > { %v2457_v17 = vmul.f32 %v2449_v34, %v2302_v0  ;;  %v2458_v51 = vmul.f32 %v2449_v34, %v2303_v19 }
 0x4f2   : > { %v2443_v49 = vpop.xlane.xlu0 %2442  ;;  %v2452_v31 = vpop.xlane.xlu1 %2451 }
 0x4f3   : > { %v2459_v58 = vmul.f32 %v2452_v31, %v2304_v55  ;;  %v2460_v32 = vmul.f32 %v2452_v31, %v2305_v46  ;;  %v2453_v53 = vmul.f32 %v2443_v49, %v2298_v1  ;;  %v2454_v40 = vmul.f32 %v2443_v49, %v2299_v22 }
 0x4f5   : > { %v2463_v63 = vpack.c.bf16 %v2459_v58, %v2457_v17  ;;  %v2464_v47 = vpack.c.bf16 %v2460_v32, %v2458_v51 }
 0x4f6   : > { %v2446_v24 = vpop.xlane.xlu0 %2445 }
 0x4f7   : > { %v2455_v57 = vmul.f32 %v2446_v24, %v2300_v44  ;;  %v2456_v14 = vmul.f32 %v2446_v24, %v2301_v36  ;;  %2483 = vmatprep.subr.bf16.mxu0 %v2464_v47 }
 0x4f8   : > { %2484 = vmatpush1.bf16.msra.mxu0 %v2463_v63 }
 0x4f9   : > { %v2461_v38 = vpack.c.bf16 %v2455_v57, %v2453_v53  ;;  %v2462_v23 = vpack.c.bf16 %v2456_v14, %v2454_v40 }
 0x4fb   : > { %2485 = vmatprep.subr.bf16.mxu0 %v2462_v23  ;;  %v2543_v23 = vpop.permute.xlu1 %2542 }
 0x4fc   : > { %2486 = vmatpush1.bf16.msra.mxu0 %v2461_v38  ;;  %v299_v38 = vld [vmem:[%s6587_s5 + $0x8] sm:$0xff] }
 0x4ff   : > { %3005 = vmatmul.mubr.msk.bf16.vlgmr.msra.gmra.mxu0 %vm2381_vm10, %v296_v30 }
 0x500   : > { %2513 = vmatprep.mubr.bf16.mxu0 %v7064_v61 }
 0x507   : > { %3006 = vmatmul.mubr.msk.bf16.gmra.mxu0 %vm2381_vm10, %v297_v60  ;;  %v2548_v60 = vpop.permute.xlu0 %2547 }
 0x53a   : > { %v2360_v3 = vpop.f32.mrf.mxu0 }
 0x53b   : > { %v2375_v19 = vmul.f32 %v2360_v3, %v292_v16 }
 0x53c   : > { %v2362_v55 = vpop.f32.mrf.mxu0 }
 0x53e   : > { %v2363_v20 = vpop.f32.mrf.mxu0 }
 0x53f   : > { %v2376_v46 = vmul.f32 %v2363_v20, %v293_v45  ;;  %v298_v45 = vld [vmem:[%s6587_s5] sm:$0xff] }
 0x540   : > { %v2365_v36 = vpop.f32.mrf.mxu0 }
 0x541   : > { %v2379_v0 = vpack.c.bf16 %v2376_v46, %v2375_v19 }
 0x542   : > { %v2368_v56 = vpop.f32.mrf.mxu0 }
 0x543   : > { %3003 = vmatmul.mubr.msk.bf16.vlgmr.msra.gmra.mxu1 %vm2381_vm10, %v2379_v0  ;;  %v2377_v37 = vmul.f32 %v2368_v56, %v294_v9 }
 0x544   : > { %v2370_v62 = vpop.f32.mrf.mxu0  ;;  %2430 = vmatprep.mubr.bf16.mxu1 %v7064_v61 }
 0x546   : > { %v2371_v22 = vpop.f32.mrf.mxu0 }
 0x547   : > { %v2378_v15 = vmul.f32 %v2371_v22, %v295_v52 }
 0x548   : > { %v2373_v44 = vpop.f32.mrf.mxu0 }
 0x549   : > { %v2380_v28 = vpack.c.bf16 %v2378_v15, %v2377_v37 }
 0x54b   : > { %3004 = vmatmul.mubr.msk.bf16.gmra.mxu1 %vm2381_vm10, %v2380_v28 }
 0x54c   : > { %2620 = vmatprep.mubr.f32.mxu1 %v3107_v42 }
 0x5bf   : > { %v2505_v61 = vpop.f32.mrf.mxu0 }
 0x5c0   : > { %v2506_v54 = vadd.f32 1e-15, %v2505_v61 }
 0x5c1   : > { %v2507_v1 = vpop.f32.mrf.mxu0 }
 0x5c2   : > { %v2508_v11 = vadd.f32 1e-15, %v2507_v1 }
 0x5c3   : > { %v2509_v2 = vpop.f32.mrf.mxu0 }
 0x5c4   : > { %v2510_v5 = vadd.f32 1e-15, %v2509_v2 }
 0x5c5   : > { %v2511_v18 = vpop.f32.mrf.mxu0 }
 0x5c6   : > { %v2512_v6 = vadd.f32 1e-15, %v2511_v18 }
 0x5c7   : > { %v2515_v7 = vpop.f32.mrf.mxu0 }
 0x5c8   : > { %v2516_v8 = vadd.f32 1e-15, %v2515_v7 }
 0x5c9   : > { %v2517_v41 = vpop.f32.mrf.mxu0 }
 0x5ca   : > { %v2518_v50 = vadd.f32 1e-15, %v2517_v41  ;;  %3058 = vrcp.f32 %v2516_v8 }
 0x5cb   : > { %v2519_v21 = vpop.f32.mrf.mxu0 }
 0x5cc   : > { %v2520_v48 = vadd.f32 1e-15, %v2519_v21 }
 0x5cd   : > { %v2521_v39 = vpop.f32.mrf.mxu0 }
 0x5ce   : > { %v2522_v43 = vadd.f32 1e-15, %v2521_v39 }
 0x5d0   : > { %3060 = vrcp.f32 %v2522_v43 }
 0x5d1   : > { %3062 = vrcp.f32 %v2520_v48 }
 0x5d2   : > { %3064 = vrcp.f32 %v2518_v50 }
 0x5d3   : > { %3066 = vrcp.f32 %v2506_v54 }
 0x5d4   : > { %3068 = vrcp.f32 %v2512_v6 }
 0x5d5   : > { %3070 = vrcp.f32 %v2510_v5 }
 0x5d6   : > { %3072 = vrcp.f32 %v2508_v11 }
 0x5d7   : > { %v3059_v35 = vpop.eup %3058 }
 0x5dd   : > { %v3061_v12 = vpop.eup %3060 }
 0x5de   : > { %v3063_v49 = vpop.eup %3062 }
 0x5df   : > { %v3065_v17 = vpop.eup %3064 }
 0x5e0   : > { %v3067_v58 = vpop.eup %3066 }
 0x5e1   : > { %v3069_v63 = vpop.eup %3068 }
 0x5e2   : > { %v3071_v24 = vpop.eup %3070 }
 0x5e3   : > { %v3073_v40 = vpop.eup %3072 }
 0x603   : > { %v2422_v27 = vpop.f32.mrf.mxu1 }
 0x604   : > { %v2532_v16 = vmul.f32 %v3067_v58, %v2422_v27 }
 0x605   : > { %v2424_v10 = vpop.f32.mrf.mxu1 }
 0x606   : > { %v2533_v14 = vmul.f32 %v3073_v40, %v2424_v10 }
 0x607   : > { %v2426_v59 = vpop.f32.mrf.mxu1 }
 0x608   : > { %v2534_v57 = vmul.f32 %v3071_v24, %v2426_v59 }
 0x609   : > { %v2428_v26 = vpop.f32.mrf.mxu1 }
 0x60a   : > { %v2535_v53 = vmul.f32 %v3069_v63, %v2428_v26 }
 0x60b   : > { %v2432_v29 = vpop.f32.mrf.mxu1 }
 0x60c   : > { %v2536_v47 = vmul.f32 %v3059_v35, %v2432_v29 }
 0x60d   : > { %v2434_v13 = vpop.f32.mrf.mxu1 }
 0x60e   : > { %v2537_v32 = vmul.f32 %v3065_v17, %v2434_v13 }
 0x60f   : > { %v2436_v4 = vpop.f32.mrf.mxu1 }
 0x610   : > { %v2538_v51 = vmul.f32 %v3063_v49, %v2436_v4 }
 0x611   : > { %v2438_v34 = vpop.f32.mrf.mxu1 }
 0x612   : > { %v2539_v31 = vmul.f32 %v3061_v12, %v2438_v34 }
 0x614   : > { %2580 = vmatprep.subr.mxu1 %v2539_v31 }
 0x615   : > { %2581 = vmatpush1.msra.mxu1 %v2538_v51 }
 0x616   : > { %2582 = vmatprep.subr.mxu1 %v2537_v32 }
 0x617   : > { %2583 = vmatpush1.msra.mxu1 %v2536_v47 }
 0x618   : > { %2584 = vmatprep.subr.mxu1 %v2535_v53 }
 0x619   : > { %2585 = vmatpush1.msra.mxu1 %v2534_v57 }
 0x61a   : > { %2586 = vmatprep.subr.mxu1 %v2533_v14 }
 0x61b   : > { %2587 = vmatpush1.msra.mxu1 %v2532_v16 }
 0x61c   : > { %3007 = vmatmul.mubr.msk.f32.vlgmr.msra.gmra.mxu1 %vm2381_vm10, %v298_v45 }
 0x61d   : > { %2626 = vmatprep.mubr.f32.mxu1 %v3107_v42 }
 0x620   : > { %3008 = vmatmul.mubr.msk.f32.gmra.mxu1 %vm2381_vm10, %v299_v38 }
 0x6dc   : > { %v2622_v30 = vpop.f32.mrf.mxu1 }
 0x6dd   : > { %v2623_v9 = vadd.f32 %v2622_v30, %v2543_v23 }
 0x6de   : > { %v2624_v52 = vpop.f32.mrf.mxu1 }
 0x6df   : > { %2633 = vst [vmem:[%s278_s19] sm:$0xff] %v2623_v9  ;;  %v2625_v3 = vadd.f32 %v2624_v52, %v2543_v23 }
 0x6e0   : > { %v2628_v55 = vpop.f32.mrf.mxu1 }
 0x6e1   : > { %2634 = vst [vmem:[%s278_s19 + $0x8] sm:$0xff] %v2625_v3  ;;  %v2629_v20 = vadd.f32 %v2628_v55, %v2548_v60 }
 0x6e2   : > { %v2630_v19 = vpop.f32.mrf.mxu1 }
 0x6e3   : > { %2635 = vst [vmem:[%s278_s19 + $0x10] sm:$0xff] %v2629_v20  ;;  %v2631_v46 = vadd.f32 %v2630_v19, %v2548_v60 }
 0x6e5   : > { %2636 = vst [vmem:[%s278_s19 + $0x18] sm:$0xff] %v2631_v46 }
 0x6e6 PF: > { %s17_s24 = sadd.s32 1, %s3080_s24  }
 0x6e7   : > { %p14_p4 = scmp.ge.s32.totalorder %s17_s24, 4  }
 0x6e9   :  { %16 = sbr.rel (!%p14_p4) target bundleno = 1 (0x1), region = 102 }

</bundles_post_ra>
